<compile_context>
chip_gen: v5e
topology: v5e:2x2
jax: 0.10.0
libtpu: 0.0.40
codegen_flags: <defaults>
</compile_context>

<pallas_src>
import functools

import jax
import jax.numpy as jnp
import numpy as np
from jax.experimental import pallas as pl
from jax.experimental.pallas import tpu as pltpu


# bf16 IO for the attention core (f32 accumulation / softmax inside the kernel).
# Set to jnp.float32 to recover near-exact f32 forward semantics at 2x the DMA
# bytes (the test tolerance below could then be tightened to ~1e-2).
COMPUTE_DTYPE = jnp.bfloat16


def _cdiv(a, b):
    return -(-a // b)


def _ceil_to(x, m):
    return _cdiv(x, m) * m


# ----------------------------------------------------------------------------
# Generation-aware hardware model: physical VMEM + TensorCores per chip.
# ----------------------------------------------------------------------------
def _detect_tpu_hw():
    phys_vmem, num_tc = None, None
    try:
        kind = jax.devices()[0].device_kind.lower()
    except Exception:
        kind = ""
    if ("v5 lite" in kind) or ("v5e" in kind) or ("v6" in kind):
        phys_vmem, num_tc = 128 * 1024 * 1024, 1          # v5e / v6e: 1 TC, 128 MiB
    elif "7" in kind:
        phys_vmem, num_tc = 64 * 1024 * 1024, 2           # v7x: 2 TCs, 64 MiB / TC
    if phys_vmem is None:
        try:
            v = getattr(pltpu.get_tpu_info(), "vmem_capacity_bytes", None)
            if v:
                phys_vmem = int(v)
        except Exception:
            pass
    if phys_vmem is None:
        # Unknown chip: assume the smallest per-core VMEM among the targets
        # (64 MiB) so the scoped limit below is always legal.
        phys_vmem = 64 * 1024 * 1024
    if num_tc is None:
        # 64 MiB/TC chips (v7x) have 2 TensorCores; 128 MiB chips have 1.
        num_tc = 2 if phys_vmem <= 80 * 1024 * 1024 else 1
    return phys_vmem, num_tc


_PHYS_VMEM_BYTES, _NUM_TC = _detect_tpu_hw()
# Raise the scoped-VMEM limit well past the 16/32 MiB defaults; leave 25% of
# physical VMEM for the compiler / pipelining machinery.
_VMEM_LIMIT_BYTES = (_PHYS_VMEM_BYTES // 4) * 3
# Block-sizing budget: keep further headroom under the scoped limit.
_BLOCK_BUDGET_BYTES = (_VMEM_LIMIT_BYTES // 4) * 3


def _tile_bytes(minor2_shape, itemsize):
    """(8/16,128)-tile-padded VMEM bytes of a 2-D slab of the given dtype."""
    sub = 8 * max(1, 4 // itemsize)                       # f32: 8, bf16: 16
    rows = _ceil_to(max(1, minor2_shape[0]), sub)
    lanes = _ceil_to(max(1, minor2_shape[1]), 128)
    return rows * lanes * itemsize


def _choose_block(num_groups, bytes_per_group):
    """Largest group-block that fits the VMEM budget; on megacore chips keep at
    least one grid step per TensorCore."""
    cap = max(1, _BLOCK_BUDGET_BYTES // max(1, bytes_per_group))
    if _NUM_TC > 1 and num_groups > 1:
        cap = min(cap, _cdiv(num_groups, _NUM_TC))
    block = max(1, min(cap, num_groups))
    g_pad = _ceil_to(num_groups, block)
    return block, g_pad


def _pad_groups(x, g_pad):
    g = x.shape[0]
    if g == g_pad:
        return x
    return jnp.pad(x, [(0, g_pad - g)] + [(0, 0)] * (x.ndim - 1))


# ----------------------------------------------------------------------------
# Pallas kernels: batched softmax-attention cores over (instance, head) groups.
# Projections are hoisted outside; Q is pre-scaled (folded into Wq).
# Two independent problems ("a" = *_pre, "b" = *_pos) share each grid step.
# ----------------------------------------------------------------------------
def _attn_lq1_kernel(qa_ref, ka_ref, va_ref, qb_ref, kb_ref, vb_ref,
                     oa_ref, ob_ref):
    """Lq == 1 core.  Blocks: q/out (G, 1, dh), k/v (G, Lk, dh).

    Scores / weighting are VPU broadcast-multiplies with XLU keepdims
    reductions (lane reduce over dh, sublane reduce over Lk): no per-group MXU
    matmuls and no layout-changing reshapes.  Softmax in f32."""
    def _one(q_ref, k_ref, v_ref, o_ref):
        q = q_ref[...].astype(jnp.float32)                       # (G, 1, dh)
        k = k_ref[...]                                           # (G, Lk, dh)
        v = v_ref[...]                                           # (G, Lk, dh)
        s = jnp.sum(q * k, axis=-1, keepdims=True)               # (G, Lk, 1) f32
        s = s - jnp.max(s, axis=1, keepdims=True)
        p = jnp.exp(s)
        inv = pl.reciprocal(jnp.sum(p, axis=1, keepdims=True), approx=True)
        attn = p * inv                                           # (G, Lk, 1) f32
        ctx = jnp.sum(attn * v, axis=1, keepdims=True)           # (G, 1, dh) f32
        o_ref[...] = ctx.astype(o_ref.dtype)

    _one(qa_ref, ka_ref, va_ref, oa_ref)
    _one(qb_ref, kb_ref, vb_ref, ob_ref)


def _attn_seq_kernel(qa_ref, ka_ref, va_ref, qb_ref, kb_ref, vb_ref,
                     oa_ref, ob_ref):
    """General-Lq core (sentence stage).  Blocks: q/out (G, Lq, dh),
    k/v (G, Lk, dh).  Head-batched MXU contractions with f32 accumulation."""
    def _one(q_ref, k_ref, v_ref, o_ref):
        q = q_ref[...]
        k = k_ref[...]
        v = v_ref[...]
        s = jnp.einsum('gqd,gkd->gqk', q, k,
                       preferred_element_type=jnp.float32)       # (G, Lq, Lk)
        s = s - jnp.max(s, axis=-1, keepdims=True)
        p = jnp.exp(s)
        inv = pl.reciprocal(jnp.sum(p, axis=-1, keepdims=True), approx=True)
        attn = (p * inv).astype(v.dtype)
        ctx = jnp.einsum('gqk,gkd->gqd', attn, v,
                         preferred_element_type=jnp.float32)     # (G, Lq, dh)
        o_ref[...] = ctx.astype(o_ref.dtype)

    _one(qa_ref, ka_ref, va_ref, oa_ref)
    _one(qb_ref, kb_ref, vb_ref, ob_ref)


def _run_fused_core(kernel, q_a, k_a, v_a, q_b, k_b, v_b, bytes_per_group):
    """Shared driver: pad the group axis, pick block_g, launch the fused call."""
    G = q_a.shape[0]
    block_g, g_pad = _choose_block(G, bytes_per_group)
    args = [_pad_groups(t, g_pad) for t in (q_a, k_a, v_a, q_b, k_b, v_b)]

    q_shape = q_a.shape[1:]
    kv_shape = k_a.shape[1:]
    q_spec = pl.BlockSpec((block_g,) + q_shape,
                          lambda i: (i,) + (0,) * len(q_shape))
    kv_spec = pl.BlockSpec((block_g,) + kv_shape,
                           lambda i: (i,) + (0,) * len(kv_shape))
    out_sds = jax.ShapeDtypeStruct((g_pad,) + q_shape, q_a.dtype)

    oa, ob = pl.pallas_call(
        kernel,
        out_shape=(out_sds, out_sds),
        grid=(g_pad // block_g,),
        in_specs=[q_spec, kv_spec, kv_spec, q_spec, kv_spec, kv_spec],
        out_specs=[q_spec, q_spec],
        compiler_params=pltpu.CompilerParams(
            dimension_semantics=("parallel",),
            vmem_limit_bytes=_VMEM_LIMIT_BYTES),
    )(*args)
    return oa[:G], ob[:G]


def _lq1_bytes_per_group(Lk, dh, io_itemsize):
    # Double-buffered IO blocks (pre + pos); q/out are single sublane-padded rows.
    io = 2 * (2 * _tile_bytes((1, dh), io_itemsize)          # q + out
              + 2 * _tile_bytes((Lk, dh), io_itemsize))      # k + v
    io *= 2                                                  # double buffering
    # f32 temporaries per problem: broadcast products (Lk, dh) x2, softmax
    # column vectors (Lk, 1) x3, ctx row (1, dh).
    tmp = 2 * (2 * _tile_bytes((Lk, dh), 4)
               + 3 * _tile_bytes((Lk, 1), 4)
               + _tile_bytes((1, dh), 4))
    return io + tmp


def _seq_bytes_per_group(Lq, Lk, dh, io_itemsize):
    io = 2 * (2 * _tile_bytes((Lq, dh), io_itemsize)
              + 2 * _tile_bytes((Lk, dh), io_itemsize))
    io *= 2
    tmp = 2 * (3 * _tile_bytes((Lq, Lk), 4) + 2 * _tile_bytes((Lq, dh), 4))
    return io + tmp


def fused_attention_core_lq1(q_a, k_a, v_a, q_b, k_b, v_b):
    _, _, dh = q_a.shape
    _, Lk, _ = k_a.shape
    it = jnp.dtype(q_a.dtype).itemsize
    return _run_fused_core(_attn_lq1_kernel, q_a, k_a, v_a, q_b, k_b, v_b,
                           _lq1_bytes_per_group(Lk, dh, it))


def fused_attention_core_seq(q_a, k_a, v_a, q_b, k_b, v_b):
    _, Lq, dh = q_a.shape
    _, Lk, _ = k_a.shape
    it = jnp.dtype(q_a.dtype).itemsize
    return _run_fused_core(_attn_seq_kernel, q_a, k_a, v_a, q_b, k_b, v_b,
                           _seq_bytes_per_group(Lq, Lk, dh, it))


# ----------------------------------------------------------------------------
# Hoisted projections (large MXU-shaped matmuls in XLA) + head plumbing.
# ----------------------------------------------------------------------------
def _project_to_heads_seq(x, W, b, head_count):
    """(N, L, D) @ (D, D) + b -> head-major (N*H, L, dh).

    NOTE: 'nld,dhf->nhlf' asks XLA to emit the head-major layout directly from
    the projection matmul; if profiling shows a materialized transpose on the
    large token-stage K/V, move the head split into a kernel grid axis."""
    N, L, D = x.shape
    dh = D // head_count
    y = jnp.einsum('nld,dhf->nhlf', x, W.reshape(D, head_count, dh),
                   preferred_element_type=jnp.float32)
    y = y + b.reshape(head_count, dh)[None, :, None, :]
    return y.reshape(N * head_count, L, dh)


def _project_to_heads_lq1(x2d, W, b, head_count):
    """(N, D) @ (D, D) + b -> (N*H, 1, dh) (contiguous; no transpose needed)."""
    N, D = x2d.shape
    dh = D // head_count
    y = jnp.dot(x2d, W, preferred_element_type=jnp.float32) + b
    return y.reshape(N * head_count, 1, dh)


def _project_from_heads_lq1(ctx_g, Wo, bo, num_inst, D):
    """(N*H, 1, dh) -> (N, D) via the output linear (head merge is a reshape)."""
    ctx = ctx_g.reshape(num_inst, D).astype(jnp.float32)
    return jnp.dot(ctx, Wo, preferred_element_type=jnp.float32) + bo


def _project_from_heads_seq(ctx_g, Wo, bo, num_inst, head_count, Lq, D):
    dh = D // head_count
    ctx = ctx_g.reshape(num_inst, head_count, Lq, dh).astype(jnp.float32)
    out = jnp.einsum('nhqf,hfe->nqe', ctx, Wo.reshape(head_count, dh, D),
                     preferred_element_type=jnp.float32)
    return out + bo


# ----------------------------------------------------------------------------
# Module forward: Context_Hierarchical_Attention
# ----------------------------------------------------------------------------
def context_hierarchical_attention(doc_sents_h, ctx_pre_tokens_h,
                                   ctx_pos_tokens_h, params, head_count):
    B, L, D = doc_sents_h.shape
    assert D % head_count == 0
    dh = D // head_count
    scale = 1.0 / float(np.sqrt(dh))
    cd = COMPUTE_DTYPE

    def qkv_lq1(query2d, key_value, prm):
        Wq, bq, Wk, bk, Wv, bv, _, _ = prm
        # Fold the 1/sqrt(dh) score scale into the Q projection weights/bias.
        q = _project_to_heads_lq1(query2d, Wq * scale, bq * scale, head_count)
        k = _project_to_heads_seq(key_value, Wk, bk, head_count)
        v = _project_to_heads_seq(key_value, Wv, bv, head_count)
        return q.astype(cd), k.astype(cd), v.astype(cd)

    def qkv_seq(query, key_value, prm):
        Wq, bq, Wk, bk, Wv, bv, _, _ = prm
        q = _project_to_heads_seq(query, Wq * scale, bq * scale, head_count)
        k = _project_to_heads_seq(key_value, Wk, bk, head_count)
        v = _project_to_heads_seq(key_value, Wv, bv, head_count)
        return q.astype(cd), k.astype(cd), v.astype(cd)

    # ---- Context_Token_Attention: each sentence (Lq=1 query) attends over its
    # own L-token context.  Groups = (B*L sentences) x H heads; pre & pos fused.
    N_tok = B * L
    q_tok2d = doc_sents_h.reshape(N_tok, D)
    kv_pre = ctx_pre_tokens_h.reshape(N_tok, L, D)
    kv_pos = ctx_pos_tokens_h.reshape(N_tok, L, D)

    qa, ka, va = qkv_lq1(q_tok2d, kv_pre, params['tok_pre'])
    qb, kb, vb = qkv_lq1(q_tok2d, kv_pos, params['tok_pos'])
    ca, cb = fused_attention_core_lq1(qa, ka, va, qb, kb, vb)
    ctx_sents_pre = _project_from_heads_lq1(
        ca, params['tok_pre'][6], params['tok_pre'][7], N_tok, D).reshape(B, L, D)
    ctx_sents_pos = _project_from_heads_lq1(
        cb, params['tok_pos'][6], params['tok_pos'][7], N_tok, D).reshape(B, L, D)

    # ---- Context_Sent_Attention: doc_sents_h (Lq=L) attends over the
    # sentence-level contexts.  Groups = B documents x H heads; pre & pos fused.
    qa2, ka2, va2 = qkv_seq(doc_sents_h, ctx_sents_pre, params['sent_pre'])
    qb2, kb2, vb2 = qkv_seq(doc_sents_h, ctx_sents_pos, params['sent_pos'])
    sa, sb = fused_attention_core_seq(qa2, ka2, va2, qb2, kb2, vb2)
    out_pre = _project_from_heads_seq(sa, params['sent_pre'][6],
                                      params['sent_pre'][7], B, head_count, L, D)
    out_pos = _project_from_heads_seq(sb, params['sent_pos'][6],
                                      params['sent_pos'][7], B, head_count, L, D)
    return out_pre, out_pos


# ----------------------------------------------------------------------------
# Pure-JAX reference (standard MHA, mirrors the PyTorch module structure).
# ----------------------------------------------------------------------------
def mha_ref(query, key, value, prm, head_count):
    Wq, bq, Wk, bk, Wv, bv, Wo, bo = prm
    N, Lq, D = query.shape
    Lk = key.shape[1]
    dh = D // head_count
    qp = query @ Wq + bq
    kp = key @ Wk + bk
    vp = value @ Wv + bv
    qh = qp.reshape(N, Lq, head_count, dh).transpose(0, 2, 1, 3)
    kh = kp.reshape(N, Lk, head_count, dh).transpose(0, 2, 1, 3)
    vh = vp.reshape(N, Lk, head_count, dh).transpose(0, 2, 1, 3)
    scores = jnp.einsum('nhqd,nhkd->nhqk', qh, kh) / np.sqrt(dh)
    attn = jax.nn.softmax(scores, axis=-1)
    ctx = jnp.einsum('nhqk,nhkd->nhqd', attn, vh)
    ctx = ctx.transpose(0, 2, 1, 3).reshape(N, Lq, D)
    return ctx @ Wo + bo


def context_hierarchical_attention_ref(doc_sents_h, ctx_pre_tokens_h,
                                       ctx_pos_tokens_h, params, head_count):
    B, L, D = doc_sents_h.shape
    q_tok = doc_sents_h.reshape(B * L, 1, D)
    kv_pre = ctx_pre_tokens_h.reshape(B * L, L, D)
    kv_pos = ctx_pos_tokens_h.reshape(B * L, L, D)
    c_pre = mha_ref(q_tok, kv_pre, kv_pre, params['tok_pre'],
                    head_count).reshape(B, L, D)
    c_pos = mha_ref(q_tok, kv_pos, kv_pos, params['tok_pos'],
                    head_count).reshape(B, L, D)
    s_pre = mha_ref(doc_sents_h, c_pre, c_pre, params['sent_pre'], head_count)
    s_pos = mha_ref(doc_sents_h, c_pos, c_pos, params['sent_pos'], head_count)
    return s_pre, s_pos


# ----------------------------------------------------------------------------
# Deterministic parameter init (PyTorch nn.Linear-style uniform bounds).
# Weights stored as (in, out) so the projections are x @ W + b.
# ----------------------------------------------------------------------------
def init_mha_params(key, D):
    ks = jax.random.split(key, 8)
    bound = 1.0 / np.sqrt(D)
    u = lambda k, shape: jax.random.uniform(k, shape, jnp.float32, -bound, bound)
    return (u(ks[0], (D, D)), u(ks[1], (1, D)),   # Wq, bq
            u(ks[2], (D, D)), u(ks[3], (1, D)),   # Wk, bk
            u(ks[4], (D, D)), u(ks[5], (1, D)),   # Wv, bv
            u(ks[6], (D, D)), u(ks[7], (1, D)))   # Wo, bo


if __name__ == "__main__":
    # Small shapes consistent with the module (original: B=2, max_len, 768).
    B, L, D, H = 2, 8, 32, 4   # batch, max_len, model_dim, head_count

    root = jax.random.PRNGKey(0)
    k_doc, k_pre, k_pos, k_p0, k_p1, k_p2, k_p3 = jax.random.split(root, 7)

    doc_sents_h = jax.random.normal(k_doc, (B, L, D), jnp.float32)
    context_pre_tokens_h = jax.random.normal(k_pre, (B, L, L, D), jnp.float32)
    context_pos_tokens_h = jax.random.normal(k_pos, (B, L, L, D), jnp.float32)

    params = {
        "tok_pre": init_mha_params(k_p0, D),
        "tok_pos": init_mha_params(k_p1, D),
        "sent_pre": init_mha_params(k_p2, D),
        "sent_pos": init_mha_params(k_p3, D),
    }

    fwd = jax.jit(functools.partial(context_hierarchical_attention,
                                    head_count=H))
    out_pre, out_pos = fwd(doc_sents_h, context_pre_tokens_h,
                           context_pos_tokens_h, params)
    jax.block_until_ready((out_pre, out_pos))

    # Verify against the pure-JAX f32 reference.  Tolerance is loosened because
    # the attention core runs in bf16 and uses the approximate EUP reciprocal
    # for the softmax normalisation.
    ref_pre, ref_pos = context_hierarchical_attention_ref(
        doc_sents_h, context_pre_tokens_h, context_pos_tokens_h, params, H)
    np.testing.assert_allclose(np.asarray(out_pre), np.asarray(ref_pre),
                               rtol=5e-2, atol=5e-2)
    np.testing.assert_allclose(np.asarray(out_pos), np.asarray(ref_pos),
                               rtol=5e-2, atol=5e-2)
    assert out_pre.shape == (B, L, D) and out_pos.shape == (B, L, D)

    print("KERNEL_OK")
</pallas_src>

<mosaic_0001>
module attributes {stable_mosaic.version = 11 : i64} {
  func.func @_attn_lq1_kernel(%arg0: i32, %arg1: memref<32x1x8xbf16, #tpu.memory_space<vmem>>, %arg2: memref<32x8x8xbf16, #tpu.memory_space<vmem>>, %arg3: memref<32x8x8xbf16, #tpu.memory_space<vmem>>, %arg4: memref<32x1x8xbf16, #tpu.memory_space<vmem>>, %arg5: memref<32x8x8xbf16, #tpu.memory_space<vmem>>, %arg6: memref<32x8x8xbf16, #tpu.memory_space<vmem>>, %arg7: memref<32x1x8xbf16, #tpu.memory_space<vmem>>, %arg8: memref<32x1x8xbf16, #tpu.memory_space<vmem>>) attributes {dimension_semantics = [#tpu.dimension_semantics<parallel>], iteration_bounds = array<i64: 2>, scalar_prefetch = 0 : i64, scratch_operands = 0 : i64, tpu.core_type = #tpu.core_type<tc>, window_params = [{transform_indices = @transform_0, window_bounds = array<i64: 32, 1, 8>}, {transform_indices = @transform_1, window_bounds = array<i64: 32, 8, 8>}, {transform_indices = @transform_2, window_bounds = array<i64: 32, 8, 8>}, {transform_indices = @transform_3, window_bounds = array<i64: 32, 1, 8>}, {transform_indices = @transform_4, window_bounds = array<i64: 32, 8, 8>}, {transform_indices = @transform_5, window_bounds = array<i64: 32, 8, 8>}, {transform_indices = @transform_6, window_bounds = array<i64: 32, 1, 8>}, {transform_indices = @transform_7, window_bounds = array<i64: 32, 1, 8>}]} {
    %c0 = arith.constant 0 : index
    %c0_0 = arith.constant 0 : index
    %c0_1 = arith.constant 0 : index
    %0 = vector.load %arg1[%c0, %c0_0, %c0_1] : memref<32x1x8xbf16, #tpu.memory_space<vmem>>, vector<32x1x8xbf16>
    %1 = arith.extf %0 : vector<32x1x8xbf16> to vector<32x1x8xf32>
    %c0_2 = arith.constant 0 : index
    %c0_3 = arith.constant 0 : index
    %c0_4 = arith.constant 0 : index
    %2 = vector.load %arg2[%c0_2, %c0_3, %c0_4] : memref<32x8x8xbf16, #tpu.memory_space<vmem>>, vector<32x8x8xbf16>
    %c0_5 = arith.constant 0 : index
    %c0_6 = arith.constant 0 : index
    %c0_7 = arith.constant 0 : index
    %3 = vector.load %arg3[%c0_5, %c0_6, %c0_7] : memref<32x8x8xbf16, #tpu.memory_space<vmem>>, vector<32x8x8xbf16>
    %4 = arith.extf %2 : vector<32x8x8xbf16> to vector<32x8x8xf32>
    %5 = vector.broadcast %1 : vector<32x1x8xf32> to vector<32x8x8xf32>
    %6 = arith.mulf %5, %4 : vector<32x8x8xf32>
    %cst = arith.constant dense<0.000000e+00> : vector<32x8xf32>
    %7 = vector.multi_reduction <add>, %6, %cst [2] : vector<32x8x8xf32> to vector<32x8xf32>
    %8 = vector.shape_cast %7 : vector<32x8xf32> to vector<32x8x1xf32>
    %cst_8 = arith.constant dense<0xFF800000> : vector<32x1xf32>
    %9 = vector.multi_reduction <maximumf>, %8, %cst_8 [1] : vector<32x8x1xf32> to vector<32x1xf32>
    %10 = vector.shape_cast %9 : vector<32x1xf32> to vector<32x1x1xf32>
    %11 = vector.broadcast %10 : vector<32x1x1xf32> to vector<32x8x1xf32>
    %12 = arith.subf %8, %11 : vector<32x8x1xf32>
    %13 = math.exp %12 : vector<32x8x1xf32>
    %cst_9 = arith.constant dense<0.000000e+00> : vector<32x1xf32>
    %14 = vector.multi_reduction <add>, %13, %cst_9 [1] : vector<32x8x1xf32> to vector<32x1xf32>
    %15 = vector.shape_cast %14 : vector<32x1xf32> to vector<32x1x1xf32>
    %16 = tpu.reciprocal %15 {approx = true} : vector<32x1x1xf32> -> vector<32x1x1xf32>
    %17 = vector.broadcast %16 : vector<32x1x1xf32> to vector<32x8x1xf32>
    %18 = arith.mulf %13, %17 : vector<32x8x1xf32>
    %19 = arith.extf %3 : vector<32x8x8xbf16> to vector<32x8x8xf32>
    %20 = vector.broadcast %18 : vector<32x8x1xf32> to vector<32x8x8xf32>
    %21 = arith.mulf %20, %19 : vector<32x8x8xf32>
    %cst_10 = arith.constant dense<0.000000e+00> : vector<32x8xf32>
    %22 = vector.multi_reduction <add>, %21, %cst_10 [1] : vector<32x8x8xf32> to vector<32x8xf32>
    %23 = vector.shape_cast %22 : vector<32x8xf32> to vector<32x1x8xf32>
    %24 = arith.truncf %23 : vector<32x1x8xf32> to vector<32x1x8xbf16>
    %c0_11 = arith.constant 0 : index
    %c0_12 = arith.constant 0 : index
    %c0_13 = arith.constant 0 : index
    %25 = vector.load %arg7[%c0_11, %c0_12, %c0_13] : memref<32x1x8xbf16, #tpu.memory_space<vmem>>, vector<32x1x8xbf16>
    tpu.vector_store %arg7[%c0_11, %c0_12, %c0_13], %24 {strides = array<i32>} : memref<32x1x8xbf16, #tpu.memory_space<vmem>>, vector<32x1x8xbf16>,
    %c0_14 = arith.constant 0 : index
    %c0_15 = arith.constant 0 : index
    %c0_16 = arith.constant 0 : index
    %26 = vector.load %arg4[%c0_14, %c0_15, %c0_16] : memref<32x1x8xbf16, #tpu.memory_space<vmem>>, vector<32x1x8xbf16>
    %27 = arith.extf %26 : vector<32x1x8xbf16> to vector<32x1x8xf32>
    %c0_17 = arith.constant 0 : index
    %c0_18 = arith.constant 0 : index
    %c0_19 = arith.constant 0 : index
    %28 = vector.load %arg5[%c0_17, %c0_18, %c0_19] : memref<32x8x8xbf16, #tpu.memory_space<vmem>>, vector<32x8x8xbf16>
    %c0_20 = arith.constant 0 : index
    %c0_21 = arith.constant 0 : index
    %c0_22 = arith.constant 0 : index
    %29 = vector.load %arg6[%c0_20, %c0_21, %c0_22] : memref<32x8x8xbf16, #tpu.memory_space<vmem>>, vector<32x8x8xbf16>
    %30 = arith.extf %28 : vector<32x8x8xbf16> to vector<32x8x8xf32>
    %31 = vector.broadcast %27 : vector<32x1x8xf32> to vector<32x8x8xf32>
    %32 = arith.mulf %31, %30 : vector<32x8x8xf32>
    %cst_23 = arith.constant dense<0.000000e+00> : vector<32x8xf32>
    %33 = vector.multi_reduction <add>, %32, %cst_23 [2] : vector<32x8x8xf32> to vector<32x8xf32>
    %34 = vector.shape_cast %33 : vector<32x8xf32> to vector<32x8x1xf32>
    %cst_24 = arith.constant dense<0xFF800000> : vector<32x1xf32>
    %35 = vector.multi_reduction <maximumf>, %34, %cst_24 [1] : vector<32x8x1xf32> to vector<32x1xf32>
    %36 = vector.shape_cast %35 : vector<32x1xf32> to vector<32x1x1xf32>
    %37 = vector.broadcast %36 : vector<32x1x1xf32> to vector<32x8x1xf32>
    %38 = arith.subf %34, %37 : vector<32x8x1xf32>
    %39 = math.exp %38 : vector<32x8x1xf32>
    %cst_25 = arith.constant dense<0.000000e+00> : vector<32x1xf32>
    %40 = vector.multi_reduction <add>, %39, %cst_25 [1] : vector<32x8x1xf32> to vector<32x1xf32>
    %41 = vector.shape_cast %40 : vector<32x1xf32> to vector<32x1x1xf32>
    %42 = tpu.reciprocal %41 {approx = true} : vector<32x1x1xf32> -> vector<32x1x1xf32>
    %43 = vector.broadcast %42 : vector<32x1x1xf32> to vector<32x8x1xf32>
    %44 = arith.mulf %39, %43 : vector<32x8x1xf32>
    %45 = arith.extf %29 : vector<32x8x8xbf16> to vector<32x8x8xf32>
    %46 = vector.broadcast %44 : vector<32x8x1xf32> to vector<32x8x8xf32>
    %47 = arith.mulf %46, %45 : vector<32x8x8xf32>
    %cst_26 = arith.constant dense<0.000000e+00> : vector<32x8xf32>
    %48 = vector.multi_reduction <add>, %47, %cst_26 [1] : vector<32x8x8xf32> to vector<32x8xf32>
    %49 = vector.shape_cast %48 : vector<32x8xf32> to vector<32x1x8xf32>
    %50 = arith.truncf %49 : vector<32x1x8xf32> to vector<32x1x8xbf16>
    %c0_27 = arith.constant 0 : index
    %c0_28 = arith.constant 0 : index
    %c0_29 = arith.constant 0 : index
    %51 = vector.load %arg8[%c0_27, %c0_28, %c0_29] : memref<32x1x8xbf16, #tpu.memory_space<vmem>>, vector<32x1x8xbf16>
    tpu.vector_store %arg8[%c0_27, %c0_28, %c0_29], %50 {strides = array<i32>} : memref<32x1x8xbf16, #tpu.memory_space<vmem>>, vector<32x1x8xbf16>,
    return
  }
  func.func @transform_0(%arg0: i32) -> (i32, i32, i32) {
    %c0_i32 = arith.constant 0 : i32
    %c0_i32_0 = arith.constant 0 : i32
    %c0_i32_1 = arith.constant 0 : i32
    return %arg0, %c0_i32, %c0_i32_0 : i32, i32, i32
  }
  func.func @transform_1(%arg0: i32) -> (i32, i32, i32) {
    %c0_i32 = arith.constant 0 : i32
    %c0_i32_0 = arith.constant 0 : i32
    %c0_i32_1 = arith.constant 0 : i32
    return %arg0, %c0_i32, %c0_i32_0 : i32, i32, i32
  }
  func.func @transform_2(%arg0: i32) -> (i32, i32, i32) {
    %c0_i32 = arith.constant 0 : i32
    %c0_i32_0 = arith.constant 0 : i32
    %c0_i32_1 = arith.constant 0 : i32
    return %arg0, %c0_i32, %c0_i32_0 : i32, i32, i32
  }
  func.func @transform_3(%arg0: i32) -> (i32, i32, i32) {
    %c0_i32 = arith.constant 0 : i32
    %c0_i32_0 = arith.constant 0 : i32
    %c0_i32_1 = arith.constant 0 : i32
    return %arg0, %c0_i32, %c0_i32_0 : i32, i32, i32
  }
  func.func @transform_4(%arg0: i32) -> (i32, i32, i32) {
    %c0_i32 = arith.constant 0 : i32
    %c0_i32_0 = arith.constant 0 : i32
    %c0_i32_1 = arith.constant 0 : i32
    return %arg0, %c0_i32, %c0_i32_0 : i32, i32, i32
  }
  func.func @transform_5(%arg0: i32) -> (i32, i32, i32) {
    %c0_i32 = arith.constant 0 : i32
    %c0_i32_0 = arith.constant 0 : i32
    %c0_i32_1 = arith.constant 0 : i32
    return %arg0, %c0_i32, %c0_i32_0 : i32, i32, i32
  }
  func.func @transform_6(%arg0: i32) -> (i32, i32, i32) {
    %c0_i32 = arith.constant 0 : i32
    %c0_i32_0 = arith.constant 0 : i32
    %c0_i32_1 = arith.constant 0 : i32
    return %arg0, %c0_i32, %c0_i32_0 : i32, i32, i32
  }
  func.func @transform_7(%arg0: i32) -> (i32, i32, i32) {
    %c0_i32 = arith.constant 0 : i32
    %c0_i32_0 = arith.constant 0 : i32
    %c0_i32_1 = arith.constant 0 : i32
    return %arg0, %c0_i32, %c0_i32_0 : i32, i32, i32
  }
}

module attributes {stable_mosaic.version = 11 : i64} {
  func.func @_attn_seq_kernel(%arg0: i32, %arg1: memref<4x8x8xbf16, #tpu.memory_space<vmem>>, %arg2: memref<4x8x8xbf16, #tpu.memory_space<vmem>>, %arg3: memref<4x8x8xbf16, #tpu.memory_space<vmem>>, %arg4: memref<4x8x8xbf16, #tpu.memory_space<vmem>>, %arg5: memref<4x8x8xbf16, #tpu.memory_space<vmem>>, %arg6: memref<4x8x8xbf16, #tpu.memory_space<vmem>>, %arg7: memref<4x8x8xbf16, #tpu.memory_space<vmem>>, %arg8: memref<4x8x8xbf16, #tpu.memory_space<vmem>>) attributes {dimension_semantics = [#tpu.dimension_semantics<parallel>], iteration_bounds = array<i64: 2>, scalar_prefetch = 0 : i64, scratch_operands = 0 : i64, tpu.core_type = #tpu.core_type<tc>, window_params = [{transform_indices = @transform_0, window_bounds = array<i64: 4, 8, 8>}, {transform_indices = @transform_1, window_bounds = array<i64: 4, 8, 8>}, {transform_indices = @transform_2, window_bounds = array<i64: 4, 8, 8>}, {transform_indices = @transform_3, window_bounds = array<i64: 4, 8, 8>}, {transform_indices = @transform_4, window_bounds = array<i64: 4, 8, 8>}, {transform_indices = @transform_5, window_bounds = array<i64: 4, 8, 8>}, {transform_indices = @transform_6, window_bounds = array<i64: 4, 8, 8>}, {transform_indices = @transform_7, window_bounds = array<i64: 4, 8, 8>}]} {
    %c0 = arith.constant 0 : index
    %c0_0 = arith.constant 0 : index
    %c0_1 = arith.constant 0 : index
    %0 = vector.load %arg1[%c0, %c0_0, %c0_1] : memref<4x8x8xbf16, #tpu.memory_space<vmem>>, vector<4x8x8xbf16>
    %c0_2 = arith.constant 0 : index
    %c0_3 = arith.constant 0 : index
    %c0_4 = arith.constant 0 : index
    %1 = vector.load %arg2[%c0_2, %c0_3, %c0_4] : memref<4x8x8xbf16, #tpu.memory_space<vmem>>, vector<4x8x8xbf16>
    %c0_5 = arith.constant 0 : index
    %c0_6 = arith.constant 0 : index
    %c0_7 = arith.constant 0 : index
    %2 = vector.load %arg3[%c0_5, %c0_6, %c0_7] : memref<4x8x8xbf16, #tpu.memory_space<vmem>>, vector<4x8x8xbf16>
    "tpu.trace_start"() <{level = 10 : i32, message = "gqd,gkd->gqk"}> : () -> ()
    %cst = arith.constant dense<0.000000e+00> : vector<4x8x8xf32>
    %3 = tpu.matmul %0, %1, %cst {dimension_numbers = #tpu.dot_dimension_numbers<[2], [2], [1], [1], [0, 0, 0, 1, 1, 1], [0], [0]>} : vector<4x8x8xbf16>, vector<4x8x8xbf16>, vector<4x8x8xf32> -> vector<4x8x8xf32>
    "tpu.trace_stop"() : () -> ()
    %cst_8 = arith.constant dense<0xFF800000> : vector<4x8xf32>
    %4 = vector.multi_reduction <maximumf>, %3, %cst_8 [2] : vector<4x8x8xf32> to vector<4x8xf32>
    %5 = vector.shape_cast %4 : vector<4x8xf32> to vector<4x8x1xf32>
    %6 = vector.broadcast %5 : vector<4x8x1xf32> to vector<4x8x8xf32>
    %7 = arith.subf %3, %6 : vector<4x8x8xf32>
    %8 = math.exp %7 : vector<4x8x8xf32>
    %cst_9 = arith.constant dense<0.000000e+00> : vector<4x8xf32>
    %9 = vector.multi_reduction <add>, %8, %cst_9 [2] : vector<4x8x8xf32> to vector<4x8xf32>
    %10 = vector.shape_cast %9 : vector<4x8xf32> to vector<4x8x1xf32>
    %11 = tpu.reciprocal %10 {approx = true} : vector<4x8x1xf32> -> vector<4x8x1xf32>
    %12 = vector.broadcast %11 : vector<4x8x1xf32> to vector<4x8x8xf32>
    %13 = arith.mulf %8, %12 : vector<4x8x8xf32>
    %14 = arith.truncf %13 : vector<4x8x8xf32> to vector<4x8x8xbf16>
    "tpu.trace_start"() <{level = 10 : i32, message = "gqk,gkd->gqd"}> : () -> ()
    %cst_10 = arith.constant dense<0.000000e+00> : vector<4x8x8xf32>
    %15 = tpu.matmul %14, %2, %cst_10 {dimension_numbers = #tpu.dot_dimension_numbers<[2], [1], [1], [2], [0, 0, 0, 1, 1, 2], [0], [0]>} : vector<4x8x8xbf16>, vector<4x8x8xbf16>, vector<4x8x8xf32> -> vector<4x8x8xf32>
    "tpu.trace_stop"() : () -> ()
    %16 = arith.truncf %15 : vector<4x8x8xf32> to vector<4x8x8xbf16>
    %c0_11 = arith.constant 0 : index
    %c0_12 = arith.constant 0 : index
    %c0_13 = arith.constant 0 : index
    %17 = vector.load %arg7[%c0_11, %c0_12, %c0_13] : memref<4x8x8xbf16, #tpu.memory_space<vmem>>, vector<4x8x8xbf16>
    tpu.vector_store %arg7[%c0_11, %c0_12, %c0_13], %16 {strides = array<i32>} : memref<4x8x8xbf16, #tpu.memory_space<vmem>>, vector<4x8x8xbf16>,
    %c0_14 = arith.constant 0 : index
    %c0_15 = arith.constant 0 : index
    %c0_16 = arith.constant 0 : index
    %18 = vector.load %arg4[%c0_14, %c0_15, %c0_16] : memref<4x8x8xbf16, #tpu.memory_space<vmem>>, vector<4x8x8xbf16>
    %c0_17 = arith.constant 0 : index
    %c0_18 = arith.constant 0 : index
    %c0_19 = arith.constant 0 : index
    %19 = vector.load %arg5[%c0_17, %c0_18, %c0_19] : memref<4x8x8xbf16, #tpu.memory_space<vmem>>, vector<4x8x8xbf16>
    %c0_20 = arith.constant 0 : index
    %c0_21 = arith.constant 0 : index
    %c0_22 = arith.constant 0 : index
    %20 = vector.load %arg6[%c0_20, %c0_21, %c0_22] : memref<4x8x8xbf16, #tpu.memory_space<vmem>>, vector<4x8x8xbf16>
    "tpu.trace_start"() <{level = 10 : i32, message = "gqd,gkd->gqk"}> : () -> ()
    %cst_23 = arith.constant dense<0.000000e+00> : vector<4x8x8xf32>
    %21 = tpu.matmul %18, %19, %cst_23 {dimension_numbers = #tpu.dot_dimension_numbers<[2], [2], [1], [1], [0, 0, 0, 1, 1, 1], [0], [0]>} : vector<4x8x8xbf16>, vector<4x8x8xbf16>, vector<4x8x8xf32> -> vector<4x8x8xf32>
    "tpu.trace_stop"() : () -> ()
    %cst_24 = arith.constant dense<0xFF800000> : vector<4x8xf32>
    %22 = vector.multi_reduction <maximumf>, %21, %cst_24 [2] : vector<4x8x8xf32> to vector<4x8xf32>
    %23 = vector.shape_cast %22 : vector<4x8xf32> to vector<4x8x1xf32>
    %24 = vector.broadcast %23 : vector<4x8x1xf32> to vector<4x8x8xf32>
    %25 = arith.subf %21, %24 : vector<4x8x8xf32>
    %26 = math.exp %25 : vector<4x8x8xf32>
    %cst_25 = arith.constant dense<0.000000e+00> : vector<4x8xf32>
    %27 = vector.multi_reduction <add>, %26, %cst_25 [2] : vector<4x8x8xf32> to vector<4x8xf32>
    %28 = vector.shape_cast %27 : vector<4x8xf32> to vector<4x8x1xf32>
    %29 = tpu.reciprocal %28 {approx = true} : vector<4x8x1xf32> -> vector<4x8x1xf32>
    %30 = vector.broadcast %29 : vector<4x8x1xf32> to vector<4x8x8xf32>
    %31 = arith.mulf %26, %30 : vector<4x8x8xf32>
    %32 = arith.truncf %31 : vector<4x8x8xf32> to vector<4x8x8xbf16>
    "tpu.trace_start"() <{level = 10 : i32, message = "gqk,gkd->gqd"}> : () -> ()
    %cst_26 = arith.constant dense<0.000000e+00> : vector<4x8x8xf32>
    %33 = tpu.matmul %32, %20, %cst_26 {dimension_numbers = #tpu.dot_dimension_numbers<[2], [1], [1], [2], [0, 0, 0, 1, 1, 2], [0], [0]>} : vector<4x8x8xbf16>, vector<4x8x8xbf16>, vector<4x8x8xf32> -> vector<4x8x8xf32>
    "tpu.trace_stop"() : () -> ()
    %34 = arith.truncf %33 : vector<4x8x8xf32> to vector<4x8x8xbf16>
    %c0_27 = arith.constant 0 : index
    %c0_28 = arith.constant 0 : index
    %c0_29 = arith.constant 0 : index
    %35 = vector.load %arg8[%c0_27, %c0_28, %c0_29] : memref<4x8x8xbf16, #tpu.memory_space<vmem>>, vector<4x8x8xbf16>
    tpu.vector_store %arg8[%c0_27, %c0_28, %c0_29], %34 {strides = array<i32>} : memref<4x8x8xbf16, #tpu.memory_space<vmem>>, vector<4x8x8xbf16>,
    return
  }
  func.func @transform_0(%arg0: i32) -> (i32, i32, i32) {
    %c0_i32 = arith.constant 0 : i32
    %c0_i32_0 = arith.constant 0 : i32
    %c0_i32_1 = arith.constant 0 : i32
    return %arg0, %c0_i32, %c0_i32_0 : i32, i32, i32
  }
  func.func @transform_1(%arg0: i32) -> (i32, i32, i32) {
    %c0_i32 = arith.constant 0 : i32
    %c0_i32_0 = arith.constant 0 : i32
    %c0_i32_1 = arith.constant 0 : i32
    return %arg0, %c0_i32, %c0_i32_0 : i32, i32, i32
  }
  func.func @transform_2(%arg0: i32) -> (i32, i32, i32) {
    %c0_i32 = arith.constant 0 : i32
    %c0_i32_0 = arith.constant 0 : i32
    %c0_i32_1 = arith.constant 0 : i32
    return %arg0, %c0_i32, %c0_i32_0 : i32, i32, i32
  }
  func.func @transform_3(%arg0: i32) -> (i32, i32, i32) {
    %c0_i32 = arith.constant 0 : i32
    %c0_i32_0 = arith.constant 0 : i32
    %c0_i32_1 = arith.constant 0 : i32
    return %arg0, %c0_i32, %c0_i32_0 : i32, i32, i32
  }
  func.func @transform_4(%arg0: i32) -> (i32, i32, i32) {
    %c0_i32 = arith.constant 0 : i32
    %c0_i32_0 = arith.constant 0 : i32
    %c0_i32_1 = arith.constant 0 : i32
    return %arg0, %c0_i32, %c0_i32_0 : i32, i32, i32
  }
  func.func @transform_5(%arg0: i32) -> (i32, i32, i32) {
    %c0_i32 = arith.constant 0 : i32
    %c0_i32_0 = arith.constant 0 : i32
    %c0_i32_1 = arith.constant 0 : i32
    return %arg0, %c0_i32, %c0_i32_0 : i32, i32, i32
  }
  func.func @transform_6(%arg0: i32) -> (i32, i32, i32) {
    %c0_i32 = arith.constant 0 : i32
    %c0_i32_0 = arith.constant 0 : i32
    %c0_i32_1 = arith.constant 0 : i32
    return %arg0, %c0_i32, %c0_i32_0 : i32, i32, i32
  }
  func.func @transform_7(%arg0: i32) -> (i32, i32, i32) {
    %c0_i32 = arith.constant 0 : i32
    %c0_i32_0 = arith.constant 0 : i32
    %c0_i32_1 = arith.constant 0 : i32
    return %arg0, %c0_i32, %c0_i32_0 : i32, i32, i32
  }
}

</mosaic_0001>

<bundles_post_ra>
// kernel: context_hierarchical_attention.3
= control target key start
LH: loop header
LB: loop body
LE: loop exit
PB: predicated region body
PF: predicated region fallthrough
CT: control target
= control target key end

     0   :  { %s1127_s24 = smov 0   ;;  %s1228_s0 = inlined_call_operand.vmem [shape: bf16[8,8,8], index: 0, kind: input, shape index: {}]   ;;  %s1229_s1 = inlined_call_operand.vmem [shape: bf16[8,8,8], index: 1, kind: input, shape index: {}]   ;;  %s1230_s2 = inlined_call_operand.vmem [shape: bf16[8,8,8], index: 2, kind: input, shape index: {}]   ;;  %s1231_s3 = inlined_call_operand.vmem [shape: bf16[8,8,8], index: 3, kind: input, shape index: {}]   ;;  %s1232_s4 = inlined_call_operand.vmem [shape: bf16[8,8,8], index: 4, kind: input, shape index: {}]   ;;  %s1233_s5 = inlined_call_operand.vmem [shape: bf16[8,8,8], index: 5, kind: input, shape index: {}]   ;;  %s1234_s6 = inlined_call_operand.vmem [shape: bf16[8,8,8], index: 6, kind: output, shape index: {0}]   ;;  %s1235_s7 = inlined_call_operand.vmem [shape: bf16[8,8,8], index: 7, kind: output, shape index: {1}]  }
   0x1 LB: > { %s1000_s25 = sadd.s32 4294967295, %s1085_s24   ;;  %p1004_p0 = scmp.ge.s32.totalorder %s1085_s24, 1  ;;  %s1085_s24 = sphi %s1127_s24, %s18_s24  }
   0x2   : > { %p296_p1 = scmp.lt.s32.totalorder %s1085_s24, 3 }
   0x4   : > { %p297_p2 = pnand %p1004_p0, %p296_p1 }
   0x5   : > { %s1005_s26 = sshll.u32 (!%p297_p2), %s1000_s25, 2 }
   0x6   : > { %300 = sbr.rel (%p297_p2) target bundleno = 963 (0x3c3), region = 44  ;;  %p359_p3 = scmp.lt.s32.totalorder (!%p297_p2), %s1005_s26, 7 }
   0xb   : > { %s1237_s26 = smov (!%p359_p3, %s1005_s26), 7  ;;  %vm419_vm0 = vcmask 64512   ;;  %vm547_vm1 = vcmask 1043456   ;;  %vm625_vm2 = vcmask 60416  }
   0xc   : > { %s1135_s27 = sshll.u32 %s1237_s26, 2 }
   0xd   : > { %s368_s30 = scalar_lea.vmem %s1229_s1, %s1135_s27  ;;  %s362_s10 = scalar_lea.vmem %s1228_s0, %s1135_s27 }
   0xe   : > { %v411_v0 = vld [vmem:[%s368_s30] sm:$0xf]  ;;  %v413_v1 = vld [vmem:[%s368_s30 + $0x8] sm:$0xf]  ;;  %v414_v2 = vld [vmem:[%s368_s30 + $0xc] sm:$0xf]  ;;  %s374_s13 = scalar_lea.vmem %s1230_s2, %s1135_s27  ;;  %s386_s16 = scalar_lea.vmem %s1232_s4, %s1135_s27 }
   0xf   : > { %v424_v3 = vsel %vm419_vm0, %v411_v0, 0  ;;  %v462_v4 = vsel %vm419_vm0, %v413_v1, 0  ;;  %v481_v5 = vsel %vm419_vm0, %v414_v2, 0  ;;  %v412_v6 = vld [vmem:[%s368_s30 + $0x4] sm:$0xf]  ;;  %s380_s19 = scalar_lea.vmem %s1231_s3, %s1135_s27  ;;  %s398_s22 = scalar_lea.vmem %s1234_s6, %s1135_s27 }
  0x10   : > { %433 = vmatpush.bf16.xpose.msra.mxu0 %v424_v3  ;;  %471 = vmatpush.bf16.xpose.msra.mxu2 %v462_v4  ;;  %v443_v7 = vsel %vm419_vm0, %v412_v6, 0  ;;  %v407_v8 = vld [vmem:[%s362_s10] sm:$0xf]  ;;  %v409_v9 = vld [vmem:[%s362_s10 + $0x8] sm:$0xf]  ;;  %s392_s26 = scalar_lea.vmem %s1233_s5, %s1135_s27  ;;  %s404_s30 = scalar_lea.vmem %s1235_s7, %s1135_s27 }
  0x11   : > { %490 = vmatpush.bf16.xpose.msra.mxu3 %v481_v5  ;;  %452 = vmatpush.bf16.xpose.msra.mxu1 %v443_v7  ;;  %v410_v10 = vld [vmem:[%s362_s10 + $0xc] sm:$0xf]  ;;  %v408_v11 = vld [vmem:[%s362_s10 + $0x4] sm:$0xf]  ;;  %v415_v44 = vld [vmem:[%s374_s13] sm:$0xf] }
  0x12   : > { %v549_v45 = vsel %vm547_vm1, %v415_v44, 0  ;;  %v417_v46 = vld [vmem:[%s374_s13 + $0x8] sm:$0xf]  ;;  %v418_v48 = vld [vmem:[%s374_s13 + $0xc] sm:$0xf] }
  0x13   : > { %v587_v47 = vsel %vm547_vm1, %v417_v46, 0  ;;  %v416_v49 = vld [vmem:[%s374_s13 + $0x4] sm:$0xf]  ;;  %v606_v50 = vsel %vm547_vm1, %v418_v48, 0  ;;  %v634_v52 = vld [vmem:[%s386_s16] sm:$0xf] }
  0x14   : > { %v568_v51 = vsel %vm547_vm1, %v416_v49, 0  ;;  %v646_v53 = vsel %vm419_vm0, %v634_v52, 0  ;;  %v636_v54 = vld [vmem:[%s386_s16 + $0x8] sm:$0xf]  ;;  %v637_v56 = vld [vmem:[%s386_s16 + $0xc] sm:$0xf] }
  0x15   : > { %v684_v55 = vsel %vm419_vm0, %v636_v54, 0  ;;  %v703_v57 = vsel %vm419_vm0, %v637_v56, 0  ;;  %v635_v59 = vld [vmem:[%s386_s16 + $0x4] sm:$0xf] }
  0x16   : > { %v665_v60 = vsel %vm419_vm0, %v635_v59, 0 }
  0x17   : > { %1021 = vmatmul.msk.bf16.vlgmr.msra.gmra.mxu0 %vm419_vm0, %v407_v8  ;;  %1023 = vmatmul.msk.bf16.vlgmr.msra.gmra.mxu2 %vm419_vm0, %v409_v9 }
  0x18   : > { %1024 = vmatmul.msk.bf16.vlgmr.msra.gmra.mxu3 %vm419_vm0, %v410_v10  ;;  %1022 = vmatmul.msk.bf16.vlgmr.msra.gmra.mxu1 %vm419_vm0, %v408_v11 }
  0x19   : > { %558 = vmatpush.bf16.msrb.mxu0 %v549_v45  ;;  %596 = vmatpush.bf16.msrb.mxu2 %v587_v47 }
  0x1a   : > { %615 = vmatpush.bf16.msrb.mxu3 %v606_v50  ;;  %577 = vmatpush.bf16.msrb.mxu1 %v568_v51 }
  0x1d   : > { %655 = vmatpush.bf16.xpose.msra.mxu0 %v646_v53  ;;  %693 = vmatpush.bf16.xpose.msra.mxu2 %v684_v55 }
  0x1e   : > { %712 = vmatpush.bf16.xpose.msra.mxu3 %v703_v57  ;;  %674 = vmatpush.bf16.xpose.msra.mxu1 %v665_v60  ;;  %v638_v60 = vld [vmem:[%s392_s26] sm:$0xf] }
  0x94   : > { %v435_v12 = vpop.f32.mrf.mxu0 }
  0x95   : > { %v496_v13 = vsel %vm419_vm0, %v435_v12, -inf  ;;  %v454_v14 = vpop.f32.mrf.mxu1 }
  0x96   : > { %497 = vmax.xlane.f32.xlu1 %v496_v13  ;;  %v499_v18 = vsel %vm419_vm0, %v454_v14, -inf  ;;  %v632_v13 = vld [vmem:[%s380_s19 + $0x8] sm:$0xf] }
  0x9a   : > { %v473_v15 = vpop.f32.mrf.mxu2 }
  0x9b   : > { %v492_v16 = vpop.f32.mrf.mxu3  ;;  %v502_v17 = vsel %vm419_vm0, %v473_v15, -inf }
  0x9c   : > { %503 = vmax.xlane.f32.xlu0 %v502_v17  ;;  %v437_v19 = vpop.f32.mrf.mxu0  ;;  %v505_v21 = vsel %vm419_vm0, %v492_v16, -inf }
  0x9d   : > { %v456_v20 = vpop.f32.mrf.mxu1 }
  0x9e   : > { %500 = vmax.xlane.f32.xlu1 %v499_v18 }
  0xa2   : > { %v475_v22 = vpop.f32.mrf.mxu2 }
  0xa3   : > { %v494_v23 = vpop.f32.mrf.mxu3 }
  0xa4   : > { %506 = vmax.xlane.f32.xlu0 %v505_v21 }
 0x109   : > { %v498_v24 = vpop.xlane.xlu1 %497 }
 0x10a   : > { %v508_v25 = vsub.f32 %v435_v12, %v498_v24  ;;  %v630_v12 = vld [vmem:[%s380_s19] sm:$0xf] }
 0x10c   : > { %v512_v26 = vmul.f32 1.442695, %v508_v25 }
 0x10e   : > { %1047 = vpow2.f32 %v512_v26 }
 0x10f   : > { %v504_v27 = vpop.xlane.xlu0 %503 }
 0x110   : > { %v510_v28 = vsub.f32 %v473_v15, %v504_v27  ;;  %v633_v15 = vld [vmem:[%s380_s19 + $0xc] sm:$0xf] }
 0x111   : > { %v501_v29 = vpop.xlane.xlu1 %500 }
 0x112   : > { %v516_v30 = vmul.f32 1.442695, %v510_v28  ;;  %v509_v31 = vsub.f32 %v454_v14, %v501_v29  ;;  %v631_v14 = vld [vmem:[%s380_s19 + $0x4] sm:$0xf] }
 0x114   : > { %v1048_v32 = vpop.eup %1047  ;;  %1049 = vpow2.f32 %v516_v30  ;;  %v514_v33 = vmul.f32 1.442695, %v509_v31 }
 0x115   : > { %v520_v34 = vsel %vm419_vm0, %v1048_v32, 0.0 }
 0x116   : > { %1051 = vpow2.f32 %v514_v33  ;;  %521 = vadd.xlane.f32.xlu0 %v520_v34 }
 0x117   : > { %v507_v35 = vpop.xlane.xlu0 %506 }
 0x118   : > { %v511_v36 = vsub.f32 %v492_v16, %v507_v35 }
 0x11a   : > { %v1050_v37 = vpop.eup %1049  ;;  %v518_v38 = vmul.f32 1.442695, %v511_v36 }
 0x11b   : > { %v526_v39 = vsel %vm419_vm0, %v1050_v37, 0.0 }
 0x11c   : > { %v1052_v40 = vpop.eup %1051  ;;  %1053 = vpow2.f32 %v518_v38  ;;  %527 = vadd.xlane.f32.xlu2 %v526_v39 }
 0x11d   : > { %v523_v41 = vsel %vm419_vm0, %v1052_v40, 0.0 }
 0x11e   : > { %524 = vadd.xlane.f32.xlu1 %v523_v41 }
 0x122   : > { %v1054_v42 = vpop.eup %1053 }
 0x123   : > { %v529_v43 = vsel %vm419_vm0, %v1054_v42, 0.0 }
 0x124   : > { %530 = vadd.xlane.f32.xlu2 %v529_v43 }
 0x189   : > { %v522_v58 = vpop.xlane.xlu0 %521 }
 0x18a   : > { %1055 = vrcp.f32 %v522_v58 }
 0x18f   : > { %v528_v61 = vpop.xlane.xlu2 %527 }
 0x190   : > { %v1056_v62 = vpop.eup %1055  ;;  %1057 = vrcp.f32 %v528_v61  ;;  %v770_v61 = vsel %vm547_vm1, %v638_v60, 0 }
 0x191   : > { %v536_v63 = vmul.f32 %v1056_v62, %v1048_v32  ;;  %v525_v0 = vpop.xlane.xlu1 %524  ;;  %v640_v62 = vld [vmem:[%s392_s26 + $0x8] sm:$0xf] }
 0x192   : > { %1059 = vrcp.f32 %v525_v0  ;;  %v641_v0 = vld [vmem:[%s392_s26 + $0xc] sm:$0xf] }
 0x193   : > { %v540_v1 = vpack.c.bf16 %v536_v63, %v536_v63  ;;  %v808_v63 = vsel %vm547_vm1, %v640_v62, 0 }
 0x195   : > { %1025 = vmatmul.msk.bf16.vlgmr.msrb.gmra.mxu0 %vm419_vm0, %v540_v1  ;;  %v827_v1 = vsel %vm547_vm1, %v641_v0, 0 }
 0x196   : > { %v1058_v2 = vpop.eup %1057  ;;  %779 = vmatpush.bf16.msrb.mxu0 %v770_v61 }
 0x197   : > { %v538_v3 = vmul.f32 %v1058_v2, %v1050_v37  ;;  %v531_v4 = vpop.xlane.xlu2 %530  ;;  %v639_v2 = vld [vmem:[%s392_s26 + $0x4] sm:$0xf] }
 0x198   : > { %v1060_v5 = vpop.eup %1059  ;;  %1061 = vrcp.f32 %v531_v4 }
 0x199   : > { %v537_v6 = vmul.f32 %v1060_v5, %v1052_v40  ;;  %v542_v7 = vpack.c.bf16 %v538_v3, %v538_v3  ;;  %v789_v3 = vsel %vm547_vm1, %v639_v2, 0 }
 0x19b   : > { %1027 = vmatmul.msk.bf16.vlgmr.msrb.gmra.mxu2 %vm419_vm0, %v542_v7  ;;  %v541_v8 = vpack.c.bf16 %v537_v6, %v537_v6 }
 0x19c   : > { %817 = vmatpush.bf16.msrb.mxu2 %v808_v63 }
 0x19d   : > { %1026 = vmatmul.msk.bf16.vlgmr.msrb.gmra.mxu1 %vm419_vm0, %v541_v8 }
 0x19e   : > { %v1062_v9 = vpop.eup %1061  ;;  %798 = vmatpush.bf16.msrb.mxu1 %v789_v3 }
 0x19f   : > { %v539_v10 = vmul.f32 %v1062_v9, %v1054_v42 }
 0x1a1   : > { %v543_v11 = vpack.c.bf16 %v539_v10, %v539_v10 }
 0x1a3   : > { %1028 = vmatmul.msk.bf16.vlgmr.msrb.gmra.mxu3 %vm419_vm0, %v543_v11 }
 0x1a4   : > { %836 = vmatpush.bf16.msrb.mxu3 %v827_v1 }
 0x1a5   : > { %1029 = vmatmul.msk.bf16.vlgmr.msra.gmra.mxu0 %vm419_vm0, %v630_v12 }
 0x1ab   : > { %1031 = vmatmul.msk.bf16.vlgmr.msra.gmra.mxu2 %vm419_vm0, %v632_v13 }
 0x1ad   : > { %1030 = vmatmul.msk.bf16.vlgmr.msra.gmra.mxu1 %vm419_vm0, %v631_v14 }
 0x1b3   : > { %1032 = vmatmul.msk.bf16.vlgmr.msra.gmra.mxu3 %vm419_vm0, %v633_v15 }
 0x212   : > { %v560_v16 = vpop.f32.mrf.mxu0 }
 0x213   : > { %v621_v17 = vpack.c.bf16 %v560_v16, %v560_v16 }
 0x215   : > { %626 = vst.msk [vmem:[%s398_s22] sm:$0xf] %vm625_vm2, %v621_v17 }
 0x21a   : > { %v562_v18 = vpop.f32.mrf.mxu0  ;;  %v579_v19 = vpop.f32.mrf.mxu1 }
 0x21b   : > { %v622_v20 = vpack.c.bf16 %v579_v19, %v579_v19 }
 0x21d   : > { %627 = vst.msk [vmem:[%s398_s22 + $0x4] sm:$0xf] %vm625_vm2, %v622_v20 }
 0x21e   : > { %v598_v21 = vpop.f32.mrf.mxu2 }
 0x21f   : > { %v623_v22 = vpack.c.bf16 %v598_v21, %v598_v21 }
 0x221   : > { %628 = vst.msk [vmem:[%s398_s22 + $0x8] sm:$0xf] %vm625_vm2, %v623_v22 }
 0x222   : > { %v581_v23 = vpop.f32.mrf.mxu1  ;;  %v657_v24 = vpop.f32.mrf.mxu0 }
 0x223   : > { %v718_v25 = vsel %vm419_vm0, %v657_v24, -inf }
 0x224   : > { %719 = vmax.xlane.f32.xlu1 %v718_v25 }
 0x226   : > { %v600_v26 = vpop.f32.mrf.mxu2  ;;  %v617_v27 = vpop.f32.mrf.mxu3 }
 0x227   : > { %v624_v28 = vpack.c.bf16 %v617_v27, %v617_v27 }
 0x229   : > { %629 = vst.msk [vmem:[%s398_s22 + $0xc] sm:$0xf] %vm625_vm2, %v624_v28 }
 0x22a   : > { %v676_v29 = vpop.f32.mrf.mxu1  ;;  %v659_v30 = vpop.f32.mrf.mxu0 }
 0x22b   : > { %v721_v35 = vsel %vm419_vm0, %v676_v29, -inf }
 0x22e   : > { %v619_v31 = vpop.f32.mrf.mxu3  ;;  %v695_v32 = vpop.f32.mrf.mxu2 }
 0x22f   : > { %v724_v33 = vsel %vm419_vm0, %v695_v32, -inf }
 0x230   : > { %725 = vmax.xlane.f32.xlu2 %v724_v33 }
 0x232   : > { %v678_v34 = vpop.f32.mrf.mxu1 }
 0x236   : > { %v697_v36 = vpop.f32.mrf.mxu2  ;;  %v714_v37 = vpop.f32.mrf.mxu3 }
 0x237   : > { %v727_v38 = vsel %vm419_vm0, %v714_v37, -inf }
 0x238   : > { %728 = vmax.xlane.f32.xlu0 %v727_v38  ;;  %722 = vmax.xlane.f32.xlu2 %v721_v35 }
 0x23e   : > { %v716_v39 = vpop.f32.mrf.mxu3 }
 0x297   : > { %v720_v40 = vpop.xlane.xlu1 %719 }
 0x298   : > { %v730_v41 = vsub.f32 %v657_v24, %v720_v40 }
 0x29a   : > { %v734_v42 = vmul.f32 1.442695, %v730_v41 }
 0x29c   : > { %1063 = vpow2.f32 %v734_v42 }
 0x2a2   : > { %v1064_v43 = vpop.eup %1063 }
 0x2a3   : > { %v726_v44 = vpop.xlane.xlu2 %725  ;;  %v742_v45 = vsel %vm419_vm0, %v1064_v43, 0.0 }
 0x2a4   : > { %v732_v46 = vsub.f32 %v695_v32, %v726_v44  ;;  %743 = vadd.xlane.f32.xlu2 %v742_v45 }
 0x2a6   : > { %v738_v47 = vmul.f32 1.442695, %v732_v46 }
 0x2a8   : > { %1065 = vpow2.f32 %v738_v47 }
 0x2ab   : > { %v729_v48 = vpop.xlane.xlu0 %728  ;;  %v723_v49 = vpop.xlane.xlu2 %722 }
 0x2ac   : > { %v733_v50 = vsub.f32 %v714_v37, %v729_v48  ;;  %v731_v51 = vsub.f32 %v676_v29, %v723_v49 }
 0x2ae   : > { %v1066_v52 = vpop.eup %1065  ;;  %v740_v53 = vmul.f32 1.442695, %v733_v50  ;;  %v736_v54 = vmul.f32 1.442695, %v731_v51 }
 0x2af   : > { %v748_v55 = vsel %vm419_vm0, %v1066_v52, 0.0 }
 0x2b0   : > { %1067 = vpow2.f32 %v740_v53  ;;  %749 = vadd.xlane.f32.xlu0 %v748_v55 }
 0x2b1   : > { %1069 = vpow2.f32 %v736_v54 }
 0x2b6   : > { %v1068_v56 = vpop.eup %1067 }
 0x2b7   : > { %v1070_v57 = vpop.eup %1069  ;;  %v751_v58 = vsel %vm419_vm0, %v1068_v56, 0.0 }
 0x2b8   : > { %v745_v59 = vsel %vm419_vm0, %v1070_v57, 0.0  ;;  %752 = vadd.xlane.f32.xlu1 %v751_v58 }
 0x2b9   : > { %746 = vadd.xlane.f32.xlu0 %v745_v59 }
 0x317   : > { %v744_v4 = vpop.xlane.xlu2 %743 }
 0x318   : > { %1071 = vrcp.f32 %v744_v4 }
 0x31e   : > { %v1072_v5 = vpop.eup %1071 }
 0x31f   : > { %v758_v6 = vmul.f32 %v1072_v5, %v1064_v43 }
 0x321   : > { %v762_v7 = vpack.c.bf16 %v758_v6, %v758_v6 }
 0x323   : > { %v750_v8 = vpop.xlane.xlu0 %749  ;;  %1033 = vmatmul.msk.bf16.vlgmr.msrb.gmra.mxu0 %vm419_vm0, %v762_v7 }
 0x324   : > { %1073 = vrcp.f32 %v750_v8 }
 0x32a   : > { %v1074_v9 = vpop.eup %1073 }
 0x32b   : > { %v760_v10 = vmul.f32 %v1074_v9, %v1066_v52  ;;  %v753_v11 = vpop.xlane.xlu1 %752 }
 0x32c   : > { %v747_v12 = vpop.xlane.xlu0 %746  ;;  %1075 = vrcp.f32 %v753_v11 }
 0x32d   : > { %v764_v13 = vpack.c.bf16 %v760_v10, %v760_v10  ;;  %1077 = vrcp.f32 %v747_v12 }
 0x32f   : > { %1035 = vmatmul.msk.bf16.vlgmr.msrb.gmra.mxu2 %vm419_vm0, %v764_v13 }
 0x332   : > { %v1076_v14 = vpop.eup %1075 }
 0x333   : > { %v1078_v15 = vpop.eup %1077  ;;  %v761_v16 = vmul.f32 %v1076_v14, %v1068_v56 }
 0x334   : > { %v759_v17 = vmul.f32 %v1078_v15, %v1070_v57 }
 0x335   : > { %v765_v18 = vpack.c.bf16 %v761_v16, %v761_v16 }
 0x336   : > { %v763_v19 = vpack.c.bf16 %v759_v17, %v759_v17 }
 0x337   : > { %1036 = vmatmul.msk.bf16.vlgmr.msrb.gmra.mxu3 %vm419_vm0, %v765_v18 }
 0x338   : > { %1034 = vmatmul.msk.bf16.vlgmr.msrb.gmra.mxu1 %vm419_vm0, %v763_v19 }
 0x3a0   : > { %v781_v20 = vpop.f32.mrf.mxu0 }
 0x3a1   : > { %v842_v21 = vpack.c.bf16 %v781_v20, %v781_v20 }
 0x3a3   : > { %846 = vst.msk [vmem:[%s404_s30] sm:$0xf] %vm625_vm2, %v842_v21 }
 0x3a8   : > { %v783_v22 = vpop.f32.mrf.mxu0 }
 0x3b2   : > { %v819_v23 = vpop.f32.mrf.mxu2 }
 0x3b3   : > { %v844_v26 = vpack.c.bf16 %v819_v23, %v819_v23 }
 0x3b5   : > { %v800_v24 = vpop.f32.mrf.mxu1  ;;  %848 = vst.msk [vmem:[%s404_s30 + $0x8] sm:$0xf] %vm625_vm2, %v844_v26 }
 0x3b6   : > { %v843_v25 = vpack.c.bf16 %v800_v24, %v800_v24 }
 0x3b8   : > { %847 = vst.msk [vmem:[%s404_s30 + $0x4] sm:$0xf] %vm625_vm2, %v843_v25 }
 0x3ba   : > { %v821_v27 = vpop.f32.mrf.mxu2  ;;  %v838_v28 = vpop.f32.mrf.mxu3 }
 0x3bb   : > { %v845_v29 = vpack.c.bf16 %v838_v28, %v838_v28 }
 0x3bd   : > { %849 = vst.msk [vmem:[%s404_s30 + $0xc] sm:$0xf] %vm625_vm2, %v845_v29  ;;  %v802_v30 = vpop.f32.mrf.mxu1 }
 0x3c2   : > { %v840_v31 = vpop.f32.mrf.mxu3 }
 0x3c3 PF: > { %s18_s24 = sadd.s32 1, %s1085_s24  }
 0x3c4   : > { %p15_p4 = scmp.ge.s32.totalorder %s18_s24, 4  }
 0x3c6   :  { %17 = sbr.rel (!%p15_p4) target bundleno = 1 (0x1), region = 101 }

// kernel: context_hierarchical_attention.2
= control target key start
LH: loop header
LB: loop body
LE: loop exit
PB: predicated region body
PF: predicated region fallthrough
CT: control target
= control target key end

     0   :  { %s3739_s24 = smov 0   ;;  %s5195_s0 = inlined_call_operand.vmem [shape: bf16[64,1,8], index: 0, kind: input, shape index: {}]   ;;  %s5196_s1 = inlined_call_operand.vmem [shape: bf16[64,8,8], index: 1, kind: input, shape index: {}]   ;;  %s5197_s2 = inlined_call_operand.vmem [shape: bf16[64,8,8], index: 2, kind: input, shape index: {}]   ;;  %s5198_s3 = inlined_call_operand.vmem [shape: bf16[64,1,8], index: 3, kind: input, shape index: {}]   ;;  %s5199_s4 = inlined_call_operand.vmem [shape: bf16[64,8,8], index: 4, kind: input, shape index: {}]   ;;  %s5200_s5 = inlined_call_operand.vmem [shape: bf16[64,8,8], index: 5, kind: input, shape index: {}]   ;;  %s5201_s6 = inlined_call_operand.vmem [shape: bf16[64,1,8], index: 6, kind: output, shape index: {0}]   ;;  %s5202_s7 = inlined_call_operand.vmem [shape: bf16[64,1,8], index: 7, kind: output, shape index: {1}]  }
   0x1 LB: > { %s3092_s25 = sadd.s32 4294967295, %s3697_s24   ;;  %p3096_p0 = scmp.ge.s32.totalorder %s3697_s24, 1  ;;  %s3697_s24 = sphi %s3739_s24, %s18_s24  }
   0x2   : > { %p294_p1 = scmp.lt.s32.totalorder %s3697_s24, 3 }
   0x4   : > { %p295_p2 = pnand %p3096_p0, %p294_p1 }
   0x5   : > { %s3097_s26 = sshll.u32 (!%p295_p2), %s3092_s25, 5 }
   0x6   : > { %298 = sbr.rel (%p295_p2) target bundleno = 634 (0x27a), region = 44  ;;  %p353_p3 = scmp.lt.s32.totalorder (!%p295_p2), %s3097_s26, 63 }
   0xb   : > { %s5206_s26 = smov (!%p353_p3, %s3097_s26), 63  ;;  %vm620_vm0 = vcmask 64512   ;;  %vm1581_vm1 = vcmask 57344   ;;  %vm1582_vm2 = vsmask.f32 256 }
   0xc   : > { %s3753_s29 = scalar_lea.vmem %s5195_s0, %s5206_s26  ;;  %s3756_s30 = sshll.u32 %s5206_s26, 2  ;;  %vm4103_vm3 = vmand %vm1581_vm1, %vm1582_vm2 }
   0xd   : > { %s3762_s10 = scalar_lea.vmem %s5196_s1, %s3756_s30  ;;  %v400_v0 = vld [vmem:[%s3753_s29 + $0x4] sm:$0x1]  ;;  %v398_v1 = vld [vmem:[%s3753_s29 + $0x2] sm:$0x1]  ;;  %v396_v2 = vld [vmem:[%s3753_s29] sm:$0x1]  ;;  %s3858_s13 = scalar_lea.vmem %s5198_s3, %s5206_s26 }
   0xe   : > { %v432_v3 = vunpack.c.l.bf16 %v400_v0  ;;  %v3368_v4 = vld [vmem:[%s3762_s10 + $0x10] sm:$0xff]   ;;  %v430_v5 = vunpack.c.l.bf16 %v398_v1  ;;  %v3367_v6 = vld [vmem:[%s3762_s10 + $0x8] sm:$0xff]   ;;  %v428_v7 = vunpack.c.l.bf16 %v396_v2  ;;  %v3112_v8 = vld [vmem:[%s3762_s10] sm:$0xff]   ;;  %s3871_s16 = scalar_lea.vmem %s5199_s4, %s3756_s30  ;;  %s3965_s19 = scalar_lea.vmem %s5197_s2, %s3756_s30 }
   0xf   : > { %v3121_v9 = vunpack.c.l.bf16 %v3368_v4  ;;  %v3117_v10 = vunpack.c.l.bf16 %v3367_v6  ;;  %v3113_v11 = vunpack.c.l.bf16 %v3112_v8  ;;  %v401_v12 = vld [vmem:[%s3753_s29 + $0x5] sm:$0x1]  ;;  %v399_v13 = vld [vmem:[%s3753_s29 + $0x3] sm:$0x1]  ;;  %v397_v14 = vld [vmem:[%s3753_s29 + $0x1] sm:$0x1]  ;;  %v3122_v19 = vunpack.c.h.bf16 %v3368_v4  ;;  %s4097_s22 = scalar_lea.vmem %s5201_s6, %s5206_s26  ;;  %s4585_s27 = scalar_lea.vmem %s5200_s5, %s3756_s30 }
  0x10   : > { %v560_v15 = vperm.slane %v432_v3, 0  ;;  %v558_v16 = vperm.slane %v430_v5, 0  ;;  %v556_v17 = vperm.slane %v428_v7, 0  ;;  %v433_v18 = vunpack.c.l.bf16 %v401_v12  ;;  %v404_v27 = vld [vmem:[%s3753_s29 + $0x8] sm:$0x1]  ;;  %v3370_v39 = vld [vmem:[%s3762_s10 + $0x20] sm:$0xff]   ;;  %s4674_s30 = scalar_lea.vmem %s5202_s7, %s5206_s26 }
  0x11   : > { %v431_v20 = vunpack.c.l.bf16 %v399_v13  ;;  %v3118_v21 = vunpack.c.h.bf16 %v3367_v6  ;;  %v429_v22 = vunpack.c.l.bf16 %v397_v14  ;;  %v3114_v29 = vunpack.c.h.bf16 %v3112_v8  ;;  %v403_v31 = vld [vmem:[%s3753_s29 + $0x7] sm:$0x1]  ;;  %v402_v35 = vld [vmem:[%s3753_s29 + $0x6] sm:$0x1]  ;;  %v3369_v42 = vld [vmem:[%s3762_s10 + $0x18] sm:$0xff]  }
  0x12   : > { %v592_v23 = vmul.f32 %v3121_v9, %v560_v15  ;;  %v590_v24 = vmul.f32 %v3117_v10, %v558_v16  ;;  %v588_v25 = vmul.f32 %v3113_v11, %v556_v17  ;;  %v561_v26 = vperm.slane %v433_v18, 0  ;;  %v407_v53 = vld [vmem:[%s3753_s29 + $0xb] sm:$0x1]  ;;  %v406_v54 = vld [vmem:[%s3753_s29 + $0xa] sm:$0x1]  ;;  %v3795_v12 = vld [vmem:[%s3762_s10 + $0x38] sm:$0xff]  }
  0x13   : > { %v559_v28 = vperm.slane %v431_v20, 0  ;;  %v557_v30 = vperm.slane %v429_v22, 0  ;;  %v436_v36 = vunpack.c.l.bf16 %v404_v27  ;;  %v435_v40 = vunpack.c.l.bf16 %v403_v31  ;;  %v405_v55 = vld [vmem:[%s3753_s29 + $0x9] sm:$0x1]  ;;  %v410_v1 = vld [vmem:[%s3753_s29 + $0xe] sm:$0x1] }
  0x14   : > { %v633_v32 = vsel %vm620_vm0, %v592_v23, 0.0  ;;  %v627_v33 = vsel %vm620_vm0, %v590_v24, 0.0  ;;  %v621_v34 = vsel %vm620_vm0, %v588_v25, 0.0  ;;  %v593_v37 = vmul.f32 %v3122_v19, %v561_v26  ;;  %v3371_v59 = vld [vmem:[%s3762_s10 + $0x28] sm:$0xff]   ;;  %v3372_v17 = vld [vmem:[%s3762_s10 + $0x30] sm:$0xff]  }
  0x15   : > { %634 = vadd.xlane.f32.xlu2 %v633_v32  ;;  %628 = vadd.xlane.f32.xlu1 %v627_v33  ;;  %v591_v38 = vmul.f32 %v3118_v21, %v559_v28  ;;  %v589_v41 = vmul.f32 %v3114_v29, %v557_v30  ;;  %v434_v43 = vunpack.c.l.bf16 %v402_v35  ;;  %v3129_v44 = vunpack.c.l.bf16 %v3370_v39  ;;  %v409_v9 = vld [vmem:[%s3753_s29 + $0xd] sm:$0x1]  ;;  %v408_v11 = vld [vmem:[%s3753_s29 + $0xc] sm:$0x1]  ;;  %v413_v25 = vld [vmem:[%s3753_s29 + $0x11] sm:$0x1] }
  0x16   : > { %622 = vadd.xlane.f32.xlu0 %v621_v34  ;;  %v564_v45 = vperm.slane %v436_v36, 0  ;;  %v636_v46 = vsel %vm620_vm0, %v593_v37, 0.0  ;;  %v3126_v48 = vunpack.c.h.bf16 %v3369_v42  ;;  %v563_v49 = vperm.slane %v435_v40, 0  ;;  %v3374_v29 = vld [vmem:[%s3762_s10 + $0x40] sm:$0xff]   ;;  %v412_v30 = vld [vmem:[%s3753_s29 + $0x10] sm:$0x1] }
  0x17   : > { %v630_v47 = vsel %vm620_vm0, %v591_v38, 0.0  ;;  %v624_v50 = vsel %vm620_vm0, %v589_v41, 0.0  ;;  %v3125_v51 = vunpack.c.l.bf16 %v3369_v42  ;;  %v562_v52 = vperm.slane %v434_v43, 0  ;;  %v411_v32 = vld [vmem:[%s3753_s29 + $0xf] sm:$0x1] }
  0x18   : > { %v596_v56 = vmul.f32 %v3129_v44, %v564_v45  ;;  %v595_v57 = vmul.f32 %v3126_v48, %v563_v49  ;;  %v439_v58 = vunpack.c.l.bf16 %v407_v53  ;;  %v438_v60 = vunpack.c.l.bf16 %v406_v54  ;;  %v422_v37 = vld [vmem:[%s3753_s29 + $0x1a] sm:$0x1]  ;;  %v3808_v38 = vld [vmem:[%s3762_s10 + $0x68] sm:$0xff]   ;;  %v421_v43 = vld [vmem:[%s3753_s29 + $0x19] sm:$0x1] }
  0x19   : > { %v594_v61 = vmul.f32 %v3125_v51, %v562_v52  ;;  %v437_v62 = vunpack.c.l.bf16 %v405_v55  ;;  %v3134_v0 = vunpack.c.h.bf16 %v3371_v59  ;;  %v3133_v4 = vunpack.c.l.bf16 %v3371_v59  ;;  %v420_v44 = vld [vmem:[%s3753_s29 + $0x18] sm:$0x1]  ;;  %v3378_v48 = vld [vmem:[%s3762_s10 + $0x60] sm:$0xff]   ;;  %v416_v51 = vld [vmem:[%s3753_s29 + $0x14] sm:$0x1] }
  0x1a   : > { %v645_v63 = vsel %vm620_vm0, %v596_v56, 0.0  ;;  %v642_v2 = vsel %vm620_vm0, %v595_v57, 0.0  ;;  %v567_v3 = vperm.slane %v439_v58, 0  ;;  %v566_v5 = vperm.slane %v438_v60, 0 }
  0x1b   : > { %v639_v6 = vsel %vm620_vm0, %v594_v61, 0.0  ;;  %v3130_v7 = vunpack.c.h.bf16 %v3370_v39  ;;  %v565_v8 = vperm.slane %v437_v62, 0  ;;  %v442_v10 = vunpack.c.l.bf16 %v410_v1  ;;  %v3820_v62 = vld [vmem:[%s3762_s10 + $0x50] sm:$0xff]  }
  0x1c   : > { %v599_v13 = vmul.f32 %v3134_v0, %v567_v3  ;;  %v598_v14 = vmul.f32 %v3133_v4, %v566_v5  ;;  %v441_v15 = vunpack.c.l.bf16 %v409_v9  ;;  %v440_v18 = vunpack.c.l.bf16 %v408_v11  ;;  %v3380_v11 = vld [vmem:[%s3762_s10 + $0x70] sm:$0xff]  }
  0x1d   : > { %637 = vadd.xlane.f32.xlu2 %v636_v46  ;;  %631 = vadd.xlane.f32.xlu1 %v630_v47  ;;  %v597_v16 = vmul.f32 %v3130_v7, %v565_v8  ;;  %v3141_v19 = vunpack.c.l.bf16 %v3795_v12  ;;  %v570_v20 = vperm.slane %v442_v10, 0  ;;  %v3138_v23 = vunpack.c.h.bf16 %v3372_v17  ;;  %v425_v10 = vld [vmem:[%s3753_s29 + $0x1d] sm:$0x1] }
  0x1e   : > { %625 = vadd.xlane.f32.xlu0 %v624_v50  ;;  %v654_v21 = vsel %vm620_vm0, %v599_v13, 0.0  ;;  %v651_v22 = vsel %vm620_vm0, %v598_v14, 0.0  ;;  %v569_v24 = vperm.slane %v441_v15, 0  ;;  %v3137_v27 = vunpack.c.l.bf16 %v3372_v17  ;;  %v423_v17 = vld [vmem:[%s3753_s29 + $0x1b] sm:$0x1] }
  0x1f   : > { %v648_v26 = vsel %vm620_vm0, %v597_v16, 0.0  ;;  %v568_v28 = vperm.slane %v440_v18, 0  ;;  %v602_v31 = vmul.f32 %v3141_v19, %v570_v20  ;;  %v445_v33 = vunpack.c.l.bf16 %v413_v25  ;;  %v424_v16 = vld [vmem:[%s3753_s29 + $0x1c] sm:$0x1] }
  0x20   : > { %v601_v34 = vmul.f32 %v3138_v23, %v569_v24  ;;  %v3146_v35 = vunpack.c.h.bf16 %v3374_v29  ;;  %v444_v36 = vunpack.c.l.bf16 %v412_v30  ;;  %v443_v40 = vunpack.c.l.bf16 %v411_v32 }
  0x21   : > { %v600_v39 = vmul.f32 %v3137_v27, %v568_v28  ;;  %v454_v41 = vunpack.c.l.bf16 %v422_v37  ;;  %v3165_v42 = vunpack.c.l.bf16 %v3808_v38  ;;  %v663_v45 = vsel %vm620_vm0, %v602_v31, 0.0  ;;  %v419_v28 = vld [vmem:[%s3753_s29 + $0x17] sm:$0x1]  ;;  %v417_v37 = vld [vmem:[%s3753_s29 + $0x15] sm:$0x1] }
  0x22   : > { %v3145_v46 = vunpack.c.l.bf16 %v3374_v29  ;;  %v453_v47 = vunpack.c.l.bf16 %v421_v43  ;;  %v452_v49 = vunpack.c.l.bf16 %v420_v44  ;;  %v573_v50 = vperm.slane %v445_v33, 0 }
  0x23   : > { %v582_v52 = vperm.slane %v454_v41, 0  ;;  %v3162_v53 = vunpack.c.h.bf16 %v3378_v48  ;;  %v3161_v54 = vunpack.c.l.bf16 %v3378_v48  ;;  %v660_v55 = vsel %vm620_vm0, %v601_v34, 0.0  ;;  %v418_v34 = vld [vmem:[%s3753_s29 + $0x16] sm:$0x1]  ;;  %v3377_v41 = vld [vmem:[%s3762_s10 + $0x58] sm:$0xff]  }
  0x24   : > { %v572_v56 = vperm.slane %v444_v36, 0  ;;  %v581_v57 = vperm.slane %v453_v47, 0  ;;  %v580_v58 = vperm.slane %v452_v49, 0  ;;  %v657_v59 = vsel %vm620_vm0, %v600_v39, 0.0  ;;  %v426_v47 = vld [vmem:[%s3753_s29 + $0x1e] sm:$0x1] }
  0x25   : > { %646 = vadd.xlane.f32.xlu2 %v645_v63  ;;  %643 = vadd.xlane.f32.xlu1 %v642_v2  ;;  %v3142_v60 = vunpack.c.h.bf16 %v3795_v12  ;;  %v571_v61 = vperm.slane %v443_v40, 0  ;;  %v415_v63 = vld [vmem:[%s3753_s29 + $0x13] sm:$0x1]  ;;  %v3823_v0 = vmul.f32 %v3165_v42, %v582_v52  ;;  %v448_v1 = vunpack.c.l.bf16 %v416_v51  ;;  %v414_v2 = vld [vmem:[%s3753_s29 + $0x12] sm:$0x1]  ;;  %v3381_v51 = vld [vmem:[%s3762_s10 + $0x78] sm:$0xff]  }
  0x26   : > { %640 = vadd.xlane.f32.xlu0 %v639_v6  ;;  %v3826_v3 = vmul.f32 %v3162_v53, %v581_v57  ;;  %v3828_v4 = vmul.f32 %v3161_v54, %v580_v58  ;;  %v605_v5 = vmul.f32 %v3146_v35, %v573_v50  ;;  %v3375_v6 = vld [vmem:[%s3762_s10 + $0x48] sm:$0xff]   ;;  %v604_v7 = vmul.f32 %v3145_v46, %v572_v56  ;;  %v427_v46 = vld [vmem:[%s3753_s29 + $0x1f] sm:$0x1] }
  0x27   : > { %v3153_v8 = vunpack.c.l.bf16 %v3820_v62  ;;  %v447_v9 = vunpack.c.l.bf16 %v415_v63  ;;  %v603_v12 = vmul.f32 %v3142_v60, %v571_v61  ;;  %v446_v13 = vunpack.c.l.bf16 %v414_v2 }
  0x28   : > { %v457_v14 = vunpack.c.l.bf16 %v425_v10  ;;  %v3170_v15 = vunpack.c.h.bf16 %v3380_v11  ;;  %v576_v18 = vperm.slane %v448_v1, 0  ;;  %v3150_v19 = vunpack.c.h.bf16 %v3375_v6 }
  0x29   : > { %v456_v20 = vunpack.c.l.bf16 %v424_v16  ;;  %v3169_v24 = vunpack.c.l.bf16 %v3380_v11  ;;  %v3166_v25 = vunpack.c.h.bf16 %v3808_v38  ;;  %v575_v27 = vperm.slane %v447_v9, 0 }
  0x2a   : > { %v585_v23 = vperm.slane %v457_v14, 0  ;;  %v666_v31 = vsel %vm620_vm0, %v603_v12, 0.0  ;;  %v3149_v32 = vunpack.c.l.bf16 %v3375_v6  ;;  %v574_v33 = vperm.slane %v446_v13, 0  ;;  %v1680_v13 = vld [vmem:[%s3858_s13] sm:$0x1] }
  0x2b   : > { %v584_v29 = vperm.slane %v456_v20, 0  ;;  %v608_v36 = vmul.f32 %v3153_v8, %v576_v18  ;;  %v451_v40 = vunpack.c.l.bf16 %v419_v28  ;;  %v607_v42 = vmul.f32 %v3150_v19, %v575_v27  ;;  %v1683_v19 = vld [vmem:[%s3858_s13 + $0x3] sm:$0x1]  ;;  %v1682_v20 = vld [vmem:[%s3858_s13 + $0x2] sm:$0x1] }
  0x2c   : > { %v617_v35 = vmul.f32 %v3170_v15, %v585_v23  ;;  %v450_v43 = vunpack.c.l.bf16 %v418_v34  ;;  %v606_v44 = vmul.f32 %v3149_v32, %v574_v33  ;;  %v3158_v49 = vunpack.c.h.bf16 %v3377_v41  ;;  %v1686_v33 = vld [vmem:[%s3858_s13 + $0x6] sm:$0x1]  ;;  %v1685_v34 = vld [vmem:[%s3858_s13 + $0x5] sm:$0x1] }
  0x2d   : > { %655 = vadd.xlane.f32.xlu2 %v654_v21  ;;  %652 = vadd.xlane.f32.xlu1 %v651_v22  ;;  %v455_v21 = vunpack.c.l.bf16 %v423_v17  ;;  %v672_v22 = vsel %vm620_vm0, %v605_v5, 0.0  ;;  %v616_v39 = vmul.f32 %v3169_v24, %v584_v29  ;;  %v681_v48 = vsel %vm620_vm0, %v608_v36, 0.0 }
  0x2e   : > { %649 = vadd.xlane.f32.xlu0 %v648_v26  ;;  %v669_v26 = vsel %vm620_vm0, %v604_v7, 0.0  ;;  %v459_v50 = vunpack.c.l.bf16 %v427_v46  ;;  %v458_v52 = vunpack.c.l.bf16 %v426_v47  ;;  %v579_v53 = vperm.slane %v451_v40, 0 }
  0x2f   : > { %v583_v30 = vperm.slane %v455_v21, 0  ;;  %v3157_v54 = vunpack.c.l.bf16 %v3377_v41  ;;  %v3173_v56 = vunpack.c.l.bf16 %v3381_v51  ;;  %v678_v57 = vsel %vm620_vm0, %v607_v42, 0.0  ;;  %v1681_v21 = vld [vmem:[%s3858_s13 + $0x1] sm:$0x1] }
  0x30   : > { %v578_v58 = vperm.slane %v450_v43, 0  ;;  %v586_v60 = vperm.slane %v458_v52, 0  ;;  %v675_v61 = vsel %vm620_vm0, %v606_v44, 0.0  ;;  %v3154_v63 = vunpack.c.h.bf16 %v3820_v62  ;;  %v3399_v43 = vld [vmem:[%s3871_s16 + $0x18] sm:$0xff]   ;;  %v3398_v44 = vld [vmem:[%s3871_s16 + $0x10] sm:$0xff]  }
  0x31   : > { %v615_v38 = vmul.f32 %v3166_v25, %v583_v30  ;;  %v611_v6 = vmul.f32 %v3158_v49, %v579_v53  ;;  %v699_v62 = vsel %vm620_vm0, %v3823_v0, 0.0  ;;  %v696_v12 = vsel %vm620_vm0, %v3826_v3, 0.0  ;;  %v3240_v0 = vld [vmem:[%s3871_s16] sm:$0xff]   ;;  %v3397_v25 = vld [vmem:[%s3871_s16 + $0x8] sm:$0xff]  }
  0x32   : > { %v618_v5 = vmul.f32 %v3173_v56, %v586_v60  ;;  %v610_v7 = vmul.f32 %v3157_v54, %v578_v58  ;;  %v693_v14 = vsel %vm620_vm0, %v3828_v4, 0.0  ;;  %v1712_v15 = vunpack.c.l.bf16 %v1680_v13  ;;  %v1689_v56 = vld [vmem:[%s3858_s13 + $0x9] sm:$0x1]  ;;  %v1687_v58 = vld [vmem:[%s3858_s13 + $0x7] sm:$0x1] }
  0x33   : > { %v690_v9 = vsel %vm620_vm0, %v611_v6, 0.0  ;;  %v3241_v16 = vunpack.c.l.bf16 %v3240_v0  ;;  %v708_v3 = vsel %vm620_vm0, %v617_v35, 0.0  ;;  %v705_v18 = vsel %vm620_vm0, %v616_v39, 0.0  ;;  %v1684_v39 = vld [vmem:[%s3858_s13 + $0x4] sm:$0x1] }
  0x34   : > { %v687_v10 = vsel %vm620_vm0, %v610_v7, 0.0  ;;  %v1840_v17 = vperm.slane %v1712_v15, 0  ;;  %v702_v4 = vsel %vm620_vm0, %v615_v38, 0.0  ;;  %v1715_v23 = vunpack.c.l.bf16 %v1683_v19  ;;  %v1691_v15 = vld [vmem:[%s3858_s13 + $0xb] sm:$0x1] }
  0x35   : > { %664 = vadd.xlane.f32.xlu2 %v663_v45  ;;  %661 = vadd.xlane.f32.xlu1 %v660_v55  ;;  %v449_v45 = vunpack.c.l.bf16 %v417_v37  ;;  %v3174_v55 = vunpack.c.h.bf16 %v3381_v51  ;;  %v1714_v24 = vunpack.c.l.bf16 %v1682_v20  ;;  %v3246_v29 = vunpack.c.h.bf16 %v3397_v25  ;;  %v3401_v20 = vld [vmem:[%s3871_s16 + $0x28] sm:$0xff]  }
  0x36   : > { %658 = vadd.xlane.f32.xlu0 %v657_v59  ;;  %v587_v59 = vperm.slane %v459_v50, 0  ;;  %v1843_v30 = vperm.slane %v1715_v23, 0  ;;  %v711_v35 = vsel %vm620_vm0, %v618_v5, 0.0  ;;  %v3242_v36 = vunpack.c.h.bf16 %v3240_v0  ;;  %v1690_v0 = vld [vmem:[%s3858_s13 + $0xa] sm:$0x1] }
  0x37   : > { %v577_v1 = vperm.slane %v449_v45, 0  ;;  %v1842_v32 = vperm.slane %v1714_v24, 0  ;;  %v1718_v38 = vunpack.c.l.bf16 %v1686_v33  ;;  %v1717_v40 = vunpack.c.l.bf16 %v1685_v34  ;;  %v1695_v24 = vld [vmem:[%s3858_s13 + $0xf] sm:$0x1]  ;;  %v1693_v34 = vld [vmem:[%s3858_s13 + $0xd] sm:$0x1] }
  0x38   : > { %v619_v2 = vmul.f32 %v3174_v55, %v587_v59  ;;  %v1875_v41 = vmul.f32 %v3246_v29, %v1843_v30  ;;  %v1716_v46 = vunpack.c.l.bf16 %v1684_v39  ;;  %v3253_v47 = vunpack.c.l.bf16 %v3399_v43 }
  0x39   : > { %v609_v8 = vmul.f32 %v3154_v63, %v577_v1  ;;  %v3250_v49 = vunpack.c.h.bf16 %v3398_v44  ;;  %v1845_v50 = vperm.slane %v1717_v40, 0  ;;  %v3249_v54 = vunpack.c.l.bf16 %v3398_v44  ;;  %v1697_v44 = vld [vmem:[%s3858_s13 + $0x11] sm:$0x1] }
  0x3a   : > { %v714_v28 = vsel %vm620_vm0, %v619_v2, 0.0  ;;  %v1913_v51 = vsel %vm620_vm0, %v1875_v41, 0.0  ;;  %v1844_v55 = vperm.slane %v1716_v46, 0  ;;  %v3400_v2 = vld [vmem:[%s3871_s16 + $0x20] sm:$0xff]   ;;  %v1719_v5 = vunpack.c.l.bf16 %v1687_v58  ;;  %v1698_v41 = vld [vmem:[%s3858_s13 + $0x12] sm:$0x1] }
  0x3b   : > { %v684_v11 = vsel %vm620_vm0, %v609_v8, 0.0  ;;  %v1877_v60 = vmul.f32 %v3250_v49, %v1845_v50  ;;  %v3258_v8 = vunpack.c.h.bf16 %v3400_v2  ;;  %v3254_v13 = vunpack.c.h.bf16 %v3399_v43  ;;  %v1696_v46 = vld [vmem:[%s3858_s13 + $0x10] sm:$0x1] }
  0x3c   : > { %v1876_v1 = vmul.f32 %v3249_v54, %v1844_v55  ;;  %v3261_v30 = vunpack.c.l.bf16 %v3401_v20  ;;  %v1727_v33 = vunpack.c.l.bf16 %v1695_v24  ;;  %v1725_v40 = vunpack.c.l.bf16 %v1693_v34  ;;  %v3918_v54 = vld [vmem:[%s3871_s16 + $0x48] sm:$0xff]  }
  0x3d   : > { %673 = vadd.xlane.f32.xlu2 %v672_v22  ;;  %670 = vadd.xlane.f32.xlu1 %v669_v26  ;;  %v1872_v22 = vmul.f32 %v3241_v16, %v1840_v17  ;;  %v1713_v26 = vunpack.c.l.bf16 %v1681_v21  ;;  %v1919_v7 = vsel %vm620_vm0, %v1877_v60, 0.0  ;;  %v1722_v21 = vunpack.c.l.bf16 %v1690_v0 }
  0x3e   : > { %667 = vadd.xlane.f32.xlu0 %v666_v31  ;;  %v3245_v31 = vunpack.c.l.bf16 %v3397_v25  ;;  %v1855_v43 = vperm.slane %v1727_v33, 0  ;;  %v1730_v50 = vunpack.c.l.bf16 %v1698_v41  ;;  %v1729_v55 = vunpack.c.l.bf16 %v1697_v44 }
  0x3f   : > { %v1904_v27 = vsel %vm620_vm0, %v1872_v22, 0.0  ;;  %v1841_v37 = vperm.slane %v1713_v26, 0  ;;  %v1728_v58 = vunpack.c.l.bf16 %v1696_v46  ;;  %v3277_v60 = vunpack.c.l.bf16 %v3918_v54 }
  0x40   : > { %v1874_v42 = vmul.f32 %v3245_v31, %v1842_v32  ;;  %v1850_v31 = vperm.slane %v1722_v21, 0  ;;  %v1694_v32 = vld [vmem:[%s3858_s13 + $0xe] sm:$0x1] }
  0x41   : > { %v1873_v45 = vmul.f32 %v3242_v36, %v1841_v37  ;;  %v3403_v36 = vld [vmem:[%s3871_s16 + $0x38] sm:$0xff]   ;;  %v1726_v39 = vunpack.c.l.bf16 %v1694_v32 }
  0x42   : > { %v1910_v52 = vsel %vm620_vm0, %v1874_v42, 0.0  ;;  %v3270_v42 = vunpack.c.h.bf16 %v3403_v36 }
  0x43   : > { %v1907_v53 = vsel %vm620_vm0, %v1873_v45, 0.0  ;;  %v1854_v49 = vperm.slane %v1726_v39, 0 }
  0x45   : > { %682 = vadd.xlane.f32.xlu2 %v681_v48  ;;  %679 = vadd.xlane.f32.xlu1 %v678_v57  ;;  %v1846_v48 = vperm.slane %v1718_v38, 0  ;;  %v1688_v57 = vld [vmem:[%s3858_s13 + $0x8] sm:$0x1]  ;;  %v1882_v38 = vmul.f32 %v3261_v30, %v1850_v31 }
  0x46   : > { %676 = vadd.xlane.f32.xlu0 %v675_v61  ;;  %v1721_v61 = vunpack.c.l.bf16 %v1689_v56  ;;  %v1720_v63 = vunpack.c.l.bf16 %v1688_v57  ;;  %v1887_v56 = vmul.f32 %v3270_v42, %v1855_v43  ;;  %v3404_v57 = vld [vmem:[%s3871_s16 + $0x40] sm:$0xff]  }
  0x47   : > { %v1878_v59 = vmul.f32 %v3253_v47, %v1846_v48  ;;  %v3269_v48 = vunpack.c.l.bf16 %v3403_v36 }
  0x49   : > { %v1922_v6 = vsel %vm620_vm0, %v1878_v59, 0.0  ;;  %v1886_v59 = vmul.f32 %v3269_v48, %v1854_v49 }
  0x4b   : > { %v1946_v0 = vsel %vm620_vm0, %v1886_v59, 0.0 }
  0x4d   : > { %691 = vadd.xlane.f32.xlu2 %v690_v9  ;;  %688 = vadd.xlane.f32.xlu1 %v687_v10  ;;  %v1849_v9 = vperm.slane %v1721_v61, 0  ;;  %v3257_v10 = vunpack.c.l.bf16 %v3400_v2  ;;  %v1858_v61 = vperm.slane %v1730_v50, 0  ;;  %v1857_v2 = vperm.slane %v1729_v55, 0 }
  0x4e   : > { %685 = vadd.xlane.f32.xlu0 %v684_v11  ;;  %v1848_v11 = vperm.slane %v1720_v63, 0 }
  0x4f   : > { %v1881_v17 = vmul.f32 %v3258_v8, %v1849_v9  ;;  %v1949_v8 = vsel %vm620_vm0, %v1887_v56, 0.0  ;;  %v1856_v9 = vperm.slane %v1728_v58, 0 }
  0x51   : > { %v1931_v25 = vsel %vm620_vm0, %v1881_v17, 0.0 }
  0x55   : > { %700 = vadd.xlane.f32.xlu2 %v699_v62  ;;  %697 = vadd.xlane.f32.xlu1 %v696_v12  ;;  %v1692_v62 = vld [vmem:[%s3858_s13 + $0xc] sm:$0x1]  ;;  %v1916_v12 = vsel %vm620_vm0, %v1876_v1, 0.0  ;;  %v3274_v1 = vunpack.c.h.bf16 %v3404_v57 }
  0x56   : > { %694 = vadd.xlane.f32.xlu0 %v693_v14  ;;  %v1847_v14 = vperm.slane %v1719_v5, 0  ;;  %v1724_v16 = vunpack.c.l.bf16 %v1692_v62  ;;  %v1701_v5 = vld [vmem:[%s3858_s13 + $0x15] sm:$0x1] }
  0x57   : > { %v1733_v17 = vunpack.c.l.bf16 %v1701_v5 }
  0x58   : > { %v1879_v19 = vmul.f32 %v3254_v13, %v1847_v14  ;;  %v1852_v23 = vperm.slane %v1724_v16, 0  ;;  %v1700_v13 = vld [vmem:[%s3858_s13 + $0x14] sm:$0x1]  ;;  %v1699_v14 = vld [vmem:[%s3858_s13 + $0x13] sm:$0x1]  ;;  %v1890_v16 = vmul.f32 %v3277_v60, %v1858_v61 }
  0x59   : > { %v1861_v30 = vperm.slane %v1733_v17, 0  ;;  %v3977_v17 = vld [vmem:[%s3965_s19 + $0x10] sm:$0xff]  }
  0x5a   : > { %v1925_v29 = vsel %vm620_vm0, %v1879_v19, 0.0  ;;  %v1889_v19 = vmul.f32 %v3274_v1, %v1857_v2 }
  0x5c   : > { %v1955_v33 = vsel %vm620_vm0, %v1889_v19, 0.0 }
  0x5d   : > { %709 = vadd.xlane.f32.xlu2 %v708_v3  ;;  %706 = vadd.xlane.f32.xlu1 %v705_v18  ;;  %v1880_v3 = vmul.f32 %v3257_v10, %v1848_v11  ;;  %v3402_v18 = vld [vmem:[%s3871_s16 + $0x30] sm:$0xff]  }
  0x5e   : > { %703 = vadd.xlane.f32.xlu0 %v702_v4  ;;  %v1723_v4 = vunpack.c.l.bf16 %v1691_v15  ;;  %v3265_v22 = vunpack.c.l.bf16 %v3402_v18 }
  0x5f   : > { %v1928_v26 = vsel %vm620_vm0, %v1880_v3, 0.0 }
  0x65   : > { %1905 = vadd.xlane.f32.xlu2 %v1904_v27  ;;  %715 = vadd.xlane.f32.xlu1 %v714_v28  ;;  %v3262_v27 = vunpack.c.h.bf16 %v3401_v20  ;;  %v1851_v28 = vperm.slane %v1723_v4, 0  ;;  %v3406_v20 = vld [vmem:[%s3871_s16 + $0x50] sm:$0xff]  }
  0x66   : > { %712 = vadd.xlane.f32.xlu0 %v711_v35  ;;  %v1884_v35 = vmul.f32 %v3265_v22, %v1852_v23  ;;  %v1732_v22 = vunpack.c.l.bf16 %v1700_v13  ;;  %v1731_v23 = vunpack.c.l.bf16 %v1699_v14  ;;  %v3281_v34 = vunpack.c.l.bf16 %v3406_v20 }
  0x67   : > { %v1883_v37 = vmul.f32 %v3262_v27, %v1851_v28  ;;  %v1958_v28 = vsel %vm620_vm0, %v1890_v16, 0.0 }
  0x68   : > { %v1940_v45 = vsel %vm620_vm0, %v1884_v35, 0.0  ;;  %v1860_v39 = vperm.slane %v1732_v22, 0 }
  0x69   : > { %v1937_v47 = vsel %vm620_vm0, %v1883_v37, 0.0 }
  0x6a   : > { %v1892_v56 = vmul.f32 %v3281_v34, %v1860_v39  ;;  %v3186_v39 = vunpack.c.h.bf16 %v3977_v17 }
  0x6d   : > { %1914 = vadd.xlane.f32.xlu2 %v1913_v51  ;;  %1911 = vadd.xlane.f32.xlu1 %v1910_v52  ;;  %v1934_v51 = vsel %vm620_vm0, %v1882_v38, 0.0  ;;  %v3266_v52 = vunpack.c.h.bf16 %v3402_v18  ;;  %v3278_v38 = vunpack.c.h.bf16 %v3918_v54 }
  0x6e   : > { %1908 = vadd.xlane.f32.xlu0 %v1907_v53  ;;  %v1853_v53 = vperm.slane %v1725_v40, 0  ;;  %v1859_v40 = vperm.slane %v1731_v23, 0 }
  0x70   : > { %v1885_v63 = vmul.f32 %v3266_v52, %v1853_v53 }
  0x72   : > { %v1943_v4 = vsel %vm620_vm0, %v1885_v63, 0.0 }
  0x75   : > { %1923 = vadd.xlane.f32.xlu2 %v1922_v6  ;;  %1920 = vadd.xlane.f32.xlu1 %v1919_v7 }
  0x76   : > { %1917 = vadd.xlane.f32.xlu0 %v1916_v12  ;;  %v3273_v12 = vunpack.c.l.bf16 %v3404_v57  ;;  %v1891_v57 = vmul.f32 %v3278_v38, %v1859_v40 }
  0x78   : > { %v1961_v13 = vsel %vm620_vm0, %v1891_v57, 0.0 }
  0x7d   : > { %1932 = vadd.xlane.f32.xlu2 %v1931_v25  ;;  %1929 = vadd.xlane.f32.xlu1 %v1928_v26  ;;  %v1888_v26 = vmul.f32 %v3273_v12, %v1856_v9  ;;  %v1964_v12 = vsel %vm620_vm0, %v1892_v56, 0.0 }
  0x7e   : > { %1926 = vadd.xlane.f32.xlu0 %v1925_v29  ;;  %v3282_v29 = vunpack.c.h.bf16 %v3406_v20  ;;  %v3985_v20 = vld [vmem:[%s3965_s19] sm:$0xff]  }
  0x7f   : > { %v1952_v48 = vsel %vm620_vm0, %v1888_v26, 0.0 }
  0x80   : > { %v1893_v49 = vmul.f32 %v3282_v29, %v1861_v30 }
  0x82   : > { %v1967_v2 = vsel %vm620_vm0, %v1893_v49, 0.0 }
  0x85   : > { %1941 = vadd.xlane.f32.xlu2 %v1940_v45  ;;  %1938 = vadd.xlane.f32.xlu1 %v1937_v47 }
  0x86   : > { %1935 = vadd.xlane.f32.xlu0 %v1934_v51 }
  0x88   : > { %v3923_v6 = vpop.xlane.xlu2 %634  ;;  %v3925_v7 = vpop.xlane.xlu1 %628 }
  0x89   : > { %v741_v10 = vrot.slane %v3923_v6, 4  ;;  %v729_v11 = vrot.slane %v3925_v7, 4  ;;  %v3930_v62 = vpop.xlane.xlu0 %622 }
  0x8a   : > { %v717_v15 = vrot.slane %v3930_v62, 4 }
  0x8b   : > { %v742_v3 = vmax.f32 %v3923_v6, %v741_v10  ;;  %v730_v18 = vmax.f32 %v3925_v7, %v729_v11 }
  0x8c   : > { %v718_v21 = vmax.f32 %v3930_v62, %v717_v15 }
  0x8d   : > { %v743_v24 = vrot.slane %v742_v3, 2  ;;  %v731_v25 = vrot.slane %v730_v18, 2  ;;  %1950 = vadd.xlane.f32.xlu2 %v1949_v8  ;;  %1947 = vadd.xlane.f32.xlu1 %v1946_v0 }
  0x8e   : > { %v719_v27 = vrot.slane %v718_v21, 2  ;;  %1944 = vadd.xlane.f32.xlu0 %v1943_v4 }
  0x8f   : > { %v744_v31 = vmax.f32 %v742_v3, %v743_v24  ;;  %v732_v32 = vmax.f32 %v730_v18, %v731_v25  ;;  %v3980_v3 = vld [vmem:[%s3965_s19 + $0x8] sm:$0xff]  }
  0x90   : > { %v720_v35 = vmax.f32 %v718_v21, %v719_v27  ;;  %v3943_v36 = vpop.xlane.xlu2 %637  ;;  %v3945_v37 = vpop.xlane.xlu1 %631  ;;  %v3185_v27 = vunpack.c.l.bf16 %v3977_v17 }
  0x91   : > { %v745_v41 = vrot.slane %v744_v31, 1  ;;  %v733_v42 = vrot.slane %v732_v32, 1  ;;  %v747_v43 = vrot.slane %v3943_v36, 4  ;;  %v735_v44 = vrot.slane %v3945_v37, 4  ;;  %v3950_v45 = vpop.xlane.xlu0 %625 }
  0x92   : > { %v721_v46 = vrot.slane %v720_v35, 1  ;;  %v723_v47 = vrot.slane %v3950_v45, 4 }
  0x93   : > { %v746_v50 = vmax.f32 %v744_v31, %v745_v41  ;;  %v734_v51 = vmax.f32 %v732_v32, %v733_v42  ;;  %v748_v52 = vmax.f32 %v3943_v36, %v747_v43  ;;  %v736_v53 = vmax.f32 %v3945_v37, %v735_v44 }
  0x94   : > { %v722_v54 = vmax.f32 %v720_v35, %v721_v46  ;;  %v724_v55 = vmax.f32 %v3950_v45, %v723_v47  ;;  %v3177_v31 = vunpack.c.l.bf16 %v3985_v20 }
  0x95   : > { %v913_v58 = vsub.f32 %v3923_v6, %v746_v50  ;;  %v911_v59 = vsub.f32 %v3925_v7, %v734_v51  ;;  %v749_v60 = vrot.slane %v748_v52, 2  ;;  %v737_v61 = vrot.slane %v736_v53, 2  ;;  %1959 = vadd.xlane.f32.xlu2 %v1958_v28  ;;  %1956 = vadd.xlane.f32.xlu1 %v1955_v33 }
  0x96   : > { %v909_v63 = vsub.f32 %v3930_v62, %v722_v54  ;;  %v725_v1 = vrot.slane %v724_v55, 2  ;;  %1953 = vadd.xlane.f32.xlu0 %v1952_v48  ;;  %v3181_v28 = vunpack.c.l.bf16 %v3980_v3 }
  0x97   : > { %v949_v5 = vmul.f32 1.442695, %v913_v58  ;;  %v945_v6 = vmul.f32 1.442695, %v911_v59  ;;  %v750_v7 = vmax.f32 %v748_v52, %v749_v60  ;;  %v738_v8 = vmax.f32 %v736_v53, %v737_v61  ;;  %v4013_v58 = vld [vmem:[%s3965_s19 + $0x20] sm:$0xff]  }
  0x98   : > { %v941_v9 = vmul.f32 1.442695, %v909_v63  ;;  %v726_v10 = vmax.f32 %v724_v55, %v725_v1  ;;  %v3967_v11 = vpop.xlane.xlu2 %646  ;;  %v3969_v62 = vpop.xlane.xlu1 %643  ;;  %v3182_v63 = vunpack.c.h.bf16 %v3980_v3  ;;  %v3178_v1 = vunpack.c.h.bf16 %v3985_v20 }
  0x99   : > { %3435 = vpow2.f32 %v949_v5  ;;  %v751_v14 = vrot.slane %v750_v7, 1  ;;  %v739_v15 = vrot.slane %v738_v8, 1  ;;  %v765_v0 = vrot.slane %v3967_v11, 4  ;;  %v3974_v16 = vpop.xlane.xlu0 %640 }
  0x9a   : > { %3437 = vpow2.f32 %v945_v6  ;;  %v727_v18 = vrot.slane %v726_v10, 1  ;;  %v759_v4 = vrot.slane %v3969_v62, 4  ;;  %v753_v19 = vrot.slane %v3974_v16, 4 }
  0x9b   : > { %3439 = vpow2.f32 %v941_v9  ;;  %v752_v21 = vmax.f32 %v750_v7, %v751_v14  ;;  %v740_v22 = vmax.f32 %v738_v8, %v739_v15  ;;  %v766_v23 = vmax.f32 %v3967_v11, %v765_v0 }
  0x9c   : > { %v728_v24 = vmax.f32 %v726_v10, %v727_v18  ;;  %v760_v25 = vmax.f32 %v3969_v62, %v759_v4  ;;  %v754_v26 = vmax.f32 %v3974_v16, %v753_v19 }
  0x9d   : > { %v914_v29 = vsub.f32 %v3943_v36, %v752_v21  ;;  %v912_v30 = vsub.f32 %v3945_v37, %v740_v22  ;;  %1968 = vadd.xlane.f32.xlu2 %v1967_v2  ;;  %1965 = vadd.xlane.f32.xlu1 %v1964_v12  ;;  %v767_v33 = vrot.slane %v766_v23, 2 }
  0x9e   : > { %v910_v32 = vsub.f32 %v3950_v45, %v728_v24  ;;  %v761_v34 = vrot.slane %v760_v25, 2  ;;  %1962 = vadd.xlane.f32.xlu0 %v1961_v13  ;;  %v755_v41 = vrot.slane %v754_v26, 2  ;;  %v3193_v13 = vunpack.c.l.bf16 %v4013_v58 }
  0x9f   : > { %v3996_v35 = vpop.eup %3435  ;;  %v951_v38 = vmul.f32 1.442695, %v914_v29  ;;  %v947_v40 = vmul.f32 1.442695, %v912_v30  ;;  %v768_v43 = vmax.f32 %v766_v23, %v767_v33 }
  0xa0   : > { %v3999_v42 = vpop.eup %3437  ;;  %v1029_v36 = vrot.slane %v3996_v35, 4  ;;  %v943_v37 = vmul.f32 1.442695, %v910_v32  ;;  %v762_v44 = vmax.f32 %v760_v25, %v761_v34  ;;  %v4002_v46 = vpop.xlane.xlu2 %655  ;;  %v756_v48 = vmax.f32 %v754_v26, %v755_v41 }
  0xa1   : > { %v4004_v45 = vpop.eup %3439  ;;  %v1017_v47 = vrot.slane %v3999_v42, 4  ;;  %3441 = vpow2.f32 %v951_v38  ;;  %v783_v49 = vrot.slane %v4002_v46, 4  ;;  %v769_v52 = vrot.slane %v768_v43, 1  ;;  %v4019_v9 = vpop.xlane.xlu1 %652 }
  0xa2   : > { %v1030_v50 = vadd.f32 %v3996_v35, %v1029_v36  ;;  %v1005_v51 = vrot.slane %v4004_v45, 4  ;;  %3443 = vpow2.f32 %v947_v40  ;;  %v763_v54 = vrot.slane %v762_v44, 1 }
  0xa3   : > { %v1018_v53 = vadd.f32 %v3999_v42, %v1017_v47  ;;  %3445 = vpow2.f32 %v943_v37  ;;  %v757_v55 = vrot.slane %v756_v48, 1  ;;  %v770_v59 = vmax.f32 %v768_v43, %v769_v52  ;;  %v4040_v37 = vld [vmem:[%s3965_s19 + $0x18] sm:$0xff]  }
  0xa4   : > { %v1031_v56 = vrot.slane %v1030_v50, 2  ;;  %v1006_v57 = vadd.f32 %v4004_v45, %v1005_v51  ;;  %v784_v60 = vmax.f32 %v4002_v46, %v783_v49  ;;  %v764_v2 = vmax.f32 %v762_v44, %v763_v54 }
  0xa5   : > { %v1019_v61 = vrot.slane %v1018_v53, 2  ;;  %v917_v7 = vsub.f32 %v3967_v11, %v770_v59  ;;  %v758_v8 = vmax.f32 %v756_v48, %v757_v55  ;;  %v777_v25 = vrot.slane %v4019_v9, 4 }
  0xa6   : > { %v1032_v5 = vadd.f32 %v1031_v56, %v1030_v50  ;;  %v1007_v6 = vrot.slane %v1006_v57, 2  ;;  %v916_v14 = vsub.f32 %v3969_v62, %v764_v2  ;;  %v785_v15 = vrot.slane %v784_v60, 2  ;;  %v4046_v56 = vld [vmem:[%s3858_s13 + $0x18] sm:$0x1] }
  0xa7   : > { %v4021_v10 = vpop.eup %3441  ;;  %v1020_v12 = vadd.f32 %v1019_v61, %v1018_v53  ;;  %v957_v21 = vmul.f32 1.442695, %v917_v7  ;;  %v915_v24 = vsub.f32 %v3974_v16, %v758_v8  ;;  %v4037_v16 = vpop.xlane.xlu0 %649  ;;  %v778_v49 = vmax.f32 %v4019_v9, %v777_v25 }
  0xa8   : > { %v4025_v0 = vpop.eup %3443  ;;  %v1033_v18 = vrot.slane %v1032_v5, 1  ;;  %v1008_v4 = vadd.f32 %v1007_v6, %v1006_v57  ;;  %v1035_v19 = vrot.slane %v4021_v10, 4  ;;  %v955_v34 = vmul.f32 1.442695, %v916_v14 }
  0xa9   : > { %v4028_v22 = vpop.eup %3445  ;;  %v1021_v11 = vrot.slane %v1020_v12, 1  ;;  %v1023_v23 = vrot.slane %v4025_v0, 4  ;;  %3447 = vpow2.f32 %v957_v21  ;;  %v953_v43 = vmul.f32 1.442695, %v915_v24 }
  0xaa   : > { %v1034_v26 = vadd.f32 %v1033_v18, %v1032_v5  ;;  %v1009_v62 = vrot.slane %v1008_v4, 1  ;;  %v1036_v29 = vadd.f32 %v4021_v10, %v1035_v19  ;;  %v1011_v30 = vrot.slane %v4028_v22, 4 }
  0xab   : > { %v1022_v32 = vadd.f32 %v1021_v11, %v1020_v12  ;;  %v1024_v33 = vadd.f32 %v4025_v0, %v1023_v23  ;;  %v786_v44 = vmax.f32 %v784_v60, %v785_v15  ;;  %v771_v52 = vrot.slane %v4037_v16, 4 }
  0xac   : > { %3449 = vrcp.f32 %v1034_v26  ;;  %v1010_v38 = vadd.f32 %v1009_v62, %v1008_v4  ;;  %v1037_v40 = vrot.slane %v1036_v29, 2  ;;  %v1012_v41 = vadd.f32 %v4028_v22, %v1011_v30 }
  0xad   : > { %3451 = vrcp.f32 %v1022_v32  ;;  %v1025_v36 = vrot.slane %v1024_v33, 2  ;;  %v787_v51 = vrot.slane %v786_v44, 1  ;;  %v3190_v55 = vunpack.c.h.bf16 %v4040_v37 }
  0xae   : > { %3453 = vrcp.f32 %v1010_v38  ;;  %v1038_v47 = vadd.f32 %v1037_v40, %v1036_v29  ;;  %v1013_v48 = vrot.slane %v1012_v41, 2  ;;  %v3189_v60 = vunpack.c.l.bf16 %v4040_v37 }
  0xaf   : > { %v1026_v50 = vadd.f32 %v1025_v36, %v1024_v33  ;;  %3455 = vpow2.f32 %v955_v34  ;;  %v4048_v57 = vpop.eup %3447  ;;  %v788_v61 = vmax.f32 %v786_v44, %v787_v51  ;;  %v779_v2 = vrot.slane %v778_v49, 2 }
  0xb0   : > { %v1039_v53 = vrot.slane %v1038_v47, 1  ;;  %v1014_v54 = vadd.f32 %v1013_v48, %v1012_v41  ;;  %3457 = vpow2.f32 %v953_v43  ;;  %v1053_v8 = vrot.slane %v4048_v57, 4 }
  0xb1   : > { %v1027_v59 = vrot.slane %v1026_v50, 1  ;;  %v4053_v12 = vmax.f32 %v4037_v16, %v771_v52  ;;  %v920_v4 = vsub.f32 %v4002_v46, %v788_v61  ;;  %v1736_v19 = vunpack.c.l.bf16 %v4046_v56 }
  0xb2   : > { %v3450_v5 = vpop.eup %3449  ;;  %v1040_v6 = vadd.f32 %v1039_v53, %v1038_v47  ;;  %v1015_v7 = vrot.slane %v1014_v54, 1  ;;  %v1054_v24 = vadd.f32 %v4048_v57, %v1053_v8  ;;  %v4074_v34 = vmax.f32 %v778_v49, %v779_v2 }
  0xb3   : > { %v3452_v14 = vpop.eup %3451  ;;  %v1233_v15 = vmul.f32 %v3450_v5, %v3996_v35  ;;  %v1028_v18 = vadd.f32 %v1027_v59, %v1026_v50  ;;  %v963_v35 = vmul.f32 1.442695, %v920_v4 }
  0xb4   : > { %v3454_v21 = vpop.eup %3453  ;;  %v1231_v11 = vmul.f32 %v3452_v14, %v3999_v42  ;;  %3459 = vrcp.f32 %v1040_v6  ;;  %v1016_v23 = vadd.f32 %v1015_v7, %v1014_v54  ;;  %v1055_v42 = vrot.slane %v1054_v24, 2 }
  0xb5   : > { %v4060_v25 = vpop.eup %3455  ;;  %v1297_v26 = vmul.f32 %v3185_v27, %v1233_v15  ;;  %v1229_v62 = vmul.f32 %v3454_v21, %v4004_v45  ;;  %3461 = vrcp.f32 %v1028_v18  ;;  %v781_v54 = vrot.slane %v4074_v34, 1 }
  0xb6   : > { %v4065_v29 = vpop.eup %3457  ;;  %v1295_v46 = vmul.f32 %v3181_v28, %v1231_v11  ;;  %3463 = vrcp.f32 %v1016_v23  ;;  %v1047_v30 = vrot.slane %v4060_v25, 4  ;;  %v1056_v40 = vadd.f32 %v1055_v42, %v1054_v24 }
  0xb7   : > { %v1353_v32 = vsel %vm620_vm0, %v1297_v26, 0.0  ;;  %v1293_v33 = vmul.f32 %v3177_v31, %v1229_v62  ;;  %v1041_v27 = vrot.slane %v4065_v29, 4  ;;  %3465 = vpow2.f32 %v963_v35 }
  0xb8   : > { %v1354_v45 = vrot.slane %v1353_v32, 4  ;;  %v1339_v38 = vsel %vm620_vm0, %v1295_v46, 0.0  ;;  %v1048_v28 = vadd.f32 %v4060_v25, %v1047_v30  ;;  %v1057_v48 = vrot.slane %v1056_v40, 1 }
  0xb9   : > { %v1340_v41 = vrot.slane %v1339_v38, 4  ;;  %v1325_v36 = vsel %vm620_vm0, %v1293_v33, 0.0  ;;  %v1042_v43 = vadd.f32 %v4065_v29, %v1041_v27 }
  0xba   : > { %v3460_v44 = vpop.eup %3459  ;;  %v1355_v31 = vadd.f32 %v1354_v45, %v1353_v32  ;;  %v1326_v47 = vrot.slane %v1325_v36, 4  ;;  %v1049_v49 = vrot.slane %v1048_v28, 2  ;;  %v1058_v6 = vadd.f32 %v1057_v48, %v1056_v40  ;;  %v1596_v32 = vld [vmem:[%s4097_s22 + $0x4] sm:$0x1] }
  0xbb   : > { %v3462_v50 = vpop.eup %3461  ;;  %v1341_v51 = vadd.f32 %v1340_v41, %v1339_v38  ;;  %v1234_v52 = vmul.f32 %v3460_v44, %v4021_v10  ;;  %v1043_v53 = vrot.slane %v1042_v43, 2 }
  0xbc   : > { %v3464_v59 = vpop.eup %3463  ;;  %v1356_v61 = vrot.slane %v1355_v31, 2  ;;  %v1327_v2 = vadd.f32 %v1326_v47, %v1325_v36  ;;  %v1232_v5 = vmul.f32 %v3462_v50, %v4025_v0  ;;  %v1050_v15 = vadd.f32 %v1049_v49, %v1048_v28  ;;  %v1590_v28 = vld [vmem:[%s4097_s22 + $0x2] sm:$0x1]  ;;  %v1584_v47 = vld [vmem:[%s4097_s22] sm:$0x1] }
  0xbd   : > { %v1342_v7 = vrot.slane %v1341_v51, 2  ;;  %v1298_v8 = vmul.f32 %v3186_v39, %v1234_v52  ;;  %v1230_v14 = vmul.f32 %v3464_v59, %v4028_v22  ;;  %3467 = vrcp.f32 %v1058_v6  ;;  %v4088_v21 = vpop.eup %3465 }
  0xbe   : > { %v1357_v18 = vadd.f32 %v1356_v61, %v1355_v31  ;;  %v1328_v4 = vrot.slane %v1327_v2, 2  ;;  %v1296_v10 = vmul.f32 %v3182_v63, %v1232_v5  ;;  %v1051_v24 = vrot.slane %v1050_v15, 1 }
  0xbf   : > { %v1343_v11 = vadd.f32 %v1342_v7, %v1341_v51  ;;  %v1360_v23 = vsel %vm620_vm0, %v1298_v8, 0.0  ;;  %v1294_v0 = vmul.f32 %v3178_v1, %v1230_v14  ;;  %v1044_v45 = vadd.f32 %v1043_v53, %v1042_v43  ;;  %v4122_v8 = vld [vmem:[%s3965_s19 + $0x28] sm:$0xff]  }
  0xc0   : > { %v1358_v17 = vrot.slane %v1357_v18, 1  ;;  %v1329_v39 = vadd.f32 %v1328_v4, %v1327_v2  ;;  %v1361_v3 = vrot.slane %v1360_v23, 4  ;;  %v1346_v63 = vsel %vm620_vm0, %v1296_v10, 0.0 }
  0xc1   : > { %v1344_v22 = vrot.slane %v1343_v11, 1  ;;  %v1347_v26 = vrot.slane %v1346_v63, 4  ;;  %v1332_v62 = vsel %vm620_vm0, %v1294_v0, 0.0  ;;  %v1052_v35 = vadd.f32 %v1051_v24, %v1050_v15  ;;  %v1599_v24 = vld [vmem:[%s4097_s22 + $0x5] sm:$0x1] }
  0xc2   : > { %v1359_v20 = vadd.f32 %v1358_v17, %v1357_v18  ;;  %v1330_v1 = vrot.slane %v1329_v39, 1  ;;  %v1362_v46 = vadd.f32 %v1361_v3, %v1360_v23  ;;  %v1333_v42 = vrot.slane %v1332_v62, 4 }
  0xc3   : > { %v1345_v33 = vadd.f32 %v1344_v22, %v1343_v11  ;;  %v1348_v27 = vadd.f32 %v1347_v26, %v1346_v63  ;;  %3469 = vrcp.f32 %v1052_v35  ;;  %v3468_v38 = vpop.eup %3467  ;;  %v1045_v50 = vrot.slane %v1044_v45, 1  ;;  %v1593_v26 = vld [vmem:[%s4097_s22 + $0x3] sm:$0x1] }
  0xc4   : > { %v1553_v40 = vpack.c.bf16 %v1359_v20, %v1359_v20  ;;  %v1331_v41 = vadd.f32 %v1330_v1, %v1329_v39  ;;  %v1363_v36 = vrot.slane %v1362_v46, 2  ;;  %v1334_v44 = vadd.f32 %v1333_v42, %v1332_v62  ;;  %v1587_v1 = vld [vmem:[%s4097_s22 + $0x1] sm:$0x1] }
  0xc5   : > { %v1551_v31 = vpack.c.bf16 %v1345_v33, %v1345_v33  ;;  %v1349_v48 = vrot.slane %v1348_v27, 2  ;;  %v1237_v49 = vmul.f32 %v3468_v38, %v4048_v57  ;;  %v1046_v5 = vadd.f32 %v1045_v50, %v1044_v45  ;;  %v4145_v45 = vld [vmem:[%s3871_s16 + $0x60] sm:$0xff]  }
  0xc6   : > { %v1597_v51 = vsel %vm4103_vm3, %v1553_v40, %v1596_v32  ;;  %v1549_v43 = vpack.c.bf16 %v1331_v41, %v1331_v41  ;;  %v1364_v52 = vadd.f32 %v1363_v36, %v1362_v46  ;;  %v1335_v53 = vrot.slane %v1334_v44, 2 }
  0xc7   : > { %1598 = vst [vmem:[%s4097_s22 + $0x4] sm:$0x1] %v1597_v51  ;;  %v1591_v59 = vsel %vm4103_vm3, %v1551_v31, %v1590_v28  ;;  %v1350_v61 = vadd.f32 %v1349_v48, %v1348_v27  ;;  %v1301_v2 = vmul.f32 %v3193_v13, %v1237_v49  ;;  %v1071_v14 = vrot.slane %v4088_v21, 4  ;;  %v1703_v31 = vld [vmem:[%s3858_s13 + $0x17] sm:$0x1] }
  0xc8   : > { %1592 = vst [vmem:[%s4097_s22 + $0x2] sm:$0x1] %v1591_v59  ;;  %v1585_v57 = vsel %vm4103_vm3, %v1549_v43, %v1584_v47  ;;  %v1365_v6 = vrot.slane %v1364_v52, 1  ;;  %v1336_v7 = vadd.f32 %v1335_v53, %v1334_v44  ;;  %3471 = vrcp.f32 %v1046_v5  ;;  %v3407_v47 = vld [vmem:[%s3871_s16 + $0x58] sm:$0xff]   ;;  %v1702_v5 = vld [vmem:[%s3858_s13 + $0x16] sm:$0x1] }
  0xc9   : > { %v3470_v15 = vpop.eup %3469  ;;  %1586 = vst [vmem:[%s4097_s22] sm:$0x1] %v1585_v57  ;;  %v1351_v18 = vrot.slane %v1350_v61, 1  ;;  %v1381_v4 = vsel %vm620_vm0, %v1301_v2, 0.0  ;;  %v773_v13 = vrot.slane %v4053_v12, 2  ;;  %v3198_v39 = vunpack.c.h.bf16 %v4122_v8 }
  0xca   : > { %v1366_v10 = vadd.f32 %v1365_v6, %v1364_v52  ;;  %v1337_v11 = vrot.slane %v1336_v7, 1  ;;  %v1382_v23 = vrot.slane %v1381_v4, 4  ;;  %v1236_v0 = vmul.f32 %v3470_v15, %v4060_v25  ;;  %v1608_v15 = vld [vmem:[%s4097_s22 + $0x8] sm:$0x1] }
  0xcb   : > { %v1352_v17 = vadd.f32 %v1351_v18, %v1350_v61  ;;  %v1072_v3 = vadd.f32 %v4088_v21, %v1071_v14  ;;  %v782_v63 = vmax.f32 %v4074_v34, %v781_v54  ;;  %v774_v32 = vmax.f32 %v4053_v12, %v773_v13 }
  0xcc   : > { %v1554_v22 = vpack.c.bf16 %v1366_v10, %v1366_v10  ;;  %v1338_v62 = vadd.f32 %v1337_v11, %v1336_v7  ;;  %v1383_v35 = vadd.f32 %v1382_v23, %v1381_v4  ;;  %v1300_v20 = vmul.f32 %v3190_v55, %v1236_v0  ;;  %v4167_v10 = vpop.xlane.xlu2 %664 }
  0xcd   : > { %v1552_v25 = vpack.c.bf16 %v1352_v17, %v1352_v17  ;;  %v1073_v46 = vrot.slane %v1072_v3, 2  ;;  %v919_v42 = vsub.f32 %v4019_v9, %v782_v63  ;;  %v775_v44 = vrot.slane %v774_v32, 1  ;;  %v4171_v17 = vpop.xlane.xlu1 %661 }
  0xce   : > { %v1600_v33 = vsel %vm4103_vm3, %v1554_v22, %v1599_v24  ;;  %v1550_v34 = vpack.c.bf16 %v1338_v62, %v1338_v62  ;;  %v1384_v54 = vrot.slane %v1383_v35, 2  ;;  %v1374_v27 = vsel %vm620_vm0, %v1300_v20, 0.0  ;;  %v3472_v55 = vpop.eup %3471  ;;  %v1707_v62 = vld [vmem:[%s3858_s13 + $0x1b] sm:$0x1] }
  0xcf   : > { %1601 = vst [vmem:[%s4097_s22 + $0x5] sm:$0x1] %v1600_v33  ;;  %v1594_v38 = vsel %vm4103_vm3, %v1552_v25, %v1593_v26  ;;  %v1375_v9 = vrot.slane %v1374_v27, 4  ;;  %v1074_v40 = vadd.f32 %v1073_v46, %v1072_v3  ;;  %v961_v12 = vmul.f32 1.442695, %v919_v42  ;;  %v4173_v3 = vpop.xlane.xlu0 %658 }
  0xd0   : > { %1595 = vst [vmem:[%s4097_s22 + $0x3] sm:$0x1] %v1594_v38  ;;  %v1588_v28 = vsel %vm4103_vm3, %v1550_v34, %v1587_v1  ;;  %v1385_v41 = vadd.f32 %v1384_v54, %v1383_v35  ;;  %v1235_v36 = vmul.f32 %v3472_v55, %v4065_v29  ;;  %v3289_v50 = vunpack.c.l.bf16 %v4145_v45  ;;  %v1605_v46 = vld [vmem:[%s4097_s22 + $0x7] sm:$0x1] }
  0xd1   : > { %1589 = vst [vmem:[%s4097_s22 + $0x1] sm:$0x1] %v1588_v28  ;;  %v1376_v48 = vadd.f32 %v1375_v9, %v1374_v27  ;;  %v1075_v49 = vrot.slane %v1074_v40, 1  ;;  %3473 = vpow2.f32 %v961_v12  ;;  %v776_v52 = vmax.f32 %v774_v32, %v775_v44 }
  0xd2   : > { %v1386_v51 = vrot.slane %v1385_v41, 1  ;;  %v1299_v43 = vmul.f32 %v3189_v60, %v1235_v36  ;;  %v1864_v53 = vperm.slane %v1736_v19, 0  ;;  %v1735_v61 = vunpack.c.l.bf16 %v1703_v31 }
  0xd3   : > { %v1377_v29 = vrot.slane %v1376_v48, 2  ;;  %v1076_v59 = vadd.f32 %v1075_v49, %v1074_v40  ;;  %v3286_v2 = vunpack.c.h.bf16 %v3407_v47  ;;  %v918_v7 = vsub.f32 %v4037_v16, %v776_v52  ;;  %v4188_v40 = vld [vmem:[%s3871_s16 + $0x68] sm:$0xff]  }
  0xd4   : > { %v1387_v57 = vadd.f32 %v1386_v51, %v1385_v41  ;;  %v1367_v6 = vsel %vm620_vm0, %v1299_v43, 0.0  ;;  %v1896_v14 = vmul.f32 %v3289_v50, %v1864_v53  ;;  %v1863_v37 = vperm.slane %v1735_v61, 0  ;;  %v1602_v61 = vld [vmem:[%s4097_s22 + $0x6] sm:$0x1] }
  0xd5   : > { %v1378_v18 = vadd.f32 %v1377_v29, %v1376_v48  ;;  %v1368_v4 = vrot.slane %v1367_v6, 4  ;;  %3475 = vrcp.f32 %v1076_v59  ;;  %v959_v13 = vmul.f32 1.442695, %v918_v7 }
  0xd6   : > { %v1557_v60 = vpack.c.bf16 %v1387_v57, %v1387_v57  ;;  %v1976_v56 = vsel %vm620_vm0, %v1896_v14, 0.0  ;;  %v1734_v19 = vunpack.c.l.bf16 %v1702_v5  ;;  %v1895_v16 = vmul.f32 %v3286_v2, %v1863_v37 }
  0xd7   : > { %v4169_v11 = vpop.eup %3473  ;;  %v1379_v23 = vrot.slane %v1378_v18, 1  ;;  %v1369_v0 = vadd.f32 %v1368_v4, %v1367_v6  ;;  %1977 = vadd.xlane.f32.xlu2 %v1976_v56  ;;  %v3285_v24 = vunpack.c.l.bf16 %v3407_v47  ;;  %3477 = vpow2.f32 %v959_v13  ;;  %v1706_v13 = vld [vmem:[%s3858_s13 + $0x1a] sm:$0x1] }
  0xd8   : > { %v1609_v63 = vsel %vm4103_vm3, %v1557_v60, %v1608_v15  ;;  %v1065_v22 = vrot.slane %v4169_v11, 4  ;;  %v1862_v26 = vperm.slane %v1734_v19, 0  ;;  %v1973_v25 = vsel %vm620_vm0, %v1895_v16, 0.0  ;;  %v1705_v16 = vld [vmem:[%s3858_s13 + $0x19] sm:$0x1] }
  0xd9   : > { %1610 = vst [vmem:[%s4097_s22 + $0x8] sm:$0x1] %v1609_v63  ;;  %v1380_v35 = vadd.f32 %v1379_v23, %v1378_v18  ;;  %v1370_v20 = vrot.slane %v1369_v0, 2  ;;  %v801_v1 = vrot.slane %v4167_v10, 4  ;;  %1974 = vadd.xlane.f32.xlu1 %v1973_v25  ;;  %v795_v33 = vrot.slane %v4171_v17, 4 }
  0xda   : > { %v1066_v42 = vadd.f32 %v4169_v11, %v1065_v22  ;;  %v1894_v32 = vmul.f32 %v3285_v24, %v1862_v26  ;;  %v789_v34 = vrot.slane %v4173_v3, 4  ;;  %v1739_v9 = vunpack.c.l.bf16 %v1707_v62 }
  0xdb   : > { %v3476_v54 = vpop.eup %3475  ;;  %v1556_v27 = vpack.c.bf16 %v1380_v35, %v1380_v35  ;;  %v1371_v55 = vadd.f32 %v1370_v20, %v1369_v0  ;;  %v802_v38 = vmax.f32 %v4167_v10, %v801_v1  ;;  %v796_v36 = vmax.f32 %v4171_v17, %v795_v33 }
  0xdc   : > { %v1240_v12 = vmul.f32 %v3476_v54, %v4088_v21  ;;  %v1067_v28 = vrot.slane %v1066_v42, 2  ;;  %v1970_v41 = vsel %vm620_vm0, %v1894_v32, 0.0  ;;  %v790_v48 = vmax.f32 %v4173_v3, %v789_v34 }
  0xdd   : > { %v1606_v44 = vsel %vm4103_vm3, %v1556_v27, %v1605_v46  ;;  %v1372_v31 = vrot.slane %v1371_v55, 1  ;;  %1971 = vadd.xlane.f32.xlu0 %v1970_v41  ;;  %v803_v47 = vrot.slane %v802_v38, 2  ;;  %v4196_v49 = vpop.eup %3477  ;;  %v797_v51 = vrot.slane %v796_v36, 2  ;;  %v4216_v27 = vpop.xlane.xlu2 %673 }
  0xde   : > { %1607 = vst [vmem:[%s4097_s22 + $0x7] sm:$0x1] %v1606_v44  ;;  %v1304_v21 = vmul.f32 %v3198_v39, %v1240_v12  ;;  %v1068_v50 = vadd.f32 %v1067_v28, %v1066_v42  ;;  %v3294_v43 = vunpack.c.h.bf16 %v4188_v40  ;;  %v1059_v53 = vrot.slane %v4196_v49, 4  ;;  %v4221_v44 = vpop.xlane.xlu1 %670 }
  0xdf   : > { %v1373_v52 = vadd.f32 %v1372_v31, %v1371_v55  ;;  %v804_v29 = vmax.f32 %v802_v38, %v803_v47  ;;  %v791_v59 = vrot.slane %v790_v48, 2  ;;  %v798_v57 = vmax.f32 %v796_v36, %v797_v51  ;;  %v4227_v47 = vpop.xlane.xlu0 %667 }
  0xe0   : > { %v1402_v2 = vsel %vm620_vm0, %v1304_v21, 0.0  ;;  %v1069_v5 = vrot.slane %v1068_v50, 1  ;;  %v1867_v6 = vperm.slane %v1739_v9, 0  ;;  %v1060_v14 = vadd.f32 %v4196_v49, %v1059_v53  ;;  %v1617_v21 = vld [vmem:[%s4097_s22 + $0xb] sm:$0x1] }
  0xe1   : > { %v1555_v7 = vpack.c.bf16 %v1373_v52, %v1373_v52  ;;  %v1403_v39 = vrot.slane %v1402_v2, 4  ;;  %v805_v15 = vrot.slane %v804_v29, 1  ;;  %v799_v4 = vrot.slane %v798_v57, 1 }
  0xe2   : > { %v1070_v18 = vadd.f32 %v1069_v5, %v1068_v50  ;;  %v792_v37 = vmax.f32 %v790_v48, %v791_v59  ;;  %v1899_v60 = vmul.f32 %v3294_v43, %v1867_v6  ;;  %v1061_v23 = vrot.slane %v1060_v14, 2  ;;  %v1710_v48 = vld [vmem:[%s3858_s13 + $0x1e] sm:$0x1] }
  0xe3   : > { %v1603_v56 = vsel %vm4103_vm3, %v1555_v7, %v1602_v61  ;;  %v1404_v19 = vadd.f32 %v1403_v39, %v1402_v2  ;;  %v806_v0 = vmax.f32 %v804_v29, %v805_v15  ;;  %v800_v24 = vmax.f32 %v798_v57, %v799_v4  ;;  %v4236_v59 = vld [vmem:[%s3871_s16 + $0x78] sm:$0xff]  }
  0xe4   : > { %1604 = vst [vmem:[%s4097_s22 + $0x6] sm:$0x1] %v1603_v56  ;;  %3479 = vrcp.f32 %v1070_v18  ;;  %v793_v63 = vrot.slane %v792_v37, 1  ;;  %v1985_v22 = vsel %vm620_vm0, %v1899_v60, 0.0  ;;  %v1062_v62 = vadd.f32 %v1061_v23, %v1060_v14 }
  0xe5   : > { %v1405_v26 = vrot.slane %v1404_v19, 2  ;;  %v923_v35 = vsub.f32 %v4167_v10, %v806_v0  ;;  %1986 = vadd.xlane.f32.xlu2 %v1985_v22  ;;  %v1738_v20 = vunpack.c.l.bf16 %v1706_v13  ;;  %v922_v25 = vsub.f32 %v4171_v17, %v800_v24 }
  0xe6   : > { %v794_v1 = vmax.f32 %v792_v37, %v793_v63  ;;  %v3293_v46 = vunpack.c.l.bf16 %v4188_v40  ;;  %v1737_v42 = vunpack.c.l.bf16 %v1705_v16  ;;  %v3197_v33 = vunpack.c.l.bf16 %v4122_v8 }
  0xe7   : > { %v1406_v32 = vadd.f32 %v1405_v26, %v1404_v19  ;;  %v1063_v34 = vrot.slane %v1062_v62, 1  ;;  %v969_v54 = vmul.f32 1.442695, %v923_v35  ;;  %v967_v55 = vmul.f32 1.442695, %v922_v25 }
  0xe8   : > { %v921_v38 = vsub.f32 %v4173_v3, %v794_v1  ;;  %v1866_v10 = vperm.slane %v1738_v20, 0  ;;  %v3290_v9 = vunpack.c.h.bf16 %v4145_v45  ;;  %v1865_v40 = vperm.slane %v1737_v42, 0  ;;  %v4225_v45 = vld [vmem:[%s3965_s19 + $0x38] sm:$0xff]  }
  0xe9   : > { %v1407_v17 = vrot.slane %v1406_v32, 1  ;;  %v1064_v12 = vadd.f32 %v1063_v34, %v1062_v62  ;;  %3481 = vpow2.f32 %v969_v54  ;;  %v819_v36 = vrot.slane %v4216_v27, 4 }
  0xea   : > { %v3480_v28 = vpop.eup %3479  ;;  %3483 = vpow2.f32 %v967_v55  ;;  %v965_v8 = vmul.f32 1.442695, %v921_v38  ;;  %v1898_v41 = vmul.f32 %v3293_v46, %v1866_v10  ;;  %v3194_v50 = vunpack.c.h.bf16 %v4013_v58 }
  0xeb   : > { %v1408_v31 = vadd.f32 %v1407_v17, %v1406_v32  ;;  %v1239_v3 = vmul.f32 %v3480_v28, %v4169_v11  ;;  %3485 = vrcp.f32 %v1064_v12  ;;  %v1897_v43 = vmul.f32 %v3290_v9, %v1865_v40 }
  0xec   : > { %3487 = vpow2.f32 %v965_v8  ;;  %v1982_v51 = vsel %vm620_vm0, %v1898_v41, 0.0  ;;  %v820_v29 = vmax.f32 %v4216_v27, %v819_v36  ;;  %v813_v11 = vrot.slane %v4221_v44, 4 }
  0xed   : > { %v1560_v52 = vpack.c.bf16 %v1408_v31, %v1408_v31  ;;  %v1303_v53 = vmul.f32 %v3197_v33, %v1239_v3  ;;  %1983 = vadd.xlane.f32.xlu1 %v1982_v51  ;;  %v3205_v61 = vunpack.c.l.bf16 %v4225_v45  ;;  %v1979_v2 = vsel %vm620_vm0, %v1897_v43, 0.0  ;;  %v1709_v3 = vld [vmem:[%s3858_s13 + $0x1d] sm:$0x1] }
  0xee   : > { %v807_v58 = vrot.slane %v4227_v47, 4  ;;  %v1742_v5 = vunpack.c.l.bf16 %v1710_v48  ;;  %1980 = vadd.xlane.f32.xlu0 %v1979_v2  ;;  %v821_v39 = vrot.slane %v820_v29, 2  ;;  %v814_v14 = vmax.f32 %v4221_v44, %v813_v11 }
  0xef   : > { %v4241_v57 = vpop.eup %3481  ;;  %v1618_v6 = vsel %vm4103_vm3, %v1560_v52, %v1617_v21  ;;  %v1395_v7 = vsel %vm620_vm0, %v1303_v53, 0.0  ;;  %v3301_v60 = vunpack.c.l.bf16 %v4236_v59  ;;  %v4265_v21 = vld [vmem:[%s3965_s19 + $0x30] sm:$0xff]  }
  0xf0   : > { %v4247_v15 = vpop.eup %3483  ;;  %1619 = vst [vmem:[%s4097_s22 + $0xb] sm:$0x1] %v1618_v6  ;;  %v1396_v18 = vrot.slane %v1395_v7, 4  ;;  %v1089_v4 = vrot.slane %v4241_v57, 4  ;;  %v808_v37 = vmax.f32 %v4227_v47, %v807_v58  ;;  %v822_v19 = vmax.f32 %v820_v29, %v821_v39 }
  0xf1   : > { %v3486_v13 = vpop.eup %3485  ;;  %v1083_v56 = vrot.slane %v4247_v15, 4  ;;  %v815_v23 = vrot.slane %v814_v14, 2  ;;  %v1870_v0 = vperm.slane %v1742_v5, 0  ;;  %v1741_v6 = vunpack.c.l.bf16 %v1709_v3 }
  0xf2   : > { %v4254_v16 = vpop.eup %3487  ;;  %v1397_v24 = vadd.f32 %v1396_v18, %v1395_v7  ;;  %v1238_v63 = vmul.f32 %v3486_v13, %v4196_v49  ;;  %v1090_v22 = vadd.f32 %v4241_v57, %v1089_v4  ;;  %v809_v26 = vrot.slane %v808_v37, 2  ;;  %v3410_v18 = vld [vmem:[%s3871_s16 + $0x70] sm:$0xff]   ;;  %v1708_v13 = vld [vmem:[%s3858_s13 + $0x1c] sm:$0x1] }
  0xf3   : > { %v1084_v62 = vadd.f32 %v4247_v15, %v1083_v56  ;;  %v1077_v35 = vrot.slane %v4254_v16, 4  ;;  %v823_v20 = vrot.slane %v822_v19, 1  ;;  %v816_v25 = vmax.f32 %v814_v14, %v815_v23  ;;  %v4278_v23 = vpop.xlane.xlu2 %682 }
  0xf4   : > { %v1398_v1 = vrot.slane %v1397_v24, 2  ;;  %v1302_v46 = vmul.f32 %v3194_v50, %v1238_v63  ;;  %v1091_v42 = vrot.slane %v1090_v22, 2  ;;  %v810_v32 = vmax.f32 %v808_v37, %v809_v26  ;;  %v4282_v63 = vld [vmem:[%s3965_s19 + $0x40] sm:$0xff]  }
  0xf5   : > { %v1085_v33 = vrot.slane %v1084_v62, 2  ;;  %v1078_v34 = vadd.f32 %v4254_v16, %v1077_v35  ;;  %v824_v54 = vmax.f32 %v822_v19, %v823_v20  ;;  %v817_v49 = vrot.slane %v816_v25, 1  ;;  %v4286_v35 = vpop.xlane.xlu0 %676 }
  0xf6   : > { %v1399_v55 = vadd.f32 %v1398_v1, %v1397_v24  ;;  %v1388_v38 = vsel %vm620_vm0, %v1302_v46, 0.0  ;;  %v1092_v10 = vadd.f32 %v1091_v42, %v1090_v22  ;;  %v811_v9 = vrot.slane %v810_v32, 1 }
  0xf7   : > { %v1389_v17 = vrot.slane %v1388_v38, 4  ;;  %v1086_v12 = vadd.f32 %v1085_v33, %v1084_v62  ;;  %v1079_v40 = vrot.slane %v1078_v34, 2  ;;  %v926_v28 = vsub.f32 %v4216_v27, %v824_v54  ;;  %v1614_v27 = vld [vmem:[%s4097_s22 + $0xa] sm:$0x1]  ;;  %v4284_v62 = vpop.xlane.xlu1 %679 }
  0xf8   : > { %v1400_v8 = vrot.slane %v1399_v55, 1  ;;  %v1093_v41 = vrot.slane %v1092_v10, 1  ;;  %v818_v36 = vmax.f32 %v816_v25, %v817_v49  ;;  %v812_v31 = vmax.f32 %v810_v32, %v811_v9  ;;  %v1611_v32 = vld [vmem:[%s4097_s22 + $0x9] sm:$0x1] }
  0xf9   : > { %v1390_v48 = vadd.f32 %v1389_v17, %v1388_v38  ;;  %v1087_v50 = vrot.slane %v1086_v12, 1  ;;  %v1080_v51 = vadd.f32 %v1079_v40, %v1078_v34  ;;  %v975_v43 = vmul.f32 1.442695, %v926_v28 }
  0xfa   : > { %v1401_v52 = vadd.f32 %v1400_v8, %v1399_v55  ;;  %v1094_v53 = vadd.f32 %v1093_v41, %v1092_v10  ;;  %v925_v29 = vsub.f32 %v4221_v44, %v818_v36  ;;  %v924_v11 = vsub.f32 %v4227_v47, %v812_v31 }
  0xfb   : > { %v1391_v2 = vrot.slane %v1390_v48, 2  ;;  %v1088_v58 = vadd.f32 %v1087_v50, %v1086_v12  ;;  %v1081_v5 = vrot.slane %v1080_v51, 1  ;;  %v3202_v39 = vunpack.c.h.bf16 %v4265_v21 }
  0xfc   : > { %v1559_v7 = vpack.c.bf16 %v1401_v52, %v1401_v52  ;;  %3489 = vrcp.f32 %v1094_v53  ;;  %v973_v14 = vmul.f32 1.442695, %v925_v29  ;;  %v971_v44 = vmul.f32 1.442695, %v924_v11 }
  0xfd   : > { %v1392_v4 = vadd.f32 %v1391_v2, %v1390_v48  ;;  %3491 = vrcp.f32 %v1088_v58  ;;  %v1082_v37 = vadd.f32 %v1081_v5, %v1080_v51  ;;  %v3201_v56 = vunpack.c.l.bf16 %v4265_v21 }
  0xfe   : > { %v1615_v47 = vsel %vm4103_vm3, %v1559_v7, %v1614_v27  ;;  %3493 = vpow2.f32 %v975_v43  ;;  %v1902_v19 = vmul.f32 %v3301_v60, %v1870_v0  ;;  %v3298_v22 = vunpack.c.h.bf16 %v3410_v18 }
  0xff   : > { %1616 = vst [vmem:[%s4097_s22 + $0xa] sm:$0x1] %v1615_v47  ;;  %v1393_v24 = vrot.slane %v1392_v4, 1  ;;  %3495 = vrcp.f32 %v1082_v37  ;;  %v1869_v26 = vperm.slane %v1741_v6, 0  ;;  %v1740_v25 = vunpack.c.l.bf16 %v1708_v13 }
 0x100   : > { %3497 = vpow2.f32 %v973_v14  ;;  %v1994_v20 = vsel %vm620_vm0, %v1902_v19, 0.0  ;;  %v3297_v1 = vunpack.c.l.bf16 %v3410_v18  ;;  %v837_v46 = vrot.slane %v4278_v23, 4 }
 0x101   : > { %v1394_v60 = vadd.f32 %v1393_v24, %v1392_v4  ;;  %3499 = vpow2.f32 %v971_v44  ;;  %1995 = vadd.xlane.f32.xlu2 %v1994_v20  ;;  %v1901_v0 = vmul.f32 %v3298_v22, %v1869_v26  ;;  %v3210_v33 = vunpack.c.h.bf16 %v4282_v63 }
 0x102   : > { %v3490_v42 = vpop.eup %3489  ;;  %v1868_v34 = vperm.slane %v1740_v25, 0  ;;  %v831_v54 = vrot.slane %v4284_v62, 4  ;;  %v825_v49 = vrot.slane %v4286_v35, 4  ;;  %v838_v17 = vmax.f32 %v4278_v23, %v837_v46 }
 0x103   : > { %v3492_v55 = vpop.eup %3491  ;;  %v1558_v38 = vpack.c.bf16 %v1394_v60, %v1394_v60  ;;  %v1243_v10 = vmul.f32 %v3490_v42, %v4241_v57  ;;  %v1991_v9 = vsel %vm620_vm0, %v1901_v0, 0.0  ;;  %v1711_v0 = vld [vmem:[%s3858_s13 + $0x1f] sm:$0x1] }
 0x104   : > { %v4297_v12 = vpop.eup %3493  ;;  %v1242_v40 = vmul.f32 %v3492_v55, %v4247_v15  ;;  %1992 = vadd.xlane.f32.xlu1 %v1991_v9  ;;  %v1900_v28 = vmul.f32 %v3297_v1, %v1868_v34  ;;  %v832_v8 = vmax.f32 %v4284_v62, %v831_v54  ;;  %v4302_v41 = vmax.f32 %v4286_v35, %v825_v49 }
 0x105   : > { %v3496_v36 = vpop.eup %3495  ;;  %v1612_v31 = vsel %vm4103_vm3, %v1558_v38, %v1611_v32  ;;  %v1307_v57 = vmul.f32 %v3205_v61, %v1243_v10  ;;  %v1107_v3 = vrot.slane %v4297_v12, 4  ;;  %v839_v48 = vrot.slane %v838_v17, 2 }
 0x106   : > { %v4309_v21 = vpop.eup %3497  ;;  %1613 = vst [vmem:[%s4097_s22 + $0x9] sm:$0x1] %v1612_v31  ;;  %v1306_v15 = vmul.f32 %v3202_v39, %v1242_v40  ;;  %v1241_v50 = vmul.f32 %v3496_v36, %v4254_v16  ;;  %v1988_v51 = vsel %vm620_vm0, %v1900_v28, 0.0  ;;  %v833_v43 = vrot.slane %v832_v8, 2 }
 0x107   : > { %v4314_v52 = vpop.eup %3499  ;;  %v1423_v53 = vsel %vm620_vm0, %v1307_v57, 0.0  ;;  %v1108_v29 = vadd.f32 %v4297_v12, %v1107_v3  ;;  %v1101_v61 = vrot.slane %v4309_v21, 4  ;;  %1989 = vadd.xlane.f32.xlu0 %v1988_v51  ;;  %v840_v11 = vmax.f32 %v838_v17, %v839_v48  ;;  %v1626_v3 = vld [vmem:[%s4097_s22 + $0xe] sm:$0x1] }
 0x108   : > { %v1424_v27 = vrot.slane %v1423_v53, 4  ;;  %v1416_v2 = vsel %vm620_vm0, %v1306_v15, 0.0  ;;  %v1305_v58 = vmul.f32 %v3201_v56, %v1241_v50  ;;  %v1095_v5 = vrot.slane %v4314_v52, 4 }
 0x109   : > { %v1417_v16 = vrot.slane %v1416_v2, 4  ;;  %v1109_v6 = vrot.slane %v1108_v29, 2  ;;  %v1102_v7 = vadd.f32 %v4309_v21, %v1101_v61  ;;  %v841_v39 = vrot.slane %v840_v11, 1  ;;  %v4331_v61 = vpop.xlane.xlu2 %691 }
 0x10a   : > { %v1425_v14 = vadd.f32 %v1424_v27, %v1423_v53  ;;  %v1409_v18 = vsel %vm620_vm0, %v1305_v58, 0.0  ;;  %v1096_v4 = vadd.f32 %v4314_v52, %v1095_v5  ;;  %v834_v37 = vmax.f32 %v832_v8, %v833_v43  ;;  %v1623_v43 = vld [vmem:[%s4097_s22 + $0xd] sm:$0x1]  ;;  %v4337_v5 = vpop.xlane.xlu0 %685 }
 0x10b   : > { %v1418_v44 = vadd.f32 %v1417_v16, %v1416_v2  ;;  %v1410_v13 = vrot.slane %v1409_v18, 4  ;;  %v1110_v47 = vadd.f32 %v1109_v6, %v1108_v29  ;;  %v1103_v19 = vrot.slane %v1102_v7, 2  ;;  %v1620_v6 = vld [vmem:[%s4097_s22 + $0xc] sm:$0x1] }
 0x10c   : > { %v1426_v24 = vrot.slane %v1425_v14, 2  ;;  %v1097_v56 = vrot.slane %v1096_v4, 2  ;;  %v842_v22 = vmax.f32 %v840_v11, %v841_v39  ;;  %v835_v26 = vrot.slane %v834_v37, 1  ;;  %v4333_v11 = vpop.xlane.xlu1 %688 }
 0x10d   : > { %v1419_v20 = vrot.slane %v1418_v44, 2  ;;  %v1411_v25 = vadd.f32 %v1410_v13, %v1409_v18  ;;  %v1111_v1 = vrot.slane %v1110_v47, 1  ;;  %v1104_v60 = vadd.f32 %v1103_v19, %v1102_v7 }
 0x10e   : > { %v1427_v46 = vadd.f32 %v1426_v24, %v1425_v14  ;;  %v1098_v42 = vadd.f32 %v1097_v56, %v1096_v4  ;;  %v929_v32 = vsub.f32 %v4278_v23, %v842_v22  ;;  %v836_v34 = vmax.f32 %v834_v37, %v835_v26 }
 0x10f   : > { %v1420_v54 = vadd.f32 %v1419_v20, %v1418_v44  ;;  %v1412_v49 = vrot.slane %v1411_v25, 2  ;;  %v1112_v55 = vadd.f32 %v1111_v1, %v1110_v47  ;;  %v1105_v38 = vrot.slane %v1104_v60, 1 }
 0x110   : > { %v1428_v10 = vrot.slane %v1427_v46, 1  ;;  %v1099_v9 = vrot.slane %v1098_v42, 1  ;;  %v981_v17 = vmul.f32 1.442695, %v929_v32  ;;  %v1743_v40 = vunpack.c.l.bf16 %v1711_v0 }
 0x111   : > { %v1421_v28 = vrot.slane %v1420_v54, 1  ;;  %v1413_v8 = vadd.f32 %v1412_v49, %v1411_v25  ;;  %3501 = vrcp.f32 %v1112_v55  ;;  %v1106_v36 = vadd.f32 %v1105_v38, %v1104_v60 }
 0x112   : > { %v1429_v31 = vadd.f32 %v1428_v10, %v1427_v46  ;;  %v1100_v57 = vadd.f32 %v1099_v9, %v1098_v42  ;;  %3503 = vpow2.f32 %v981_v17  ;;  %v928_v23 = vsub.f32 %v4284_v62, %v836_v34 }
 0x113   : > { %v1422_v48 = vadd.f32 %v1421_v28, %v1420_v54  ;;  %v1414_v15 = vrot.slane %v1413_v8, 1  ;;  %3505 = vrcp.f32 %v1106_v36  ;;  %v827_v50 = vrot.slane %v4302_v41, 2 }
 0x114   : > { %v1563_v51 = vpack.c.bf16 %v1429_v31, %v1429_v31  ;;  %3507 = vrcp.f32 %v1100_v57  ;;  %v979_v53 = vmul.f32 1.442695, %v928_v23  ;;  %v3302_v29 = vunpack.c.h.bf16 %v4236_v59 }
 0x115   : > { %v1562_v27 = vpack.c.bf16 %v1422_v48, %v1422_v48  ;;  %v1415_v62 = vadd.f32 %v1414_v15, %v1413_v8  ;;  %v3209_v2 = vunpack.c.l.bf16 %v4282_v63  ;;  %v3206_v58 = vunpack.c.h.bf16 %v4225_v45 }
 0x116   : > { %v1627_v16 = vsel %vm4103_vm3, %v1563_v51, %v1626_v3  ;;  %3509 = vpow2.f32 %v979_v53  ;;  %v828_v59 = vmax.f32 %v4302_v41, %v827_v50  ;;  %v1871_v7 = vperm.slane %v1743_v40, 0 }
 0x117   : > { %v3502_v39 = vpop.eup %3501  ;;  %1628 = vst [vmem:[%s4097_s22 + $0xe] sm:$0x1] %v1627_v16  ;;  %v1624_v14 = vsel %vm4103_vm3, %v1562_v27, %v1623_v43  ;;  %v1561_v18 = vpack.c.bf16 %v1415_v62, %v1415_v62  ;;  %v855_v4 = vrot.slane %v4331_v61, 4  ;;  %v849_v45 = vrot.slane %v4333_v11, 4 }
 0x118   : > { %v4348_v37 = vpop.eup %3503  ;;  %1625 = vst [vmem:[%s4097_s22 + $0xd] sm:$0x1] %v1624_v14  ;;  %v1246_v44 = vmul.f32 %v3502_v39, %v4297_v12  ;;  %v829_v13 = vrot.slane %v828_v59, 1  ;;  %v1903_v47 = vmul.f32 %v3302_v29, %v1871_v7  ;;  %v843_v41 = vrot.slane %v4337_v5, 4 }
 0x119   : > { %v3506_v19 = vpop.eup %3505  ;;  %v1621_v24 = vsel %vm4103_vm3, %v1561_v18, %v1620_v6  ;;  %v1125_v56 = vrot.slane %v4348_v37, 4  ;;  %v856_v22 = vmax.f32 %v4331_v61, %v855_v4  ;;  %v850_v26 = vmax.f32 %v4333_v11, %v849_v45  ;;  %v4376_v4 = vpop.xlane.xlu2 %700 }
 0x11a   : > { %v3508_v20 = vpop.eup %3507  ;;  %1622 = vst [vmem:[%s4097_s22 + $0xc] sm:$0x1] %v1621_v24  ;;  %v1310_v25 = vmul.f32 %v3210_v33, %v1246_v44  ;;  %v1245_v12 = vmul.f32 %v3506_v19, %v4309_v21  ;;  %v830_v1 = vmax.f32 %v828_v59, %v829_v13  ;;  %v1997_v60 = vsel %vm620_vm0, %v1903_v47, 0.0  ;;  %v4381_v13 = vld [vmem:[%s3965_s19 + $0x50] sm:$0xff]  }
 0x11b   : > { %v1244_v0 = vmul.f32 %v3508_v20, %v4314_v52  ;;  %v1126_v46 = vadd.f32 %v4348_v37, %v1125_v56  ;;  %1998 = vadd.xlane.f32.xlu0 %v1997_v60  ;;  %v857_v42 = vrot.slane %v856_v22, 2  ;;  %v851_v32 = vrot.slane %v850_v26, 2  ;;  %v4384_v56 = vld [vmem:[%s3965_s19 + $0x48] sm:$0xff]   ;;  %v1635_v20 = vld [vmem:[%s4097_s22 + $0x11] sm:$0x1] }
 0x11c   : > { %v4365_v34 = vpop.eup %3509  ;;  %v1444_v54 = vsel %vm620_vm0, %v1310_v25, 0.0  ;;  %v1309_v49 = vmul.f32 %v3209_v2, %v1245_v12  ;;  %v927_v63 = vsub.f32 %v4286_v35, %v830_v1  ;;  %v844_v33 = vmax.f32 %v4337_v5, %v843_v41 }
 0x11d   : > { %v1445_v21 = vrot.slane %v1444_v54, 4  ;;  %v1308_v55 = vmul.f32 %v3206_v58, %v1244_v0  ;;  %v1127_v38 = vrot.slane %v1126_v46, 2  ;;  %v1119_v10 = vrot.slane %v4365_v34, 4 }
 0x11e   : > { %v1437_v52 = vsel %vm620_vm0, %v1309_v49, 0.0  ;;  %v977_v9 = vmul.f32 1.442695, %v927_v63  ;;  %v858_v17 = vmax.f32 %v856_v22, %v857_v42  ;;  %v852_v40 = vmax.f32 %v850_v26, %v851_v32  ;;  %v1632_v42 = vld [vmem:[%s4097_s22 + $0x10] sm:$0x1]  ;;  %v4393_v63 = vpop.xlane.xlu1 %697 }
 0x11f   : > { %v1446_v28 = vadd.f32 %v1445_v21, %v1444_v54  ;;  %v1438_v8 = vrot.slane %v1437_v52, 4  ;;  %v1430_v36 = vsel %vm620_vm0, %v1308_v55, 0.0  ;;  %v1128_v31 = vadd.f32 %v1127_v38, %v1126_v46 }
 0x120   : > { %v1431_v57 = vrot.slane %v1430_v36, 4  ;;  %v1120_v35 = vadd.f32 %v4365_v34, %v1119_v10  ;;  %3511 = vpow2.f32 %v977_v9  ;;  %v859_v23 = vrot.slane %v858_v17, 1  ;;  %v1629_v10 = vld [vmem:[%s4097_s22 + $0xf] sm:$0x1] }
 0x121   : > { %v1447_v3 = vrot.slane %v1446_v28, 2  ;;  %v1439_v48 = vadd.f32 %v1438_v8, %v1437_v52  ;;  %v1129_v15 = vrot.slane %v1128_v31, 1  ;;  %v853_v50 = vrot.slane %v852_v40, 1 }
 0x122   : > { %v1432_v51 = vadd.f32 %v1431_v57, %v1430_v36  ;;  %v1121_v43 = vrot.slane %v1120_v35, 2  ;;  %v860_v53 = vmax.f32 %v858_v17, %v859_v23  ;;  %v845_v29 = vrot.slane %v844_v33, 2 }
 0x123   : > { %v1448_v27 = vadd.f32 %v1447_v3, %v1446_v28  ;;  %v1440_v62 = vrot.slane %v1439_v48, 2  ;;  %v1130_v2 = vadd.f32 %v1129_v15, %v1128_v31  ;;  %v854_v58 = vmax.f32 %v852_v40, %v853_v50  ;;  %v4403_v40 = vld [vmem:[%s3965_s19 + $0x58] sm:$0xff]  }
 0x124   : > { %v1433_v16 = vrot.slane %v1432_v51, 2  ;;  %v1122_v6 = vadd.f32 %v1121_v43, %v1120_v35  ;;  %v932_v59 = vsub.f32 %v4331_v61, %v860_v53  ;;  %v846_v7 = vmax.f32 %v844_v33, %v845_v29  ;;  %v4395_v33 = vpop.xlane.xlu0 %694  ;;  %v4421_v53 = vpop.xlane.xlu2 %709 }
 0x125   : > { %v1449_v39 = vrot.slane %v1448_v27, 1  ;;  %v1441_v14 = vadd.f32 %v1440_v62, %v1439_v48  ;;  %3513 = vrcp.f32 %v1130_v2  ;;  %v931_v18 = vsub.f32 %v4333_v11, %v854_v58 }
 0x126   : > { %v4378_v45 = vpop.eup %3511  ;;  %v1434_v44 = vadd.f32 %v1433_v16, %v1432_v51  ;;  %v1123_v47 = vrot.slane %v1122_v6, 1  ;;  %v987_v41 = vmul.f32 1.442695, %v932_v59  ;;  %v847_v19 = vrot.slane %v846_v7, 1 }
 0x127   : > { %v1450_v24 = vadd.f32 %v1449_v39, %v1448_v27  ;;  %v1442_v61 = vrot.slane %v1441_v14, 1  ;;  %v1113_v22 = vrot.slane %v4378_v45, 4  ;;  %v985_v26 = vmul.f32 1.442695, %v931_v18 }
 0x128   : > { %v1435_v11 = vrot.slane %v1434_v44, 1  ;;  %v1124_v25 = vadd.f32 %v1123_v47, %v1122_v6  ;;  %3515 = vpow2.f32 %v987_v41  ;;  %v848_v12 = vmax.f32 %v846_v7, %v847_v19 }
 0x129   : > { %v1566_v1 = vpack.c.bf16 %v1450_v24, %v1450_v24  ;;  %v1443_v60 = vadd.f32 %v1442_v61, %v1441_v14  ;;  %v3217_v0 = vunpack.c.l.bf16 %v4381_v13  ;;  %v1114_v46 = vadd.f32 %v4378_v45, %v1113_v22 }
 0x12a   : > { %v1436_v32 = vadd.f32 %v1435_v11, %v1434_v44  ;;  %v3214_v54 = vunpack.c.h.bf16 %v4384_v56  ;;  %3517 = vrcp.f32 %v1124_v25  ;;  %v3213_v49 = vunpack.c.l.bf16 %v4384_v56 }
 0x12b   : > { %v3514_v21 = vpop.eup %3513  ;;  %v1636_v55 = vsel %vm4103_vm3, %v1566_v1, %v1635_v20  ;;  %v1565_v38 = vpack.c.bf16 %v1443_v60, %v1443_v60  ;;  %v1115_v52 = vrot.slane %v1114_v46, 2  ;;  %3519 = vpow2.f32 %v985_v26 }
 0x12c   : > { %1637 = vst [vmem:[%s4097_s22 + $0x11] sm:$0x1] %v1636_v55  ;;  %v1564_v9 = vpack.c.bf16 %v1436_v32, %v1436_v32  ;;  %v1249_v17 = vmul.f32 %v3514_v21, %v4348_v37  ;;  %v930_v28 = vsub.f32 %v4337_v5, %v848_v12  ;;  %v873_v8 = vrot.slane %v4376_v4, 4 }
 0x12d   : > { %v1633_v36 = vsel %vm4103_vm3, %v1565_v38, %v1632_v42  ;;  %v1116_v31 = vadd.f32 %v1115_v52, %v1114_v46  ;;  %v867_v57 = vrot.slane %v4393_v63, 4  ;;  %v861_v35 = vrot.slane %v4395_v33, 4 }
 0x12e   : > { %v4411_v23 = vpop.eup %3515  ;;  %1634 = vst [vmem:[%s4097_s22 + $0x10] sm:$0x1] %v1633_v36  ;;  %v1630_v37 = vsel %vm4103_vm3, %v1564_v9, %v1629_v10  ;;  %v1313_v3 = vmul.f32 %v3217_v0, %v1249_v17  ;;  %v983_v48 = vmul.f32 1.442695, %v930_v28  ;;  %v874_v5 = vmax.f32 %v4376_v4, %v873_v8 }
 0x12f   : > { %1631 = vst [vmem:[%s4097_s22 + $0xf] sm:$0x1] %v1630_v37  ;;  %v1117_v15 = vrot.slane %v1116_v31, 1  ;;  %v3222_v50 = vunpack.c.h.bf16 %v4403_v40  ;;  %v1143_v51 = vrot.slane %v4411_v23, 4  ;;  %v868_v43 = vmax.f32 %v4393_v63, %v867_v57 }
 0x130   : > { %v3518_v29 = vpop.eup %3517  ;;  %v1465_v27 = vsel %vm620_vm0, %v1313_v3, 0.0  ;;  %3521 = vpow2.f32 %v983_v48  ;;  %v875_v62 = vrot.slane %v874_v5, 2  ;;  %v862_v2 = vmax.f32 %v4395_v33, %v861_v35 }
 0x131   : > { %v4425_v58 = vpop.eup %3519  ;;  %v1466_v16 = vrot.slane %v1465_v27, 4  ;;  %v1248_v6 = vmul.f32 %v3518_v29, %v4365_v34  ;;  %v1118_v59 = vadd.f32 %v1117_v15, %v1116_v31  ;;  %v1144_v7 = vadd.f32 %v4411_v23, %v1143_v51 }
 0x132   : > { %v1137_v39 = vrot.slane %v4425_v58, 4  ;;  %v876_v14 = vmax.f32 %v874_v5, %v875_v62  ;;  %v869_v18 = vrot.slane %v868_v43, 2  ;;  %v891_v44 = vrot.slane %v4421_v53, 4 }
 0x133   : > { %v1467_v47 = vadd.f32 %v1466_v16, %v1465_v27  ;;  %v1312_v41 = vmul.f32 %v3214_v54, %v1248_v6  ;;  %3523 = vrcp.f32 %v1118_v59  ;;  %v1145_v19 = vrot.slane %v1144_v7, 2  ;;  %v4453_v59 = vld [vmem:[%s3965_s19 + $0x60] sm:$0xff]  }
 0x134   : > { %v1138_v24 = vadd.f32 %v4425_v58, %v1137_v39  ;;  %v877_v61 = vrot.slane %v876_v14, 1  ;;  %v870_v22 = vmax.f32 %v868_v43, %v869_v18  ;;  %v863_v26 = vrot.slane %v862_v2, 2 }
 0x135   : > { %v1468_v20 = vrot.slane %v1467_v47, 2  ;;  %v1458_v34 = vsel %vm620_vm0, %v1312_v41, 0.0  ;;  %v1146_v11 = vadd.f32 %v1145_v19, %v1144_v7  ;;  %v3221_v25 = vunpack.c.l.bf16 %v4403_v40  ;;  %v1641_v19 = vld [vmem:[%s4097_s22 + $0x13] sm:$0x1] }
 0x136   : > { %v4434_v12 = vpop.eup %3521  ;;  %v1459_v1 = vrot.slane %v1458_v34, 4  ;;  %v1139_v60 = vrot.slane %v1138_v24, 2  ;;  %v878_v0 = vmax.f32 %v876_v14, %v877_v61  ;;  %v892_v46 = vmax.f32 %v4421_v53, %v891_v44 }
 0x137   : > { %v1469_v42 = vadd.f32 %v1468_v20, %v1467_v47  ;;  %v1147_v32 = vrot.slane %v1146_v11, 1  ;;  %v1131_v54 = vrot.slane %v4434_v12, 4  ;;  %v871_v21 = vrot.slane %v870_v22, 1 }
 0x138   : > { %v1460_v55 = vadd.f32 %v1459_v1, %v1458_v34  ;;  %v1140_v38 = vadd.f32 %v1139_v60, %v1138_v24  ;;  %v935_v10 = vsub.f32 %v4376_v4, %v878_v0  ;;  %v864_v52 = vmax.f32 %v862_v2, %v863_v26  ;;  %v1644_v4 = vld [vmem:[%s4097_s22 + $0x14] sm:$0x1]  ;;  %v4446_v2 = vpop.xlane.xlu1 %706 }
 0x139   : > { %v3524_v9 = vpop.eup %3523  ;;  %v1470_v17 = vrot.slane %v1469_v42, 1  ;;  %v1148_v28 = vadd.f32 %v1147_v32, %v1146_v11  ;;  %v1132_v8 = vadd.f32 %v4434_v12, %v1131_v54  ;;  %v872_v36 = vmax.f32 %v870_v22, %v871_v21 }
 0x13a   : > { %v1461_v31 = vrot.slane %v1460_v55, 2  ;;  %v1247_v57 = vmul.f32 %v3524_v9, %v4378_v45  ;;  %v1141_v35 = vrot.slane %v1140_v38, 1  ;;  %v993_v37 = vmul.f32 1.442695, %v935_v10 }
 0x13b   : > { %v1471_v3 = vadd.f32 %v1470_v17, %v1469_v42  ;;  %3525 = vrcp.f32 %v1148_v28  ;;  %v1133_v48 = vrot.slane %v1132_v8, 2  ;;  %v934_v5 = vsub.f32 %v4393_v63, %v872_v36  ;;  %v4450_v63 = vld [vmem:[%s3965_s19 + $0x68] sm:$0xff]   ;;  %v4477_v17 = vpop.xlane.xlu0 %703  ;;  %v4479_v28 = vpop.xlane.xlu2 %1905 }
 0x13c   : > { %v1462_v15 = vadd.f32 %v1461_v31, %v1460_v55  ;;  %v1311_v51 = vmul.f32 %v3213_v49, %v1247_v57  ;;  %v1142_v43 = vadd.f32 %v1141_v35, %v1140_v38  ;;  %3527 = vpow2.f32 %v993_v37 }
 0x13d   : > { %v1569_v29 = vpack.c.bf16 %v1471_v3, %v1471_v3  ;;  %v3218_v45 = vunpack.c.h.bf16 %v4381_v13  ;;  %v1134_v27 = vadd.f32 %v1133_v48, %v1132_v8  ;;  %v991_v62 = vmul.f32 1.442695, %v934_v5 }
 0x13e   : > { %v1463_v16 = vrot.slane %v1462_v15, 1  ;;  %v1451_v6 = vsel %vm620_vm0, %v1311_v51, 0.0  ;;  %3529 = vrcp.f32 %v1142_v43  ;;  %v865_v56 = vrot.slane %v864_v52, 1 }
 0x13f   : > { %v1645_v49 = vsel %vm4103_vm3, %v1569_v29, %v1644_v4  ;;  %v1452_v7 = vrot.slane %v1451_v6, 4  ;;  %v1135_v39 = vrot.slane %v1134_v27, 1  ;;  %3531 = vpow2.f32 %v991_v62 }
 0x140   : > { %1646 = vst [vmem:[%s4097_s22 + $0x14] sm:$0x1] %v1645_v49  ;;  %v1464_v14 = vadd.f32 %v1463_v16, %v1462_v15  ;;  %v866_v18 = vmax.f32 %v864_v52, %v865_v56  ;;  %v893_v44 = vrot.slane %v892_v46, 2  ;;  %v885_v47 = vrot.slane %v4446_v2, 4 }
 0x141   : > { %v3526_v41 = vpop.eup %3525  ;;  %v1453_v24 = vadd.f32 %v1452_v7, %v1451_v6  ;;  %v1136_v61 = vadd.f32 %v1135_v39, %v1134_v27  ;;  %v3229_v22 = vunpack.c.l.bf16 %v4450_v63  ;;  %v3226_v26 = vunpack.c.h.bf16 %v4453_v59  ;;  %v1638_v27 = vld [vmem:[%s4097_s22 + $0x12] sm:$0x1] }
 0x142   : > { %v4462_v20 = vpop.eup %3527  ;;  %v1568_v34 = vpack.c.bf16 %v1464_v14, %v1464_v14  ;;  %v1252_v11 = vmul.f32 %v3526_v41, %v4411_v23  ;;  %v933_v1 = vsub.f32 %v4395_v33, %v866_v18  ;;  %v894_v60 = vmax.f32 %v892_v46, %v893_v44 }
 0x143   : > { %v1454_v0 = vrot.slane %v1453_v24, 2  ;;  %3533 = vrcp.f32 %v1136_v61  ;;  %v1161_v42 = vrot.slane %v4462_v20, 4  ;;  %v886_v32 = vmax.f32 %v4446_v2, %v885_v47 }
 0x144   : > { %v3530_v54 = vpop.eup %3529  ;;  %v1642_v21 = vsel %vm4103_vm3, %v1568_v34, %v1641_v19  ;;  %v1316_v55 = vmul.f32 %v3222_v50, %v1252_v11  ;;  %v989_v38 = vmul.f32 1.442695, %v933_v1  ;;  %v895_v10 = vrot.slane %v894_v60, 1 }
 0x145   : > { %v4472_v52 = vpop.eup %3531  ;;  %1643 = vst [vmem:[%s4097_s22 + $0x13] sm:$0x1] %v1642_v21  ;;  %v1455_v33 = vadd.f32 %v1454_v0, %v1453_v24  ;;  %v1251_v23 = vmul.f32 %v3530_v54, %v4425_v58  ;;  %v1162_v46 = vadd.f32 %v4462_v20, %v1161_v42  ;;  %v887_v9 = vrot.slane %v886_v32, 2 }
 0x146   : > { %v1486_v8 = vsel %vm620_vm0, %v1316_v55, 0.0  ;;  %v1155_v36 = vrot.slane %v4472_v52, 4  ;;  %3535 = vpow2.f32 %v989_v38  ;;  %v896_v50 = vmax.f32 %v894_v60, %v895_v10  ;;  %v1653_v10 = vld [vmem:[%s4097_s22 + $0x17] sm:$0x1] }
 0x147   : > { %v1456_v31 = vrot.slane %v1455_v33, 1  ;;  %v1487_v57 = vrot.slane %v1486_v8, 4  ;;  %v1315_v35 = vmul.f32 %v3221_v25, %v1251_v23  ;;  %v1163_v58 = vrot.slane %v1162_v46, 2 }
 0x148   : > { %v1156_v37 = vadd.f32 %v4472_v52, %v1155_v36  ;;  %v938_v3 = vsub.f32 %v4421_v53, %v896_v50  ;;  %v879_v48 = vrot.slane %v4477_v17, 4  ;;  %v2000_v5 = vrot.slane %v4479_v28, 4 }
 0x149   : > { %v3534_v4 = vpop.eup %3533  ;;  %v1457_v15 = vadd.f32 %v1456_v31, %v1455_v33  ;;  %v1488_v51 = vadd.f32 %v1487_v57, %v1486_v8  ;;  %v1479_v43 = vsel %vm620_vm0, %v1315_v35, 0.0  ;;  %v1164_v29 = vadd.f32 %v1163_v58, %v1162_v46 }
 0x14a   : > { %v1480_v62 = vrot.slane %v1479_v43, 4  ;;  %v1250_v40 = vmul.f32 %v3534_v4, %v4434_v12  ;;  %v1157_v25 = vrot.slane %v1156_v37, 2  ;;  %v999_v16 = vmul.f32 1.442695, %v938_v3 }
 0x14b   : > { %v1567_v6 = vpack.c.bf16 %v1457_v15, %v1457_v15  ;;  %v1489_v56 = vrot.slane %v1488_v51, 2  ;;  %v1165_v53 = vrot.slane %v1164_v29, 1  ;;  %v888_v49 = vmax.f32 %v886_v32, %v887_v9 }
 0x14c   : > { %v4492_v7 = vpop.eup %3535  ;;  %v1481_v39 = vadd.f32 %v1480_v62, %v1479_v43  ;;  %v1314_v14 = vmul.f32 %v3218_v45, %v1250_v40  ;;  %v1158_v18 = vadd.f32 %v1157_v25, %v1156_v37  ;;  %3537 = vpow2.f32 %v999_v16 }
 0x14d   : > { %v1639_v44 = vsel %vm4103_vm3, %v1567_v6, %v1638_v27  ;;  %v1490_v47 = vadd.f32 %v1489_v56, %v1488_v51  ;;  %v1166_v12 = vadd.f32 %v1165_v53, %v1164_v29  ;;  %v1149_v41 = vrot.slane %v4492_v7, 4  ;;  %v4514_v51 = vpop.xlane.xlu1 %715 }
 0x14e   : > { %1640 = vst [vmem:[%s4097_s22 + $0x12] sm:$0x1] %v1639_v44  ;;  %v1482_v19 = vrot.slane %v1481_v39, 2  ;;  %v1472_v24 = vsel %vm620_vm0, %v1314_v14, 0.0  ;;  %v1159_v61 = vrot.slane %v1158_v18, 1  ;;  %v889_v34 = vrot.slane %v888_v49, 1 }
 0x14f   : > { %v1491_v11 = vrot.slane %v1490_v47, 1  ;;  %v1473_v1 = vrot.slane %v1472_v24, 4  ;;  %3539 = vrcp.f32 %v1166_v12  ;;  %v1150_v13 = vadd.f32 %v4492_v7, %v1149_v41  ;;  %v1647_v44 = vld [vmem:[%s4097_s22 + $0x15] sm:$0x1] }
 0x150   : > { %v1483_v45 = vadd.f32 %v1482_v19, %v1481_v39  ;;  %v1160_v60 = vadd.f32 %v1159_v61, %v1158_v18  ;;  %v890_v0 = vmax.f32 %v888_v49, %v889_v34  ;;  %v880_v42 = vmax.f32 %v4477_v17, %v879_v48  ;;  %v1650_v48 = vld [vmem:[%s4097_s22 + $0x16] sm:$0x1]  ;;  %v4525_v18 = vpop.xlane.xlu0 %712 }
 0x151   : > { %v1492_v32 = vadd.f32 %v1491_v11, %v1490_v47  ;;  %v1474_v54 = vadd.f32 %v1473_v1, %v1472_v24  ;;  %v3225_v21 = vunpack.c.l.bf16 %v4453_v59  ;;  %v1151_v55 = vrot.slane %v1150_v13, 2 }
 0x152   : > { %v4504_v38 = vpop.eup %3537  ;;  %v1484_v33 = vrot.slane %v1483_v45, 1  ;;  %3541 = vrcp.f32 %v1160_v60  ;;  %v937_v23 = vsub.f32 %v4446_v2, %v890_v0  ;;  %v881_v46 = vrot.slane %v880_v42, 2 }
 0x153   : > { %v1572_v9 = vpack.c.bf16 %v1492_v32, %v1492_v32  ;;  %v1475_v8 = vrot.slane %v1474_v54, 2  ;;  %v1152_v36 = vadd.f32 %v1151_v55, %v1150_v13  ;;  %v1179_v50 = vrot.slane %v4504_v38, 4 }
 0x154   : > { %v1485_v31 = vadd.f32 %v1484_v33, %v1483_v45  ;;  %v997_v57 = vmul.f32 1.442695, %v937_v23  ;;  %v882_v35 = vmax.f32 %v880_v42, %v881_v46  ;;  %v2001_v58 = vmax.f32 %v4479_v28, %v2000_v5  ;;  %v4540_v42 = vld [vmem:[%s3965_s19 + $0x70] sm:$0xff]  }
 0x155   : > { %v3540_v37 = vpop.eup %3539  ;;  %v1654_v3 = vsel %vm4103_vm3, %v1572_v9, %v1653_v10  ;;  %v1476_v4 = vadd.f32 %v1475_v8, %v1474_v54  ;;  %v1153_v15 = vrot.slane %v1152_v36, 1  ;;  %v1180_v2 = vadd.f32 %v4504_v38, %v1179_v50 }
 0x156   : > { %1655 = vst [vmem:[%s4097_s22 + $0x17] sm:$0x1] %v1654_v3  ;;  %v1571_v43 = vpack.c.bf16 %v1485_v31, %v1485_v31  ;;  %v1255_v29 = vmul.f32 %v3540_v37, %v4462_v20  ;;  %3543 = vpow2.f32 %v997_v57  ;;  %v883_v27 = vrot.slane %v882_v35, 1  ;;  %v4548_v31 = vpop.xlane.xlu2 %1914 }
 0x157   : > { %v1477_v5 = vrot.slane %v1476_v4, 1  ;;  %v1154_v62 = vadd.f32 %v1153_v15, %v1152_v36  ;;  %v1181_v40 = vrot.slane %v1180_v2, 2  ;;  %v2002_v25 = vrot.slane %v2001_v58, 2 }
 0x158   : > { %v3542_v16 = vpop.eup %3541  ;;  %v1651_v6 = vsel %vm4103_vm3, %v1571_v43, %v1650_v48  ;;  %v1319_v56 = vmul.f32 %v3229_v22, %v1255_v29  ;;  %v884_v53 = vmax.f32 %v882_v35, %v883_v27  ;;  %v903_v49 = vrot.slane %v4514_v51, 4 }
 0x159   : > { %1652 = vst [vmem:[%s4097_s22 + $0x16] sm:$0x1] %v1651_v6  ;;  %v1478_v39 = vadd.f32 %v1477_v5, %v1476_v4  ;;  %v1254_v20 = vmul.f32 %v3542_v16, %v4472_v52  ;;  %3545 = vrcp.f32 %v1154_v62  ;;  %v1182_v14 = vadd.f32 %v1181_v40, %v1180_v2 }
 0x15a   : > { %v1507_v47 = vsel %vm620_vm0, %v1319_v56, 0.0  ;;  %v936_v12 = vsub.f32 %v4477_v17, %v884_v53  ;;  %v2003_v41 = vmax.f32 %v2001_v58, %v2002_v25  ;;  %v904_v22 = vmax.f32 %v4514_v51, %v903_v49 }
 0x15b   : > { %v1570_v19 = vpack.c.bf16 %v1478_v39, %v1478_v39  ;;  %v1508_v24 = vrot.slane %v1507_v47, 4  ;;  %v1318_v61 = vmul.f32 %v3226_v26, %v1254_v20  ;;  %v1183_v52 = vrot.slane %v1182_v14, 1 }
 0x15c   : > { %v4533_v34 = vpop.eup %3543  ;;  %v995_v11 = vmul.f32 1.442695, %v936_v12  ;;  %v2004_v1 = vrot.slane %v2003_v41, 1  ;;  %v905_v13 = vrot.slane %v904_v22, 2  ;;  %v897_v45 = vrot.slane %v4525_v18, 4 }
 0x15d   : > { %v1648_v17 = vsel %vm4103_vm3, %v1570_v19, %v1647_v44  ;;  %v1509_v60 = vadd.f32 %v1508_v24, %v1507_v47  ;;  %v1500_v0 = vsel %vm620_vm0, %v1318_v61, 0.0  ;;  %v1184_v32 = vadd.f32 %v1183_v52, %v1182_v14  ;;  %v1659_v61 = vld [vmem:[%s4097_s22 + $0x19] sm:$0x1] }
 0x15e   : > { %1649 = vst [vmem:[%s4097_s22 + $0x15] sm:$0x1] %v1648_v17  ;;  %v1501_v54 = vrot.slane %v1500_v0, 4  ;;  %v1173_v26 = vrot.slane %v4533_v34, 4  ;;  %3547 = vpow2.f32 %v995_v11  ;;  %v2005_v55 = vmax.f32 %v2003_v41, %v2004_v1 }
 0x15f   : > { %v3546_v10 = vpop.eup %3545  ;;  %v1510_v33 = vrot.slane %v1509_v60, 2  ;;  %3549 = vrcp.f32 %v1184_v32  ;;  %v906_v23 = vmax.f32 %v904_v22, %v905_v13  ;;  %v898_v46 = vmax.f32 %v4525_v18, %v897_v45  ;;  %v4570_v45 = vpop.xlane.xlu1 %1911 }
 0x160   : > { %v1502_v9 = vadd.f32 %v1501_v54, %v1500_v0  ;;  %v1253_v8 = vmul.f32 %v3546_v10, %v4492_v7  ;;  %v3234_v36 = vunpack.c.h.bf16 %v4540_v42  ;;  %v1174_v50 = vadd.f32 %v4533_v34, %v1173_v26  ;;  %v4574_v54 = vpop.xlane.xlu0 %1908 }
 0x161   : > { %v1511_v57 = vadd.f32 %v1510_v33, %v1509_v60  ;;  %v3233_v35 = vunpack.c.l.bf16 %v4540_v42  ;;  %v2192_v58 = vsub.f32 %v4479_v28, %v2005_v55  ;;  %v907_v37 = vrot.slane %v906_v23, 1 }
 0x162   : > { %v1503_v3 = vrot.slane %v1502_v9, 2  ;;  %v1317_v48 = vmul.f32 %v3225_v21, %v1253_v8  ;;  %v1175_v4 = vrot.slane %v1174_v50, 2  ;;  %v899_v15 = vrot.slane %v898_v46, 2  ;;  %v1662_v21 = vld [vmem:[%s4097_s22 + $0x1a] sm:$0x1] }
 0x163   : > { %v1512_v7 = vrot.slane %v1511_v57, 1  ;;  %v2224_v2 = vmul.f32 1.442695, %v2192_v58  ;;  %v908_v43 = vmax.f32 %v906_v23, %v907_v37  ;;  %v2018_v29 = vrot.slane %v4548_v31, 4 }
 0x164   : > { %v4555_v27 = vpop.eup %3547  ;;  %v1504_v5 = vadd.f32 %v1503_v3, %v1502_v9  ;;  %v1493_v62 = vsel %vm620_vm0, %v1317_v48, 0.0  ;;  %v1176_v40 = vadd.f32 %v1175_v4, %v1174_v50  ;;  %v900_v28 = vmax.f32 %v898_v46, %v899_v15 }
 0x165   : > { %v3550_v25 = vpop.eup %3549  ;;  %v1513_v16 = vadd.f32 %v1512_v7, %v1511_v57  ;;  %v1494_v6 = vrot.slane %v1493_v62, 4  ;;  %v1167_v59 = vrot.slane %v4555_v27, 4  ;;  %3551 = vpow2.f32 %v2224_v2  ;;  %v1656_v7 = vld [vmem:[%s4097_s22 + $0x18] sm:$0x1] }
 0x166   : > { %v1505_v56 = vrot.slane %v1504_v5, 1  ;;  %v1258_v53 = vmul.f32 %v3550_v25, %v4504_v38  ;;  %v1177_v49 = vrot.slane %v1176_v40, 1  ;;  %v940_v39 = vsub.f32 %v4514_v51, %v908_v43  ;;  %v4597_v25 = vld [vmem:[%s4585_s27] sm:$0xff]  }
 0x167   : > { %v1575_v20 = vpack.c.bf16 %v1513_v16, %v1513_v16  ;;  %v1495_v14 = vadd.f32 %v1494_v6, %v1493_v62  ;;  %v3230_v44 = vunpack.c.h.bf16 %v4450_v63  ;;  %v1168_v47 = vadd.f32 %v4555_v27, %v1167_v59  ;;  %v4600_v6 = vld [vmem:[%s3965_s19 + $0x78] sm:$0xff]  }
 0x168   : > { %v1506_v12 = vadd.f32 %v1505_v56, %v1504_v5  ;;  %v1322_v41 = vmul.f32 %v3234_v36, %v1258_v53  ;;  %v1178_v22 = vadd.f32 %v1177_v49, %v1176_v40  ;;  %v1003_v19 = vmul.f32 1.442695, %v940_v39 }
 0x169   : > { %v1663_v24 = vsel %vm4103_vm3, %v1575_v20, %v1662_v21  ;;  %v1496_v52 = vrot.slane %v1495_v14, 2  ;;  %v1169_v38 = vrot.slane %v1168_v47, 2  ;;  %v901_v11 = vrot.slane %v900_v28, 1 }
 0x16a   : > { %1664 = vst [vmem:[%s4097_s22 + $0x1a] sm:$0x1] %v1663_v24  ;;  %v1574_v51 = vpack.c.bf16 %v1506_v12, %v1506_v12  ;;  %v1528_v1 = vsel %vm620_vm0, %v1322_v41, 0.0  ;;  %3553 = vrcp.f32 %v1178_v22  ;;  %v2019_v13 = vmax.f32 %v4548_v31, %v2018_v29  ;;  %v4611_v12 = vpop.xlane.xlu2 %1923 }
 0x16b   : > { %v4572_v17 = vpop.eup %3551  ;;  %v1497_v60 = vadd.f32 %v1496_v52, %v1495_v14  ;;  %v1529_v0 = vrot.slane %v1528_v1, 4  ;;  %v1170_v32 = vadd.f32 %v1169_v38, %v1168_v47  ;;  %3555 = vpow2.f32 %v1003_v19 }
 0x16c   : > { %v1660_v26 = vsel %vm4103_vm3, %v1574_v51, %v1659_v61  ;;  %v2288_v55 = vrot.slane %v4572_v17, 4  ;;  %v902_v10 = vmax.f32 %v900_v28, %v901_v11  ;;  %v2020_v33 = vrot.slane %v2019_v13, 2  ;;  %v1671_v61 = vld [vmem:[%s4097_s22 + $0x1d] sm:$0x1] }
 0x16d   : > { %1661 = vst [vmem:[%s4097_s22 + $0x19] sm:$0x1] %v1660_v26  ;;  %v1498_v23 = vrot.slane %v1497_v60, 1  ;;  %v1530_v46 = vadd.f32 %v1529_v0, %v1528_v1  ;;  %v1171_v9 = vrot.slane %v1170_v32, 1  ;;  %v2012_v8 = vrot.slane %v4570_v45, 4 }
 0x16e   : > { %v2289_v36 = vadd.f32 %v4572_v17, %v2288_v55  ;;  %v939_v50 = vsub.f32 %v4525_v18, %v902_v10  ;;  %v2021_v57 = vmax.f32 %v2019_v13, %v2020_v33  ;;  %v2006_v58 = vrot.slane %v4574_v54, 4 }
 0x16f   : > { %v1499_v37 = vadd.f32 %v1498_v23, %v1497_v60  ;;  %v1531_v3 = vrot.slane %v1530_v46, 2  ;;  %v1172_v48 = vadd.f32 %v1171_v9, %v1170_v32  ;;  %v2013_v4 = vmax.f32 %v4570_v45, %v2012_v8  ;;  %v4623_v23 = vpop.xlane.xlu1 %1920 }
 0x170   : > { %v3554_v15 = vpop.eup %3553  ;;  %v2290_v2 = vrot.slane %v2289_v36, 2  ;;  %v1001_v43 = vmul.f32 1.442695, %v939_v50  ;;  %v2022_v29 = vrot.slane %v2021_v57, 1  ;;  %v2007_v5 = vmax.f32 %v4574_v54, %v2006_v58 }
 0x171   : > { %v4593_v62 = vpop.eup %3555  ;;  %v1573_v18 = vpack.c.bf16 %v1499_v37, %v1499_v37  ;;  %v1532_v40 = vadd.f32 %v1531_v3, %v1530_v46  ;;  %v1257_v28 = vmul.f32 %v3554_v15, %v4533_v34  ;;  %3557 = vrcp.f32 %v1172_v48 }
 0x172   : > { %v2291_v16 = vadd.f32 %v2290_v2, %v2289_v36  ;;  %v1191_v59 = vrot.slane %v4593_v62, 4  ;;  %3559 = vpow2.f32 %v1001_v43  ;;  %v2023_v21 = vmax.f32 %v2021_v57, %v2022_v29 }
 0x173   : > { %v1657_v56 = vsel %vm4103_vm3, %v1573_v18, %v1656_v7  ;;  %v1533_v53 = vrot.slane %v1532_v40, 1  ;;  %v1321_v49 = vmul.f32 %v3233_v35, %v1257_v28  ;;  %v2014_v39 = vrot.slane %v2013_v4, 2 }
 0x174   : > { %1658 = vst [vmem:[%s4097_s22 + $0x18] sm:$0x1] %v1657_v56  ;;  %v3305_v34 = vunpack.c.l.bf16 %v4597_v25  ;;  %v2292_v20 = vrot.slane %v2291_v16, 1  ;;  %v1192_v14 = vadd.f32 %v4593_v62, %v1191_v59  ;;  %v2195_v47 = vsub.f32 %v4548_v31, %v2023_v21 }
 0x175   : > { %v1534_v41 = vadd.f32 %v1533_v53, %v1532_v40  ;;  %v1521_v22 = vsel %vm620_vm0, %v1321_v49, 0.0  ;;  %v3238_v19 = vunpack.c.h.bf16 %v4600_v6  ;;  %v2015_v24 = vmax.f32 %v2013_v4, %v2014_v39  ;;  %v1668_v53 = vld [vmem:[%s4097_s22 + $0x1c] sm:$0x1] }
 0x176   : > { %v1522_v42 = vrot.slane %v1521_v22, 4  ;;  %v2293_v35 = vadd.f32 %v2292_v20, %v2291_v16  ;;  %v1193_v52 = vrot.slane %v1192_v14, 2  ;;  %v2230_v38 = vmul.f32 1.442695, %v2195_v47 }
 0x177   : > { %v3558_v11 = vpop.eup %3557  ;;  %v1578_v51 = vpack.c.bf16 %v1534_v41, %v1534_v41  ;;  %v2016_v1 = vrot.slane %v2015_v24, 1  ;;  %v2008_v13 = vrot.slane %v2007_v5, 2  ;;  %v2036_v31 = vrot.slane %v4611_v12, 4 }
 0x178   : > { %v4617_v60 = vpop.eup %3559  ;;  %v1523_v0 = vadd.f32 %v1522_v42, %v1521_v22  ;;  %v1256_v32 = vmul.f32 %v3558_v11, %v4555_v27  ;;  %3561 = vrcp.f32 %v2293_v35  ;;  %v1194_v26 = vadd.f32 %v1193_v52, %v1192_v14 }
 0x179   : > { %v1672_v55 = vsel %vm4103_vm3, %v1578_v51, %v1671_v61  ;;  %v1185_v10 = vrot.slane %v4617_v60, 4  ;;  %3563 = vpow2.f32 %v2230_v38  ;;  %v2017_v33 = vmax.f32 %v2015_v24, %v2016_v1 }
 0x17a   : > { %1673 = vst [vmem:[%s4097_s22 + $0x1d] sm:$0x1] %v1672_v55  ;;  %v1524_v46 = vrot.slane %v1523_v0, 2  ;;  %v1320_v9 = vmul.f32 %v3230_v44, %v1256_v32  ;;  %v1195_v8 = vrot.slane %v1194_v26, 1  ;;  %v3237_v36 = vunpack.c.l.bf16 %v4600_v6 }
 0x17b   : > { %v1186_v27 = vadd.f32 %v4617_v60, %v1185_v10  ;;  %v2194_v50 = vsub.f32 %v4570_v45, %v2017_v33  ;;  %v2009_v57 = vmax.f32 %v2007_v5, %v2008_v13  ;;  %v2037_v58 = vmax.f32 %v4611_v12, %v2036_v31  ;;  %v4650_v31 = vld [vmem:[%s4585_s27 + $0x8] sm:$0xff]  }
 0x17c   : > { %v1525_v37 = vadd.f32 %v1524_v46, %v1523_v0  ;;  %v1514_v3 = vsel %vm620_vm0, %v1320_v9, 0.0  ;;  %v1196_v48 = vadd.f32 %v1195_v8, %v1194_v26  ;;  %v2030_v4 = vrot.slane %v4623_v23, 4  ;;  %v1665_v8 = vld [vmem:[%s4097_s22 + $0x1b] sm:$0x1] }
 0x17d   : > { %v1515_v15 = vrot.slane %v1514_v3, 4  ;;  %v1187_v7 = vrot.slane %v1186_v27, 2  ;;  %v2228_v63 = vmul.f32 1.442695, %v2194_v50  ;;  %v2010_v44 = vrot.slane %v2009_v57, 1 }
 0x17e   : > { %v3562_v2 = vpop.eup %3561  ;;  %v1526_v43 = vrot.slane %v1525_v37, 1  ;;  %3565 = vrcp.f32 %v1196_v48  ;;  %v2038_v29 = vrot.slane %v2037_v58, 2  ;;  %v2031_v45 = vmax.f32 %v4623_v23, %v2030_v4 }
 0x17f   : > { %v4635_v5 = vpop.eup %3563  ;;  %v1516_v18 = vadd.f32 %v1515_v15, %v1514_v3  ;;  %v2512_v40 = vmul.f32 %v3562_v2, %v4572_v17  ;;  %v1188_v28 = vadd.f32 %v1187_v7, %v1186_v27  ;;  %3567 = vpow2.f32 %v2228_v63  ;;  %v4661_v7 = vpop.xlane.xlu0 %1917 }
 0x180   : > { %v1527_v16 = vadd.f32 %v1526_v43, %v1525_v37  ;;  %v2306_v59 = vrot.slane %v4635_v5, 4  ;;  %v2011_v21 = vmax.f32 %v2009_v57, %v2010_v44  ;;  %v2039_v56 = vmax.f32 %v2037_v58, %v2038_v29  ;;  %v4666_v29 = vpop.xlane.xlu2 %1932 }
 0x181   : > { %v1517_v49 = vrot.slane %v1516_v18, 2  ;;  %v2576_v39 = vmul.f32 %v3305_v34, %v2512_v40  ;;  %v1189_v20 = vrot.slane %v1188_v28, 1  ;;  %v2032_v14 = vrot.slane %v2031_v45, 2 }
 0x182   : > { %v1577_v47 = vpack.c.bf16 %v1527_v16, %v1527_v16  ;;  %v2307_v41 = vadd.f32 %v4635_v5, %v2306_v59  ;;  %v2193_v22 = vsub.f32 %v4574_v54, %v2011_v21  ;;  %v2040_v17 = vrot.slane %v2039_v56, 1 }
 0x183   : > { %v1518_v24 = vadd.f32 %v1517_v49, %v1516_v18  ;;  %v2608_v61 = vsel %vm620_vm0, %v2576_v39, 0.0  ;;  %v1190_v42 = vadd.f32 %v1189_v20, %v1188_v28  ;;  %v2033_v35 = vmax.f32 %v2031_v45, %v2032_v14  ;;  %v2864_v14 = vld [vmem:[%s4674_s30] sm:$0x1] }
 0x184   : > { %v3566_v52 = vpop.eup %3565  ;;  %v1669_v38 = vsel %vm4103_vm3, %v1577_v47, %v1668_v53  ;;  %v2609_v34 = vrot.slane %v2608_v61, 4  ;;  %v2308_v11 = vrot.slane %v2307_v41, 2  ;;  %v2226_v51 = vmul.f32 1.442695, %v2193_v22 }
 0x185   : > { %v4645_v1 = vpop.eup %3567  ;;  %1670 = vst [vmem:[%s4097_s22 + $0x1c] sm:$0x1] %v1669_v38  ;;  %v1519_v13 = vrot.slane %v1518_v24, 1  ;;  %v1260_v54 = vmul.f32 %v3566_v52, %v4593_v62  ;;  %3569 = vrcp.f32 %v1190_v42  ;;  %v2041_v0 = vmax.f32 %v2039_v56, %v2040_v17 }
 0x186   : > { %v2610_v32 = vadd.f32 %v2609_v34, %v2608_v61  ;;  %v2309_v26 = vadd.f32 %v2308_v11, %v2307_v41  ;;  %v2300_v55 = vrot.slane %v4645_v1, 4  ;;  %3571 = vpow2.f32 %v2226_v51 }
 0x187   : > { %v1520_v10 = vadd.f32 %v1519_v13, %v1518_v24  ;;  %v1324_v33 = vmul.f32 %v3238_v19, %v1260_v54  ;;  %v2198_v46 = vsub.f32 %v4611_v12, %v2041_v0  ;;  %v2034_v9 = vrot.slane %v2033_v35, 1  ;;  %v4694_v13 = vpop.xlane.xlu1 %1929 }
 0x188   : > { %v2611_v27 = vrot.slane %v2610_v32, 2  ;;  %v3310_v62 = vunpack.c.h.bf16 %v4650_v31  ;;  %v2310_v50 = vrot.slane %v2309_v26, 1  ;;  %v2301_v57 = vadd.f32 %v4645_v1, %v2300_v55 }
 0x189   : > { %v1576_v58 = vpack.c.bf16 %v1520_v10, %v1520_v10  ;;  %v1542_v37 = vsel %vm620_vm0, %v1324_v33, 0.0  ;;  %v3309_v3 = vunpack.c.l.bf16 %v4650_v31  ;;  %v2236_v48 = vmul.f32 1.442695, %v2198_v46  ;;  %v1677_v46 = vld [vmem:[%s4097_s22 + $0x1f] sm:$0x1] }
 0x18a   : > { %v2612_v4 = vadd.f32 %v2611_v27, %v2610_v32  ;;  %v1543_v19 = vrot.slane %v1542_v37, 4  ;;  %v2311_v15 = vadd.f32 %v2310_v50, %v2309_v26  ;;  %v2302_v12 = vrot.slane %v2301_v57, 2 }
 0x18b   : > { %v3570_v63 = vpop.eup %3569  ;;  %v1666_v44 = vsel %vm4103_vm3, %v1576_v58, %v1665_v8  ;;  %v3306_v2 = vunpack.c.h.bf16 %v4597_v25  ;;  %3573 = vpow2.f32 %v2236_v48  ;;  %v2035_v43 = vmax.f32 %v2033_v35, %v2034_v9 }
 0x18c   : > { %v4668_v45 = vpop.eup %3571  ;;  %1667 = vst [vmem:[%s4097_s22 + $0x1b] sm:$0x1] %v1666_v44  ;;  %v2613_v18 = vrot.slane %v2612_v4, 1  ;;  %v1544_v40 = vadd.f32 %v1543_v19, %v1542_v37  ;;  %v1259_v28 = vmul.f32 %v3570_v63, %v4617_v60  ;;  %3575 = vrcp.f32 %v2311_v15 }
 0x18d   : > { %v2303_v16 = vadd.f32 %v2302_v12, %v2301_v57  ;;  %v2294_v59 = vrot.slane %v4668_v45, 4  ;;  %v2197_v21 = vsub.f32 %v4623_v23, %v2035_v43  ;;  %v2024_v56 = vrot.slane %v4661_v7, 4 }
 0x18e   : > { %v2614_v53 = vadd.f32 %v2613_v18, %v2612_v4  ;;  %v1545_v49 = vrot.slane %v1544_v40, 2  ;;  %v1323_v39 = vmul.f32 %v3237_v36, %v1259_v28  ;;  %v2054_v20 = vrot.slane %v4666_v29, 4 }
 0x18f   : > { %v2304_v47 = vrot.slane %v2303_v16, 1  ;;  %v2295_v41 = vadd.f32 %v4668_v45, %v2294_v59  ;;  %v2234_v60 = vmul.f32 1.442695, %v2197_v21  ;;  %v2025_v22 = vmax.f32 %v4661_v7, %v2024_v56 }
 0x190   : > { %v2832_v17 = vpack.c.bf16 %v2614_v53, %v2614_v53  ;;  %v1546_v24 = vadd.f32 %v1545_v49, %v1544_v40  ;;  %v1535_v23 = vsel %vm620_vm0, %v1323_v39, 0.0  ;;  %v2055_v61 = vmax.f32 %v4666_v29, %v2054_v20 }
 0x191   : > { %v4689_v42 = vpop.eup %3573  ;;  %v1536_v6 = vrot.slane %v1535_v23, 4  ;;  %v2305_v36 = vadd.f32 %v2304_v47, %v2303_v16  ;;  %v2296_v35 = vrot.slane %v2295_v41, 2  ;;  %3577 = vpow2.f32 %v2234_v60  ;;  %v1674_v47 = vld [vmem:[%s4097_s22 + $0x1e] sm:$0x1] }
 0x192   : > { %v3576_v52 = vpop.eup %3575  ;;  %v2865_v38 = vsel %vm4103_vm3, %v2832_v17, %v2864_v14  ;;  %v1547_v34 = vrot.slane %v1546_v24, 1  ;;  %v2324_v11 = vrot.slane %v4689_v42, 4  ;;  %v2026_v51 = vrot.slane %v2025_v22, 2 }
 0x193   : > { %2866 = vst [vmem:[%s4674_s30] sm:$0x1] %v2865_v38  ;;  %v1537_v54 = vadd.f32 %v1536_v6, %v1535_v23  ;;  %v2515_v0 = vmul.f32 %v3576_v52, %v4635_v5  ;;  %3579 = vrcp.f32 %v2305_v36  ;;  %v2297_v32 = vadd.f32 %v2296_v35, %v2295_v41 }
 0x194   : > { %v1548_v26 = vadd.f32 %v1547_v34, %v1546_v24  ;;  %v2325_v55 = vadd.f32 %v4689_v42, %v2324_v11  ;;  %v2027_v10 = vmax.f32 %v2025_v22, %v2026_v51  ;;  %v2056_v33 = vrot.slane %v2055_v61, 2  ;;  %v4727_v11 = vld [vmem:[%s4585_s27 + $0x10] sm:$0xff]  }
 0x195   : > { %v1538_v9 = vrot.slane %v1537_v54, 2  ;;  %v2579_v8 = vmul.f32 %v3310_v62, %v2515_v0  ;;  %v2298_v27 = vrot.slane %v2297_v32, 1  ;;  %v2048_v50 = vrot.slane %v4694_v13, 4  ;;  %v4729_v0 = vpop.xlane.xlu0 %1926 }
 0x196   : > { %v1580_v57 = vpack.c.bf16 %v1548_v26, %v1548_v26  ;;  %v2326_v58 = vrot.slane %v2325_v55, 2  ;;  %v2028_v37 = vrot.slane %v2027_v10, 1  ;;  %v2057_v5 = vmax.f32 %v2055_v61, %v2056_v33 }
 0x197   : > { %v4703_v48 = vpop.eup %3577  ;;  %v1539_v4 = vadd.f32 %v1538_v9, %v1537_v54  ;;  %v2629_v19 = vsel %vm620_vm0, %v2579_v8, 0.0  ;;  %v2299_v15 = vadd.f32 %v2298_v27, %v2297_v32  ;;  %v2049_v12 = vmax.f32 %v4694_v13, %v2048_v50  ;;  %v4731_v32 = vpop.xlane.xlu2 %1941  ;;  %v2873_v8 = vld [vmem:[%s4674_s30 + $0x3] sm:$0x1] }
 0x198   : > { %v1678_v63 = vsel %vm4103_vm3, %v1580_v57, %v1677_v46  ;;  %v2630_v62 = vrot.slane %v2629_v19, 4  ;;  %v2327_v44 = vadd.f32 %v2326_v58, %v2325_v55  ;;  %v2318_v43 = vrot.slane %v4703_v48, 4 }
 0x199   : > { %v3580_v18 = vpop.eup %3579  ;;  %1679 = vst [vmem:[%s4097_s22 + $0x1f] sm:$0x1] %v1678_v63  ;;  %v1540_v40 = vrot.slane %v1539_v4, 1  ;;  %3581 = vrcp.f32 %v2299_v15  ;;  %v2029_v28 = vmax.f32 %v2027_v10, %v2028_v37  ;;  %v2058_v16 = vrot.slane %v2057_v5, 1 }
 0x19a   : > { %v2631_v59 = vadd.f32 %v2630_v62, %v2629_v19  ;;  %v2514_v21 = vmul.f32 %v3580_v18, %v4645_v1  ;;  %v2328_v56 = vrot.slane %v2327_v44, 1  ;;  %v2319_v53 = vadd.f32 %v4703_v48, %v2318_v43 }
 0x19b   : > { %v1541_v49 = vadd.f32 %v1540_v40, %v1539_v4  ;;  %v2196_v39 = vsub.f32 %v4661_v7, %v2029_v28  ;;  %v2059_v20 = vmax.f32 %v2057_v5, %v2058_v16  ;;  %v2050_v14 = vrot.slane %v2049_v12, 2  ;;  %v4720_v7 = vld [vmem:[%s4585_s27 + $0x18] sm:$0xff]  }
 0x19c   : > { %v2632_v41 = vrot.slane %v2631_v59, 2  ;;  %v2578_v60 = vmul.f32 %v3309_v3, %v2514_v21  ;;  %v2329_v22 = vadd.f32 %v2328_v56, %v2327_v44  ;;  %v2320_v17 = vrot.slane %v2319_v53, 2 }
 0x19d   : > { %v1579_v24 = vpack.c.bf16 %v1541_v49, %v1541_v49  ;;  %v2232_v23 = vmul.f32 1.442695, %v2196_v39  ;;  %v2201_v1 = vsub.f32 %v4666_v29, %v2059_v20  ;;  %v2051_v61 = vmax.f32 %v2049_v12, %v2050_v14  ;;  %v2870_v14 = vld [vmem:[%s4674_s30 + $0x2] sm:$0x1] }
 0x19e   : > { %v2633_v6 = vadd.f32 %v2632_v41, %v2631_v59  ;;  %v2622_v36 = vsel %vm620_vm0, %v2578_v60, 0.0  ;;  %3583 = vrcp.f32 %v2329_v22  ;;  %v2321_v35 = vadd.f32 %v2320_v17, %v2319_v53  ;;  %v4758_v17 = vpop.xlane.xlu1 %1938 }
 0x19f   : > { %v3582_v52 = vpop.eup %3581  ;;  %v1675_v31 = vsel %vm4103_vm3, %v1579_v24, %v1674_v47  ;;  %v2623_v3 = vrot.slane %v2622_v36, 4  ;;  %3585 = vpow2.f32 %v2232_v23  ;;  %v2242_v38 = vmul.f32 1.442695, %v2201_v1 }
 0x1a0   : > { %1676 = vst [vmem:[%s4097_s22 + $0x1e] sm:$0x1] %v1675_v31  ;;  %v2634_v34 = vrot.slane %v2633_v6, 1  ;;  %v2513_v29 = vmul.f32 %v3582_v52, %v4668_v45  ;;  %v2322_v51 = vrot.slane %v2321_v35, 1  ;;  %v2052_v54 = vrot.slane %v2051_v61, 1 }
 0x1a1   : > { %v2624_v26 = vadd.f32 %v2623_v3, %v2622_v36  ;;  %v3317_v55 = vunpack.c.l.bf16 %v4720_v7  ;;  %3587 = vpow2.f32 %v2242_v38  ;;  %v3314_v27 = vunpack.c.h.bf16 %v4727_v11 }
 0x1a2   : > { %v2635_v10 = vadd.f32 %v2634_v34, %v2633_v6  ;;  %v2577_v33 = vmul.f32 %v3306_v2, %v2513_v29  ;;  %v2323_v46 = vadd.f32 %v2322_v51, %v2321_v35  ;;  %v2053_v9 = vmax.f32 %v2051_v61, %v2052_v54 }
 0x1a3   : > { %v2625_v45 = vrot.slane %v2624_v26, 2  ;;  %v2042_v50 = vrot.slane %v4729_v0, 4  ;;  %v2072_v57 = vrot.slane %v4731_v32, 4 }
 0x1a4   : > { %v3584_v58 = vpop.eup %3583  ;;  %v2835_v37 = vpack.c.bf16 %v2635_v10, %v2635_v10  ;;  %v2615_v5 = vsel %vm620_vm0, %v2577_v33, 0.0  ;;  %3589 = vrcp.f32 %v2323_v46  ;;  %v2200_v4 = vsub.f32 %v4694_v13, %v2053_v9  ;;  %v2867_v9 = vld [vmem:[%s4674_s30 + $0x1] sm:$0x1] }
 0x1a5   : > { %v4742_v25 = vpop.eup %3585  ;;  %v2626_v2 = vadd.f32 %v2625_v45, %v2624_v26  ;;  %v2616_v19 = vrot.slane %v2615_v5, 4  ;;  %v2518_v15 = vmul.f32 %v3584_v58, %v4689_v42  ;;  %v2043_v12 = vmax.f32 %v4729_v0, %v2042_v50 }
 0x1a6   : > { %v2874_v63 = vsel %vm4103_vm3, %v2835_v37, %v2873_v8  ;;  %v2312_v62 = vrot.slane %v4742_v25, 4  ;;  %v2240_v44 = vmul.f32 1.442695, %v2200_v4  ;;  %v2073_v43 = vmax.f32 %v4731_v32, %v2072_v57 }
 0x1a7   : > { %v4750_v18 = vpop.eup %3587  ;;  %2875 = vst [vmem:[%s4674_s30 + $0x3] sm:$0x1] %v2874_v63  ;;  %v2627_v13 = vrot.slane %v2626_v2, 1  ;;  %v2617_v40 = vadd.f32 %v2616_v19, %v2615_v5  ;;  %v2582_v28 = vmul.f32 %v3317_v55, %v2518_v15  ;;  %v2044_v16 = vrot.slane %v2043_v12, 2  ;;  %v4772_v15 = vpop.xlane.xlu0 %1935 }
 0x1a8   : > { %v2313_v42 = vadd.f32 %v4742_v25, %v2312_v62  ;;  %v2342_v59 = vrot.slane %v4750_v18, 4  ;;  %3591 = vpow2.f32 %v2240_v44  ;;  %v2074_v21 = vrot.slane %v2073_v43, 2 }
 0x1a9   : > { %v2628_v56 = vadd.f32 %v2627_v13, %v2626_v2  ;;  %v2618_v53 = vrot.slane %v2617_v40, 2  ;;  %v2650_v49 = vsel %vm620_vm0, %v2582_v28, 0.0  ;;  %v2045_v39 = vmax.f32 %v2043_v12, %v2044_v16  ;;  %v4777_v12 = vld [vmem:[%s4585_s27 + $0x20] sm:$0xff]   ;;  %v4782_v13 = vpop.xlane.xlu1 %1947 }
 0x1aa   : > { %v3590_v20 = vpop.eup %3589  ;;  %v2651_v47 = vrot.slane %v2650_v49, 4  ;;  %v2314_v41 = vrot.slane %v2313_v42, 2  ;;  %v2343_v60 = vadd.f32 %v4750_v18, %v2342_v59  ;;  %v2075_v22 = vmax.f32 %v2073_v43, %v2074_v21 }
 0x1ab   : > { %v2834_v24 = vpack.c.bf16 %v2628_v56, %v2628_v56  ;;  %v2619_v23 = vadd.f32 %v2618_v53, %v2617_v40  ;;  %v2517_v1 = vmul.f32 %v3590_v20, %v4703_v48  ;;  %v2046_v61 = vrot.slane %v2045_v39, 1  ;;  %v2882_v40 = vld [vmem:[%s4674_s30 + $0x6] sm:$0x1] }
 0x1ac   : > { %v2652_v6 = vadd.f32 %v2651_v47, %v2650_v49  ;;  %v2315_v36 = vadd.f32 %v2314_v41, %v2313_v42  ;;  %v2344_v35 = vrot.slane %v2343_v60, 2  ;;  %v2076_v52 = vrot.slane %v2075_v22, 1 }
 0x1ad   : > { %v2871_v31 = vsel %vm4103_vm3, %v2834_v24, %v2870_v14  ;;  %v2620_v3 = vrot.slane %v2619_v23, 1  ;;  %v2581_v38 = vmul.f32 %v3314_v27, %v2517_v1  ;;  %v2047_v34 = vmax.f32 %v2045_v39, %v2046_v61 }
 0x1ae   : > { %v4763_v29 = vpop.eup %3591  ;;  %2872 = vst [vmem:[%s4674_s30 + $0x2] sm:$0x1] %v2871_v31  ;;  %v2653_v51 = vrot.slane %v2652_v6, 2  ;;  %v2316_v54 = vrot.slane %v2315_v36, 1  ;;  %v2345_v26 = vadd.f32 %v2344_v35, %v2343_v60  ;;  %v2077_v55 = vmax.f32 %v2075_v22, %v2076_v52 }
 0x1af   : > { %v2621_v48 = vadd.f32 %v2620_v3, %v2619_v23  ;;  %v2643_v10 = vsel %vm620_vm0, %v2581_v38, 0.0  ;;  %v2336_v33 = vrot.slane %v4763_v29, 4  ;;  %v2199_v46 = vsub.f32 %v4729_v0, %v2047_v34  ;;  %v2879_v34 = vld [vmem:[%s4674_s30 + $0x5] sm:$0x1] }
 0x1b0   : > { %v2654_v8 = vadd.f32 %v2653_v51, %v2652_v6  ;;  %v2644_v45 = vrot.slane %v2643_v10, 4  ;;  %v2317_v27 = vadd.f32 %v2316_v54, %v2315_v36  ;;  %v2346_v50 = vrot.slane %v2345_v26, 1 }
 0x1b1   : > { %v2833_v57 = vpack.c.bf16 %v2621_v48, %v2621_v48  ;;  %v2337_v58 = vadd.f32 %v4763_v29, %v2336_v33  ;;  %v2238_v37 = vmul.f32 1.442695, %v2199_v46  ;;  %v2204_v5 = vsub.f32 %v4731_v32, %v2077_v55  ;;  %v4780_v32 = vpop.xlane.xlu2 %1950  ;;  %v4809_v33 = vpop.xlane.xlu0 %1944 }
 0x1b2   : > { %v2655_v4 = vrot.slane %v2654_v8, 1  ;;  %v2645_v2 = vadd.f32 %v2644_v45, %v2643_v10  ;;  %3593 = vrcp.f32 %v2317_v27  ;;  %v2347_v19 = vadd.f32 %v2346_v50, %v2345_v26 }
 0x1b3   : > { %v2868_v0 = vsel %vm4103_vm3, %v2833_v57, %v2867_v9  ;;  %v2338_v63 = vrot.slane %v2337_v58, 2  ;;  %3595 = vpow2.f32 %v2238_v37  ;;  %v2248_v62 = vmul.f32 1.442695, %v2204_v5 }
 0x1b4   : > { %2869 = vst [vmem:[%s4674_s30 + $0x1] sm:$0x1] %v2868_v0  ;;  %v2656_v44 = vadd.f32 %v2655_v4, %v2654_v8  ;;  %v2646_v43 = vrot.slane %v2645_v2, 2  ;;  %3597 = vrcp.f32 %v2347_v19  ;;  %v3313_v28 = vunpack.c.l.bf16 %v4727_v11 }
 0x1b5   : > { %v2339_v16 = vadd.f32 %v2338_v63, %v2337_v58  ;;  %3599 = vpow2.f32 %v2248_v62  ;;  %v2066_v42 = vrot.slane %v4758_v17, 4  ;;  %v3322_v56 = vunpack.c.h.bf16 %v4777_v12 }
 0x1b6   : > { %v2838_v59 = vpack.c.bf16 %v2656_v44, %v2656_v44  ;;  %v2647_v21 = vadd.f32 %v2646_v43, %v2645_v2  ;;  %v2060_v53 = vrot.slane %v4772_v15, 4  ;;  %v2090_v20 = vrot.slane %v4780_v32, 4 }
 0x1b7   : > { %v2340_v49 = vrot.slane %v2339_v16, 1  ;;  %v2067_v39 = vmax.f32 %v4758_v17, %v2066_v42  ;;  %v2084_v14 = vrot.slane %v4782_v13, 4  ;;  %v3321_v60 = vunpack.c.l.bf16 %v4777_v12 }
 0x1b8   : > { %v3594_v47 = vpop.eup %3593  ;;  %v2883_v11 = vsel %vm4103_vm3, %v2838_v59, %v2882_v40  ;;  %v2648_v41 = vrot.slane %v2647_v21, 1  ;;  %v2061_v22 = vmax.f32 %v4772_v15, %v2060_v53  ;;  %v2091_v6 = vmax.f32 %v4780_v32, %v2090_v20 }
 0x1b9   : > { %v4796_v24 = vpop.eup %3595  ;;  %2884 = vst [vmem:[%s4674_s30 + $0x6] sm:$0x1] %v2883_v11  ;;  %v2516_v23 = vmul.f32 %v3594_v47, %v4742_v25  ;;  %v2341_v1 = vadd.f32 %v2340_v49, %v2339_v16  ;;  %v2068_v61 = vrot.slane %v2067_v39, 2  ;;  %v2085_v3 = vmax.f32 %v4782_v13, %v2084_v14 }
 0x1ba   : > { %v3598_v36 = vpop.eup %3597  ;;  %v2649_v35 = vadd.f32 %v2648_v41, %v2647_v21  ;;  %v2330_v52 = vrot.slane %v4796_v24, 4  ;;  %v2062_v31 = vrot.slane %v2061_v22, 2  ;;  %v2092_v45 = vrot.slane %v2091_v6, 2 }
 0x1bb   : > { %v4803_v38 = vpop.eup %3599  ;;  %v2580_v51 = vmul.f32 %v3313_v28, %v2516_v23  ;;  %v2521_v54 = vmul.f32 %v3598_v36, %v4750_v18  ;;  %3601 = vrcp.f32 %v2341_v1  ;;  %v2069_v25 = vmax.f32 %v2067_v39, %v2068_v61  ;;  %v4823_v61 = vld [vmem:[%s4585_s27 + $0x30] sm:$0xff]  }
 0x1bc   : > { %v2837_v26 = vpack.c.bf16 %v2649_v35, %v2649_v35  ;;  %v2331_v55 = vadd.f32 %v4796_v24, %v2330_v52  ;;  %v2360_v48 = vrot.slane %v4803_v38, 4  ;;  %v2063_v10 = vmax.f32 %v2061_v22, %v2062_v31  ;;  %v4827_v31 = vpop.xlane.xlu2 %1959 }
 0x1bd   : > { %v2636_v46 = vsel %vm620_vm0, %v2580_v51, 0.0  ;;  %v2585_v9 = vmul.f32 %v3322_v56, %v2521_v54  ;;  %v2070_v8 = vrot.slane %v2069_v25, 1  ;;  %v2078_v4 = vrot.slane %v4809_v33, 4 }
 0x1be   : > { %v2880_v27 = vsel %vm4103_vm3, %v2837_v26, %v2879_v34  ;;  %v2637_v18 = vrot.slane %v2636_v46, 4  ;;  %v2332_v50 = vrot.slane %v2331_v55, 2  ;;  %v2361_v57 = vadd.f32 %v4803_v38, %v2360_v48  ;;  %v2876_v34 = vld [vmem:[%s4674_s30 + $0x4] sm:$0x1] }
 0x1bf   : > { %2881 = vst [vmem:[%s4674_s30 + $0x5] sm:$0x1] %v2880_v27  ;;  %v2671_v58 = vsel %vm620_vm0, %v2585_v9, 0.0  ;;  %v2071_v37 = vmax.f32 %v2069_v25, %v2070_v8  ;;  %v2064_v5 = vrot.slane %v2063_v10, 1  ;;  %v2093_v43 = vmax.f32 %v2091_v6, %v2092_v45 }
 0x1c0   : > { %v2638_v2 = vadd.f32 %v2637_v18, %v2636_v46  ;;  %v2672_v19 = vrot.slane %v2671_v58, 4  ;;  %v2333_v0 = vadd.f32 %v2332_v50, %v2331_v55  ;;  %v2362_v12 = vrot.slane %v2361_v57, 2 }
 0x1c1   : > { %v3602_v63 = vpop.eup %3601  ;;  %v2203_v62 = vsub.f32 %v4758_v17, %v2071_v37  ;;  %v2065_v44 = vmax.f32 %v2063_v10, %v2064_v5  ;;  %v2086_v40 = vrot.slane %v2085_v3, 2  ;;  %v2094_v49 = vrot.slane %v2093_v43, 1 }
 0x1c2   : > { %v2639_v28 = vrot.slane %v2638_v2, 2  ;;  %v2673_v16 = vadd.f32 %v2672_v19, %v2671_v58  ;;  %v2520_v42 = vmul.f32 %v3602_v63, %v4763_v29  ;;  %v2334_v59 = vrot.slane %v2333_v0, 1 }
 0x1c3   : > { %v2363_v21 = vadd.f32 %v2362_v12, %v2361_v57  ;;  %v2246_v56 = vmul.f32 1.442695, %v2203_v62  ;;  %v2202_v53 = vsub.f32 %v4772_v15, %v2065_v44  ;;  %v2095_v41 = vmax.f32 %v2093_v43, %v2094_v49 }
 0x1c4   : > { %v2640_v39 = vadd.f32 %v2639_v28, %v2638_v2  ;;  %v2674_v20 = vrot.slane %v2673_v16, 2  ;;  %v2584_v14 = vmul.f32 %v3321_v60, %v2520_v42  ;;  %v2335_v47 = vadd.f32 %v2334_v59, %v2333_v0 }
 0x1c5   : > { %v2364_v11 = vrot.slane %v2363_v21, 1  ;;  %3603 = vpow2.f32 %v2246_v56  ;;  %v2244_v17 = vmul.f32 1.442695, %v2202_v53  ;;  %v2207_v15 = vsub.f32 %v4780_v32, %v2095_v41  ;;  %v4833_v32 = vld [vmem:[%s4585_s27 + $0x28] sm:$0xff]  }
 0x1c6   : > { %v2641_v22 = vrot.slane %v2640_v39, 1  ;;  %v2675_v23 = vadd.f32 %v2674_v20, %v2673_v16  ;;  %v2664_v29 = vsel %vm620_vm0, %v2584_v14, 0.0  ;;  %3605 = vrcp.f32 %v2335_v47 }
 0x1c7   : > { %v2665_v1 = vrot.slane %v2664_v29, 4  ;;  %v2365_v6 = vadd.f32 %v2364_v11, %v2363_v21  ;;  %3607 = vpow2.f32 %v2244_v17  ;;  %v2087_v35 = vmax.f32 %v2085_v3, %v2086_v40  ;;  %v2891_v3 = vld [vmem:[%s4674_s30 + $0x9] sm:$0x1] }
 0x1c8   : > { %v2642_v60 = vadd.f32 %v2641_v22, %v2640_v39  ;;  %v2676_v36 = vrot.slane %v2675_v23, 1  ;;  %v2079_v52 = vmax.f32 %v4809_v33, %v2078_v4  ;;  %v3318_v54 = vunpack.c.h.bf16 %v4720_v7  ;;  %v2888_v39 = vld [vmem:[%s4674_s30 + $0x8] sm:$0x1] }
 0x1c9   : > { %v2666_v51 = vadd.f32 %v2665_v1, %v2664_v29  ;;  %3609 = vrcp.f32 %v2365_v6  ;;  %v2254_v25 = vmul.f32 1.442695, %v2207_v15  ;;  %v3329_v48 = vunpack.c.l.bf16 %v4823_v61  ;;  %v4863_v6 = vpop.xlane.xlu1 %1956 }
 0x1ca   : > { %v2836_v26 = vpack.c.bf16 %v2642_v60, %v2642_v60  ;;  %v2677_v55 = vadd.f32 %v2676_v36, %v2675_v23  ;;  %v2088_v10 = vrot.slane %v2087_v35, 1  ;;  %v2080_v8 = vrot.slane %v2079_v52, 2 }
 0x1cb   : > { %v4835_v46 = vpop.eup %3603  ;;  %v2667_v9 = vrot.slane %v2666_v51, 2  ;;  %3611 = vpow2.f32 %v2254_v25  ;;  %v2108_v45 = vrot.slane %v4827_v31, 4  ;;  %v3326_v4 = vunpack.c.h.bf16 %v4833_v32 }
 0x1cc   : > { %v3606_v27 = vpop.eup %3605  ;;  %v2877_v7 = vsel %vm4103_vm3, %v2836_v26, %v2876_v34  ;;  %v2841_v18 = vpack.c.bf16 %v2677_v55, %v2677_v55  ;;  %v2354_v50 = vrot.slane %v4835_v46, 4  ;;  %v2089_v57 = vmax.f32 %v2087_v35, %v2088_v10 }
 0x1cd   : > { %v4842_v58 = vpop.eup %3607  ;;  %2878 = vst [vmem:[%s4674_s30 + $0x4] sm:$0x1] %v2877_v7  ;;  %v2668_v37 = vadd.f32 %v2667_v9, %v2666_v51  ;;  %v2519_v5 = vmul.f32 %v3606_v27, %v4796_v24  ;;  %v2081_v2 = vmax.f32 %v2079_v52, %v2080_v8  ;;  %v2109_v24 = vmax.f32 %v4827_v31, %v2108_v45  ;;  %v4875_v45 = vld [vmem:[%s4585_s27 + $0x38] sm:$0xff]  }
 0x1ce   : > { %v2892_v19 = vsel %vm4103_vm3, %v2841_v18, %v2891_v3  ;;  %v2355_v0 = vadd.f32 %v4835_v46, %v2354_v50  ;;  %v2348_v12 = vrot.slane %v4842_v58, 4  ;;  %v2206_v63 = vsub.f32 %v4782_v13, %v2089_v57 }
 0x1cf   : > { %v3610_v62 = vpop.eup %3609  ;;  %2893 = vst [vmem:[%s4674_s30 + $0x9] sm:$0x1] %v2892_v19  ;;  %v2669_v44 = vrot.slane %v2668_v37, 1  ;;  %v2583_v43 = vmul.f32 %v3318_v54, %v2519_v5  ;;  %v2082_v40 = vrot.slane %v2081_v2, 1  ;;  %v2110_v49 = vrot.slane %v2109_v24, 2  ;;  %v4869_v54 = vpop.xlane.xlu0 %1953 }
 0x1d0   : > { %v2524_v28 = vmul.f32 %v3610_v62, %v4803_v38  ;;  %v2356_v16 = vrot.slane %v2355_v0, 2  ;;  %v2349_v42 = vadd.f32 %v4842_v58, %v2348_v12  ;;  %v2252_v59 = vmul.f32 1.442695, %v2206_v63 }
 0x1d1   : > { %v4856_v21 = vpop.eup %3611  ;;  %v2670_v56 = vadd.f32 %v2669_v44, %v2668_v37  ;;  %v2657_v53 = vsel %vm620_vm0, %v2583_v43, 0.0  ;;  %v2083_v13 = vmax.f32 %v2081_v2, %v2082_v40  ;;  %v2102_v55 = vrot.slane %v4863_v6, 4  ;;  %v2885_v40 = vld [vmem:[%s4674_s30 + $0x7] sm:$0x1] }
 0x1d2   : > { %v2658_v20 = vrot.slane %v2657_v53, 4  ;;  %v2588_v14 = vmul.f32 %v3329_v48, %v2524_v28  ;;  %v2357_v47 = vadd.f32 %v2356_v16, %v2355_v0  ;;  %v2350_v11 = vrot.slane %v2349_v42, 2 }
 0x1d3   : > { %v2840_v17 = vpack.c.bf16 %v2670_v56, %v2670_v56  ;;  %v2378_v38 = vrot.slane %v4856_v21, 4  ;;  %3613 = vpow2.f32 %v2252_v59  ;;  %v2205_v41 = vsub.f32 %v4809_v33, %v2083_v13 }
 0x1d4   : > { %v2659_v22 = vadd.f32 %v2658_v20, %v2657_v53  ;;  %v2692_v23 = vsel %vm620_vm0, %v2588_v14, 0.0  ;;  %v2358_v29 = vrot.slane %v2357_v47, 1  ;;  %v2351_v1 = vadd.f32 %v2350_v11, %v2349_v42 }
 0x1d5   : > { %v2889_v15 = vsel %vm4103_vm3, %v2840_v17, %v2888_v39  ;;  %v2693_v60 = vrot.slane %v2692_v23, 4  ;;  %v2379_v36 = vadd.f32 %v4856_v21, %v2378_v38  ;;  %v2250_v35 = vmul.f32 1.442695, %v2205_v41  ;;  %v2900_v17 = vld [vmem:[%s4674_s30 + $0xc] sm:$0x1] }
 0x1d6   : > { %2890 = vst [vmem:[%s4674_s30 + $0x8] sm:$0x1] %v2889_v15  ;;  %v2660_v52 = vrot.slane %v2659_v22, 2  ;;  %v2359_v34 = vadd.f32 %v2358_v29, %v2357_v47  ;;  %v2352_v51 = vrot.slane %v2351_v1, 1  ;;  %v2111_v33 = vmax.f32 %v2109_v24, %v2110_v49 }
 0x1d7   : > { %v2694_v25 = vadd.f32 %v2693_v60, %v2692_v23  ;;  %v2380_v26 = vrot.slane %v2379_v36, 2  ;;  %3615 = vpow2.f32 %v2250_v35  ;;  %v2103_v7 = vmax.f32 %v4863_v6, %v2102_v55 }
 0x1d8   : > { %v2661_v48 = vadd.f32 %v2660_v52, %v2659_v22  ;;  %3617 = vrcp.f32 %v2359_v34  ;;  %v2353_v10 = vadd.f32 %v2352_v51, %v2351_v1  ;;  %v2112_v3 = vrot.slane %v2111_v33, 1  ;;  %v4894_v22 = vpop.xlane.xlu2 %1968 }
 0x1d9   : > { %v4872_v9 = vpop.eup %3613  ;;  %v2695_v8 = vrot.slane %v2694_v25, 2  ;;  %v2381_v27 = vadd.f32 %v2380_v26, %v2379_v36  ;;  %v2096_v18 = vrot.slane %v4869_v54, 4  ;;  %v3325_v57 = vunpack.c.l.bf16 %v4833_v32 }
 0x1da   : > { %v2662_v50 = vrot.slane %v2661_v48, 1  ;;  %3619 = vrcp.f32 %v2353_v10  ;;  %v2372_v37 = vrot.slane %v4872_v9, 4  ;;  %v2113_v19 = vmax.f32 %v2111_v33, %v2112_v3 }
 0x1db   : > { %v2696_v5 = vadd.f32 %v2695_v8, %v2694_v25  ;;  %v2382_v2 = vrot.slane %v2381_v27, 1  ;;  %v2104_v0 = vrot.slane %v2103_v7, 2  ;;  %v3334_v63 = vunpack.c.h.bf16 %v4875_v45 }
 0x1dc   : > { %v2663_v12 = vadd.f32 %v2662_v50, %v2661_v48  ;;  %v2373_v62 = vadd.f32 %v4872_v9, %v2372_v37  ;;  %v2097_v44 = vmax.f32 %v4869_v54, %v2096_v18  ;;  %v2210_v16 = vsub.f32 %v4827_v31, %v2113_v19 }
 0x1dd   : > { %v4884_v43 = vpop.eup %3615  ;;  %v2697_v24 = vrot.slane %v2696_v5, 1  ;;  %v2383_v28 = vadd.f32 %v2382_v2, %v2381_v27  ;;  %v2105_v42 = vmax.f32 %v2103_v7, %v2104_v0  ;;  %v2126_v51 = vrot.slane %v4894_v22, 4 }
 0x1de   : > { %v3618_v59 = vpop.eup %3617  ;;  %v2839_v56 = vpack.c.bf16 %v2663_v12, %v2663_v12  ;;  %v2374_v53 = vrot.slane %v2373_v62, 2  ;;  %v2366_v13 = vrot.slane %v4884_v43, 4  ;;  %v2098_v49 = vrot.slane %v2097_v44, 2 }
 0x1df   : > { %v2698_v39 = vadd.f32 %v2697_v24, %v2696_v5  ;;  %v2523_v20 = vmul.f32 %v3618_v59, %v4835_v46  ;;  %3621 = vrcp.f32 %v2383_v28  ;;  %v2260_v14 = vmul.f32 1.442695, %v2210_v16 }
 0x1e0   : > { %v3620_v47 = vpop.eup %3619  ;;  %v2886_v11 = vsel %vm4103_vm3, %v2839_v56, %v2885_v40  ;;  %v2375_v38 = vadd.f32 %v2374_v53, %v2373_v62  ;;  %v2367_v31 = vadd.f32 %v4884_v43, %v2366_v13  ;;  %v2106_v41 = vrot.slane %v2105_v42, 1  ;;  %v4914_v62 = vpop.xlane.xlu1 %1965  ;;  %v4919_v53 = vld [vmem:[%s4585_s27 + $0x48] sm:$0xff]  }
 0x1e1   : > { %2887 = vst [vmem:[%s4674_s30 + $0x7] sm:$0x1] %v2886_v11  ;;  %v2844_v23 = vpack.c.bf16 %v2698_v39, %v2698_v39  ;;  %v2587_v29 = vmul.f32 %v3326_v4, %v2523_v20  ;;  %v2522_v46 = vmul.f32 %v3620_v47, %v4842_v58  ;;  %3623 = vpow2.f32 %v2260_v14 }
 0x1e2   : > { %v2376_v1 = vrot.slane %v2375_v38, 1  ;;  %v2368_v15 = vrot.slane %v2367_v31, 2  ;;  %v2107_v60 = vmax.f32 %v2105_v42, %v2106_v41  ;;  %v2099_v36 = vmax.f32 %v2097_v44, %v2098_v49 }
 0x1e3   : > { %v2901_v35 = vsel %vm4103_vm3, %v2844_v23, %v2900_v17  ;;  %v2685_v52 = vsel %vm620_vm0, %v2587_v29, 0.0  ;;  %v2586_v34 = vmul.f32 %v3325_v57, %v2522_v46  ;;  %v3333_v55 = vunpack.c.l.bf16 %v4875_v45 }
 0x1e4   : > { %2902 = vst [vmem:[%s4674_s30 + $0xc] sm:$0x1] %v2901_v35  ;;  %v2686_v33 = vrot.slane %v2685_v52, 4  ;;  %v2377_v25 = vadd.f32 %v2376_v1, %v2375_v38  ;;  %v2369_v32 = vadd.f32 %v2368_v15, %v2367_v31  ;;  %v2209_v4 = vsub.f32 %v4863_v6, %v2107_v60  ;;  %v2897_v31 = vld [vmem:[%s4674_s30 + $0xb] sm:$0x1] }
 0x1e5   : > { %v3622_v58 = vpop.eup %3621  ;;  %v2678_v26 = vsel %vm620_vm0, %v2586_v34, 0.0  ;;  %v2100_v48 = vrot.slane %v2099_v36, 1  ;;  %v2127_v10 = vmax.f32 %v4894_v22, %v2126_v51  ;;  %v2120_v13 = vrot.slane %v4914_v62, 4  ;;  %v2894_v35 = vld [vmem:[%s4674_s30 + $0xa] sm:$0x1] }
 0x1e6   : > { %v2687_v3 = vadd.f32 %v2686_v33, %v2685_v52  ;;  %v2679_v8 = vrot.slane %v2678_v26, 4  ;;  %v2527_v27 = vmul.f32 %v3622_v58, %v4856_v21  ;;  %3625 = vrcp.f32 %v2377_v25 }
 0x1e7   : > { %v4910_v7 = vpop.eup %3623  ;;  %v2370_v18 = vrot.slane %v2369_v32, 1  ;;  %v2258_v50 = vmul.f32 1.442695, %v2209_v4  ;;  %v2101_v57 = vmax.f32 %v2099_v36, %v2100_v48  ;;  %v2128_v37 = vrot.slane %v2127_v10, 2  ;;  %v4940_v48 = vpop.xlane.xlu0 %1962 }
 0x1e8   : > { %v2688_v6 = vrot.slane %v2687_v3, 2  ;;  %v2680_v5 = vadd.f32 %v2679_v8, %v2678_v26  ;;  %v2591_v2 = vmul.f32 %v3334_v63, %v2527_v27  ;;  %v2396_v19 = vrot.slane %v4910_v7, 4 }
 0x1e9   : > { %v2371_v45 = vadd.f32 %v2370_v18, %v2369_v32  ;;  %3627 = vpow2.f32 %v2258_v50  ;;  %v2208_v0 = vsub.f32 %v4869_v54, %v2101_v57  ;;  %v2129_v12 = vmax.f32 %v2127_v10, %v2128_v37  ;;  %v4947_v18 = vld [vmem:[%s4585_s27 + $0x40] sm:$0xff]   ;;  %v2909_v37 = vld [vmem:[%s4674_s30 + $0xf] sm:$0x1] }
 0x1ea   : > { %v2689_v21 = vadd.f32 %v2688_v6, %v2687_v3  ;;  %v2681_v44 = vrot.slane %v2680_v5, 2  ;;  %v2713_v40 = vsel %vm620_vm0, %v2591_v2, 0.0  ;;  %v2397_v24 = vadd.f32 %v4910_v7, %v2396_v19 }
 0x1eb   : > { %v2714_v28 = vrot.slane %v2713_v40, 4  ;;  %3629 = vrcp.f32 %v2371_v45  ;;  %v2256_v16 = vmul.f32 1.442695, %v2208_v0  ;;  %v2130_v63 = vrot.slane %v2129_v12, 1 }
 0x1ec   : > { %v3626_v42 = vpop.eup %3625  ;;  %v2690_v59 = vrot.slane %v2689_v21, 1  ;;  %v2682_v56 = vadd.f32 %v2681_v44, %v2680_v5  ;;  %v2398_v54 = vrot.slane %v2397_v24, 2  ;;  %v3330_v11 = vunpack.c.h.bf16 %v4823_v61 }
 0x1ed   : > { %v2715_v49 = vadd.f32 %v2714_v28, %v2713_v40  ;;  %v2526_v39 = vmul.f32 %v3626_v42, %v4872_v9  ;;  %3631 = vpow2.f32 %v2256_v16  ;;  %v2131_v20 = vmax.f32 %v2129_v12, %v2130_v63  ;;  %v4955_v16 = vpop.xlane.xlu2 %1977 }
 0x1ee   : > { %v2691_v14 = vadd.f32 %v2690_v59, %v2689_v21  ;;  %v2683_v47 = vrot.slane %v2682_v56, 1  ;;  %v2399_v17 = vadd.f32 %v2398_v54, %v2397_v24  ;;  %v3341_v29 = vunpack.c.l.bf16 %v4919_v53 }
 0x1ef   : > { %v4924_v38 = vpop.eup %3627  ;;  %v2716_v41 = vrot.slane %v2715_v49, 2  ;;  %v2590_v23 = vmul.f32 %v3333_v55, %v2526_v39  ;;  %v2213_v46 = vsub.f32 %v4894_v22, %v2131_v20  ;;  %v2121_v51 = vmax.f32 %v4914_v62, %v2120_v13 }
 0x1f0   : > { %v2843_v1 = vpack.c.bf16 %v2691_v14, %v2691_v14  ;;  %v2684_v9 = vadd.f32 %v2683_v47, %v2682_v56  ;;  %v2400_v15 = vrot.slane %v2399_v17, 1  ;;  %v2390_v60 = vrot.slane %v4924_v38, 4 }
 0x1f1   : > { %v3630_v36 = vpop.eup %3629  ;;  %v2717_v52 = vadd.f32 %v2716_v41, %v2715_v49  ;;  %v2706_v61 = vsel %vm620_vm0, %v2590_v23, 0.0  ;;  %v2266_v34 = vmul.f32 1.442695, %v2213_v46  ;;  %v2122_v57 = vrot.slane %v2121_v51, 2 }
 0x1f2   : > { %v2898_v33 = vsel %vm4103_vm3, %v2843_v1, %v2897_v31  ;;  %v2842_v25 = vpack.c.bf16 %v2684_v9, %v2684_v9  ;;  %v2707_v22 = vrot.slane %v2706_v61, 4  ;;  %v2525_v32 = vmul.f32 %v3630_v36, %v4884_v43  ;;  %v2906_v9 = vld [vmem:[%s4674_s30 + $0xe] sm:$0x1] }
 0x1f3   : > { %v4936_v4 = vpop.eup %3631  ;;  %2899 = vst [vmem:[%s4674_s30 + $0xb] sm:$0x1] %v2898_v33  ;;  %v2718_v58 = vrot.slane %v2717_v52, 1  ;;  %v2401_v26 = vadd.f32 %v2400_v15, %v2399_v17  ;;  %v2391_v55 = vadd.f32 %v4924_v38, %v2390_v60  ;;  %3633 = vpow2.f32 %v2266_v34 }
 0x1f4   : > { %v2895_v10 = vsel %vm4103_vm3, %v2842_v25, %v2894_v35  ;;  %v2708_v3 = vadd.f32 %v2707_v22, %v2706_v61  ;;  %v2589_v8 = vmul.f32 %v3330_v11, %v2525_v32  ;;  %v2384_v27 = vrot.slane %v4936_v4, 4  ;;  %v4971_v22 = vpop.xlane.xlu1 %1974  ;;  %v4973_v32 = vpop.xlane.xlu0 %1971 }
 0x1f5   : > { %2896 = vst [vmem:[%s4674_s30 + $0xa] sm:$0x1] %v2895_v10  ;;  %v2719_v43 = vadd.f32 %v2718_v58, %v2717_v52  ;;  %3635 = vrcp.f32 %v2401_v26  ;;  %v2392_v50 = vrot.slane %v2391_v55, 2  ;;  %v2114_v19 = vrot.slane %v4940_v48, 4 }
 0x1f6   : > { %v2709_v6 = vrot.slane %v2708_v3, 2  ;;  %v2699_v5 = vsel %vm620_vm0, %v2589_v8, 0.0  ;;  %v2385_v2 = vadd.f32 %v4936_v4, %v2384_v27  ;;  %v2123_v21 = vmax.f32 %v2121_v51, %v2122_v57 }
 0x1f7   : > { %v2847_v45 = vpack.c.bf16 %v2719_v43, %v2719_v43  ;;  %v2700_v0 = vrot.slane %v2699_v5, 4  ;;  %v2393_v12 = vadd.f32 %v2392_v50, %v2391_v55  ;;  %v3338_v40 = vunpack.c.h.bf16 %v4947_v18 }
 0x1f8   : > { %v2710_v44 = vadd.f32 %v2709_v6, %v2708_v3  ;;  %v2386_v24 = vrot.slane %v2385_v2, 2  ;;  %v2115_v28 = vmax.f32 %v4940_v48, %v2114_v19  ;;  %v2124_v54 = vrot.slane %v2123_v21, 1  ;;  %v2903_v3 = vld [vmem:[%s4674_s30 + $0xd] sm:$0x1] }
 0x1f9   : > { %v4957_v63 = vpop.eup %3633  ;;  %v2910_v42 = vsel %vm4103_vm3, %v2847_v45, %v2909_v37  ;;  %v2701_v59 = vadd.f32 %v2700_v0, %v2699_v5  ;;  %v2394_v56 = vrot.slane %v2393_v12, 1  ;;  %v2144_v31 = vrot.slane %v4955_v16, 4 }
 0x1fa   : > { %2911 = vst [vmem:[%s4674_s30 + $0xf] sm:$0x1] %v2910_v42  ;;  %v2711_v13 = vrot.slane %v2710_v44, 1  ;;  %v2387_v49 = vadd.f32 %v2386_v24, %v2385_v2  ;;  %v2414_v39 = vrot.slane %v4957_v63, 4  ;;  %v2116_v20 = vrot.slane %v2115_v28, 2 }
 0x1fb   : > { %v3636_v14 = vpop.eup %3635  ;;  %v2702_v47 = vrot.slane %v2701_v59, 2  ;;  %v2395_v11 = vadd.f32 %v2394_v56, %v2393_v12  ;;  %v2125_v17 = vmax.f32 %v2123_v21, %v2124_v54  ;;  %v2145_v25 = vmax.f32 %v4955_v16, %v2144_v31  ;;  %v4993_v56 = vld [vmem:[%s4585_s27 + $0x50] sm:$0xff]  }
 0x1fc   : > { %v2712_v41 = vadd.f32 %v2711_v13, %v2710_v44  ;;  %v2530_v23 = vmul.f32 %v3636_v14, %v4910_v7  ;;  %v2388_v46 = vrot.slane %v2387_v49, 1  ;;  %v2415_v1 = vadd.f32 %v4957_v63, %v2414_v39 }
 0x1fd   : > { %v2703_v15 = vadd.f32 %v2702_v47, %v2701_v59  ;;  %3637 = vrcp.f32 %v2395_v11  ;;  %v2212_v60 = vsub.f32 %v4914_v62, %v2125_v17  ;;  %v2117_v36 = vmax.f32 %v2115_v28, %v2116_v20 }
 0x1fe   : > { %v2846_v35 = vpack.c.bf16 %v2712_v41, %v2712_v41  ;;  %v2594_v52 = vmul.f32 %v3341_v29, %v2530_v23  ;;  %v2389_v61 = vadd.f32 %v2388_v46, %v2387_v49  ;;  %v2416_v34 = vrot.slane %v2415_v1, 2 }
 0x1ff   : > { %v2704_v51 = vrot.slane %v2703_v15, 1  ;;  %v2264_v33 = vmul.f32 1.442695, %v2212_v60  ;;  %v2118_v7 = vrot.slane %v2117_v36, 1  ;;  %v2146_v27 = vrot.slane %v2145_v25, 2 }
 0x200   : > { %v2907_v62 = vsel %vm4103_vm3, %v2846_v35, %v2906_v9  ;;  %v2734_v58 = vsel %vm620_vm0, %v2594_v52, 0.0  ;;  %3639 = vrcp.f32 %v2389_v61  ;;  %v2417_v26 = vadd.f32 %v2416_v34, %v2415_v1  ;;  %v5004_v1 = vpop.xlane.xlu2 %1986  ;;  %v2918_v52 = vld [vmem:[%s4674_s30 + $0x12] sm:$0x1] }
 0x201   : > { %2908 = vst [vmem:[%s4674_s30 + $0xe] sm:$0x1] %v2907_v62  ;;  %v2705_v29 = vadd.f32 %v2704_v51, %v2703_v15  ;;  %v2735_v55 = vrot.slane %v2734_v58, 4  ;;  %3641 = vpow2.f32 %v2264_v33  ;;  %v2119_v10 = vmax.f32 %v2117_v36, %v2118_v7 }
 0x202   : > { %v2418_v8 = vrot.slane %v2417_v26, 1  ;;  %v2138_v43 = vrot.slane %v4971_v22, 4  ;;  %v2132_v50 = vrot.slane %v4973_v32, 4  ;;  %v3337_v5 = vunpack.c.l.bf16 %v4947_v18 }
 0x203   : > { %v3638_v57 = vpop.eup %3637  ;;  %v2845_v37 = vpack.c.bf16 %v2705_v29, %v2705_v29  ;;  %v2736_v6 = vadd.f32 %v2735_v55, %v2734_v58  ;;  %v2211_v2 = vsub.f32 %v4940_v48, %v2119_v10  ;;  %v2147_v0 = vmax.f32 %v2145_v25, %v2146_v27 }
 0x204   : > { %v2529_v19 = vmul.f32 %v3638_v57, %v4924_v38  ;;  %v2419_v45 = vadd.f32 %v2418_v8, %v2417_v26  ;;  %v2139_v12 = vmax.f32 %v4971_v22, %v2138_v43  ;;  %v2133_v28 = vmax.f32 %v4973_v32, %v2132_v50 }
 0x205   : > { %v2904_v21 = vsel %vm4103_vm3, %v2845_v37, %v2903_v3  ;;  %v2737_v44 = vrot.slane %v2736_v6, 2  ;;  %v2262_v24 = vmul.f32 1.442695, %v2211_v2  ;;  %v2148_v38 = vrot.slane %v2147_v0, 1 }
 0x206   : > { %v3640_v42 = vpop.eup %3639  ;;  %2905 = vst [vmem:[%s4674_s30 + $0xd] sm:$0x1] %v2904_v21  ;;  %v2593_v59 = vmul.f32 %v3338_v40, %v2529_v19  ;;  %3643 = vrcp.f32 %v2419_v45  ;;  %v2140_v48 = vrot.slane %v2139_v12, 2  ;;  %v2134_v39 = vrot.slane %v2133_v28, 2 }
 0x207   : > { %v4995_v54 = vpop.eup %3641  ;;  %v2738_v13 = vadd.f32 %v2737_v44, %v2736_v6  ;;  %v2528_v49 = vmul.f32 %v3640_v42, %v4936_v4  ;;  %3645 = vpow2.f32 %v2262_v24  ;;  %v2149_v47 = vmax.f32 %v2147_v0, %v2148_v38  ;;  %v5020_v24 = vpop.xlane.xlu1 %1983  ;;  %v2915_v42 = vld [vmem:[%s4674_s30 + $0x11] sm:$0x1] }
 0x208   : > { %v2727_v20 = vsel %vm620_vm0, %v2593_v59, 0.0  ;;  %v2408_v14 = vrot.slane %v4995_v54, 4  ;;  %v2141_v18 = vmax.f32 %v2139_v12, %v2140_v48  ;;  %v3346_v31 = vunpack.c.h.bf16 %v4993_v56 }
 0x209   : > { %v2739_v40 = vrot.slane %v2738_v13, 1  ;;  %v2728_v11 = vrot.slane %v2727_v20, 4  ;;  %v2592_v17 = vmul.f32 %v3337_v5, %v2528_v49  ;;  %v3345_v41 = vunpack.c.l.bf16 %v4993_v56 }
 0x20a   : > { %v2409_v23 = vadd.f32 %v4995_v54, %v2408_v14  ;;  %v2216_v4 = vsub.f32 %v4955_v16, %v2149_v47  ;;  %v2142_v46 = vrot.slane %v2141_v18, 1  ;;  %v2135_v36 = vmax.f32 %v2133_v28, %v2134_v39 }
 0x20b   : > { %v2740_v9 = vadd.f32 %v2739_v40, %v2738_v13  ;;  %v2729_v15 = vadd.f32 %v2728_v11, %v2727_v20  ;;  %v2720_v60 = vsel %vm620_vm0, %v2592_v17, 0.0  ;;  %v2162_v58 = vrot.slane %v5004_v1, 4  ;;  %v5028_v11 = vpop.xlane.xlu0 %1980 }
 0x20c   : > { %v3644_v35 = vpop.eup %3643  ;;  %v2721_v61 = vrot.slane %v2720_v60, 4  ;;  %v2410_v34 = vrot.slane %v2409_v23, 2  ;;  %v2272_v51 = vmul.f32 1.442695, %v2216_v4  ;;  %v2143_v33 = vmax.f32 %v2141_v18, %v2142_v46 }
 0x20d   : > { %v5008_v7 = vpop.eup %3645  ;;  %v2850_v25 = vpack.c.bf16 %v2740_v9, %v2740_v9  ;;  %v2730_v62 = vrot.slane %v2729_v15, 2  ;;  %v2533_v16 = vmul.f32 %v3644_v35, %v4957_v63  ;;  %v2136_v63 = vrot.slane %v2135_v36, 1  ;;  %v5039_v35 = vld [vmem:[%s4585_s27 + $0x60] sm:$0xff]  }
 0x20e   : > { %v2722_v26 = vadd.f32 %v2721_v61, %v2720_v60  ;;  %v2411_v29 = vadd.f32 %v2410_v34, %v2409_v23  ;;  %v2402_v55 = vrot.slane %v5008_v7, 4  ;;  %3647 = vpow2.f32 %v2272_v51 }
 0x20f   : > { %v2919_v10 = vsel %vm4103_vm3, %v2850_v25, %v2918_v52  ;;  %v2731_v3 = vadd.f32 %v2730_v62, %v2729_v15  ;;  %v2597_v8 = vmul.f32 %v3346_v31, %v2533_v16  ;;  %v2215_v27 = vsub.f32 %v4971_v22, %v2143_v33  ;;  %v2912_v31 = vld [vmem:[%s4674_s30 + $0x10] sm:$0x1] }
 0x210   : > { %2920 = vst [vmem:[%s4674_s30 + $0x12] sm:$0x1] %v2919_v10  ;;  %v2723_v43 = vrot.slane %v2722_v26, 2  ;;  %v2412_v50 = vrot.slane %v2411_v29, 1  ;;  %v2403_v57 = vadd.f32 %v5008_v7, %v2402_v55  ;;  %v2163_v2 = vmax.f32 %v5004_v1, %v2162_v58  ;;  %v5049_v55 = vpop.xlane.xlu2 %1995 }
 0x211   : > { %v2732_v37 = vrot.slane %v2731_v3, 1  ;;  %v2755_v6 = vsel %vm620_vm0, %v2597_v8, 0.0  ;;  %v2270_v5 = vmul.f32 1.442695, %v2215_v27  ;;  %v2137_v22 = vmax.f32 %v2135_v36, %v2136_v63 }
 0x212   : > { %v2724_v19 = vadd.f32 %v2723_v43, %v2722_v26  ;;  %v2756_v45 = vrot.slane %v2755_v6, 4  ;;  %v2413_v0 = vadd.f32 %v2412_v50, %v2411_v29  ;;  %v2404_v12 = vrot.slane %v2403_v57, 2  ;;  %v2927_v43 = vld [vmem:[%s4674_s30 + $0x15] sm:$0x1] }
 0x213   : > { %v2733_v21 = vadd.f32 %v2732_v37, %v2731_v3  ;;  %3649 = vpow2.f32 %v2270_v5  ;;  %v2164_v44 = vrot.slane %v2163_v2, 2  ;;  %v2214_v39 = vsub.f32 %v4973_v32, %v2137_v22 }
 0x214   : > { %v5022_v28 = vpop.eup %3647  ;;  %v2725_v59 = vrot.slane %v2724_v19, 1  ;;  %v2757_v38 = vadd.f32 %v2756_v45, %v2755_v6  ;;  %3651 = vrcp.f32 %v2413_v0  ;;  %v2405_v48 = vadd.f32 %v2404_v12, %v2403_v57  ;;  %v5064_v12 = vld [vmem:[%s4585_s27 + $0x58] sm:$0xff]  }
 0x215   : > { %v2849_v13 = vpack.c.bf16 %v2733_v21, %v2733_v21  ;;  %v2432_v49 = vrot.slane %v5022_v28, 4  ;;  %v2165_v20 = vmax.f32 %v2163_v2, %v2164_v44  ;;  %v2156_v40 = vrot.slane %v5020_v24, 4 }
 0x216   : > { %v2726_v14 = vadd.f32 %v2725_v59, %v2724_v19  ;;  %v2758_v47 = vrot.slane %v2757_v38, 2  ;;  %v2406_v18 = vrot.slane %v2405_v48, 1  ;;  %v2268_v4 = vmul.f32 1.442695, %v2214_v39  ;;  %v5071_v39 = vpop.xlane.xlu1 %1992 }
 0x217   : > { %v2916_v17 = vsel %vm4103_vm3, %v2849_v13, %v2915_v42  ;;  %v2433_v23 = vadd.f32 %v5022_v28, %v2432_v49  ;;  %v2166_v46 = vrot.slane %v2165_v20, 1  ;;  %v2157_v60 = vmax.f32 %v5020_v24, %v2156_v40 }
 0x218   : > { %2917 = vst [vmem:[%s4674_s30 + $0x11] sm:$0x1] %v2916_v17  ;;  %v2848_v32 = vpack.c.bf16 %v2726_v14, %v2726_v14  ;;  %v2759_v9 = vadd.f32 %v2758_v47, %v2757_v38  ;;  %v2407_v15 = vadd.f32 %v2406_v18, %v2405_v48  ;;  %3653 = vpow2.f32 %v2268_v4 }
 0x219   : > { %v5036_v36 = vpop.eup %3649  ;;  %v2434_v52 = vrot.slane %v2433_v23, 2  ;;  %v2167_v61 = vmax.f32 %v2165_v20, %v2166_v46  ;;  %v2150_v34 = vrot.slane %v5028_v11, 4  ;;  %v3342_v58 = vunpack.c.h.bf16 %v4919_v53 }
 0x21a   : > { %v3652_v51 = vpop.eup %3651  ;;  %v2913_v33 = vsel %vm4103_vm3, %v2848_v32, %v2912_v31  ;;  %v2760_v25 = vrot.slane %v2759_v9, 1  ;;  %3655 = vrcp.f32 %v2407_v15  ;;  %v2426_v62 = vrot.slane %v5036_v36, 4 }
 0x21b   : > { %2914 = vst [vmem:[%s4674_s30 + $0x10] sm:$0x1] %v2913_v33  ;;  %v2532_v16 = vmul.f32 %v3652_v51, %v4995_v54  ;;  %v2435_v26 = vadd.f32 %v2434_v52, %v2433_v23  ;;  %v2219_v29 = vsub.f32 %v5004_v1, %v2167_v61  ;;  %v3353_v3 = vunpack.c.l.bf16 %v5039_v35 }
 0x21c   : > { %v2761_v10 = vadd.f32 %v2760_v25, %v2759_v9  ;;  %v2427_v8 = vadd.f32 %v5036_v36, %v2426_v62  ;;  %v2158_v27 = vrot.slane %v2157_v60, 2  ;;  %v2151_v53 = vmax.f32 %v5028_v11, %v2150_v34 }
 0x21d   : > { %v2596_v50 = vmul.f32 %v3345_v41, %v2532_v16  ;;  %v2436_v57 = vrot.slane %v2435_v26, 1  ;;  %v2278_v54 = vmul.f32 1.442695, %v2219_v29  ;;  %v2180_v6 = vrot.slane %v5049_v55, 4 }
 0x21e   : > { %v2853_v63 = vpack.c.bf16 %v2761_v10, %v2761_v10  ;;  %v2428_v1 = vrot.slane %v2427_v8, 2  ;;  %v2159_v37 = vmax.f32 %v2157_v60, %v2158_v27  ;;  %v5058_v5 = vpop.eup %3653  ;;  %v2152_v45 = vrot.slane %v2151_v53, 2 }
 0x21f   : > { %v2748_v2 = vsel %vm620_vm0, %v2596_v50, 0.0  ;;  %v2437_v19 = vadd.f32 %v2436_v57, %v2435_v26  ;;  %3657 = vpow2.f32 %v2278_v54  ;;  %v2420_v22 = vrot.slane %v5058_v5, 4  ;;  %v5085_v57 = vpop.xlane.xlu0 %1989 }
 0x220   : > { %v3656_v56 = vpop.eup %3655  ;;  %v2928_v41 = vsel %vm4103_vm3, %v2853_v63, %v2927_v43  ;;  %v2749_v0 = vrot.slane %v2748_v2, 4  ;;  %v2429_v21 = vadd.f32 %v2428_v1, %v2427_v8  ;;  %v2160_v42 = vrot.slane %v2159_v37, 1 }
 0x221   : > { %2929 = vst [vmem:[%s4674_s30 + $0x15] sm:$0x1] %v2928_v41  ;;  %v2531_v44 = vmul.f32 %v3656_v56, %v5008_v7  ;;  %3659 = vrcp.f32 %v2437_v19  ;;  %v2153_v59 = vmax.f32 %v2151_v53, %v2152_v45  ;;  %v2421_v13 = vadd.f32 %v5058_v5, %v2420_v22 }
 0x222   : > { %v2750_v38 = vadd.f32 %v2749_v0, %v2748_v2  ;;  %v2430_v48 = vrot.slane %v2429_v21, 1  ;;  %v2181_v49 = vmax.f32 %v5049_v55, %v2180_v6  ;;  %v3350_v14 = vunpack.c.h.bf16 %v5064_v12 }
 0x223   : > { %v2595_v20 = vmul.f32 %v3342_v58, %v2531_v44  ;;  %v2161_v47 = vmax.f32 %v2159_v37, %v2160_v42  ;;  %v2154_v18 = vrot.slane %v2153_v59, 1  ;;  %v2422_v31 = vrot.slane %v2421_v13, 2 }
 0x224   : > { %v2751_v40 = vrot.slane %v2750_v38, 2  ;;  %v2431_v17 = vadd.f32 %v2430_v48, %v2429_v21  ;;  %v2182_v7 = vrot.slane %v2181_v49, 2  ;;  %v2174_v9 = vrot.slane %v5071_v39, 4 }
 0x225   : > { %v5074_v23 = vpop.eup %3657  ;;  %v2741_v4 = vsel %vm620_vm0, %v2595_v20, 0.0  ;;  %v2218_v46 = vsub.f32 %v5020_v24, %v2161_v47  ;;  %v2155_v32 = vmax.f32 %v2153_v59, %v2154_v18  ;;  %v2423_v52 = vadd.f32 %v2422_v31, %v2421_v13 }
 0x226   : > { %v2752_v15 = vadd.f32 %v2751_v40, %v2750_v38  ;;  %v2742_v60 = vrot.slane %v2741_v4, 4  ;;  %3661 = vrcp.f32 %v2431_v17  ;;  %v2450_v34 = vrot.slane %v5074_v23, 4 }
 0x227   : > { %v3660_v61 = vpop.eup %3659  ;;  %v2276_v51 = vmul.f32 1.442695, %v2218_v46  ;;  %v2217_v33 = vsub.f32 %v5028_v11, %v2155_v32  ;;  %v2183_v25 = vmax.f32 %v2181_v49, %v2182_v7  ;;  %v2424_v24 = vrot.slane %v2423_v52, 1  ;;  %v2924_v11 = vld [vmem:[%s4674_s30 + $0x14] sm:$0x1]  ;;  %v5108_v46 = vld [vmem:[%s4585_s27 + $0x68] sm:$0xff]  }
 0x228   : > { %v2753_v62 = vrot.slane %v2752_v15, 1  ;;  %v2743_v16 = vadd.f32 %v2742_v60, %v2741_v4  ;;  %v2536_v58 = vmul.f32 %v3660_v61, %v5022_v28  ;;  %v2451_v26 = vadd.f32 %v5074_v23, %v2450_v34  ;;  %v2921_v49 = vld [vmem:[%s4674_s30 + $0x13] sm:$0x1]  ;;  %v5113_v61 = vpop.xlane.xlu0 %1998 }
 0x229   : > { %3663 = vpow2.f32 %v2276_v51  ;;  %v2274_v29 = vmul.f32 1.442695, %v2217_v33  ;;  %v2184_v10 = vrot.slane %v2183_v25, 1  ;;  %v2425_v50 = vadd.f32 %v2424_v24, %v2423_v52 }
 0x22a   : > { %v2754_v8 = vadd.f32 %v2753_v62, %v2752_v15  ;;  %v2744_v27 = vrot.slane %v2743_v16, 2  ;;  %v2600_v43 = vmul.f32 %v3353_v3, %v2536_v58  ;;  %v2452_v54 = vrot.slane %v2451_v26, 2 }
 0x22b   : > { %3665 = vpow2.f32 %v2274_v29  ;;  %v2185_v53 = vmax.f32 %v2183_v25, %v2184_v10  ;;  %v2175_v28 = vmax.f32 %v5071_v39, %v2174_v9  ;;  %v3349_v0 = vunpack.c.l.bf16 %v5064_v12 }
 0x22c   : > { %v3662_v63 = vpop.eup %3661  ;;  %v2852_v1 = vpack.c.bf16 %v2754_v8, %v2754_v8  ;;  %v2745_v37 = vadd.f32 %v2744_v27, %v2743_v16  ;;  %v2776_v6 = vsel %vm620_vm0, %v2600_v43, 0.0  ;;  %3667 = vrcp.f32 %v2425_v50  ;;  %v2936_v27 = vld [vmem:[%s4674_s30 + $0x18] sm:$0x1] }
 0x22d   : > { %v2777_v2 = vrot.slane %v2776_v6, 4  ;;  %v2535_v19 = vmul.f32 %v3662_v63, %v5036_v36  ;;  %v2453_v3 = vadd.f32 %v2452_v54, %v2451_v26  ;;  %v2222_v45 = vsub.f32 %v5049_v55, %v2185_v53 }
 0x22e   : > { %v2925_v56 = vsel %vm4103_vm3, %v2852_v1, %v2924_v11  ;;  %v2746_v41 = vrot.slane %v2745_v37, 1  ;;  %v2176_v48 = vrot.slane %v2175_v28, 2  ;;  %v2168_v55 = vrot.slane %v5085_v57, 4 }
 0x22f   : > { %v5095_v21 = vpop.eup %3663  ;;  %2926 = vst [vmem:[%s4674_s30 + $0x14] sm:$0x1] %v2925_v56  ;;  %v2778_v22 = vadd.f32 %v2777_v2, %v2776_v6  ;;  %v2599_v44 = vmul.f32 %v3350_v14, %v2535_v19  ;;  %v2454_v42 = vrot.slane %v2453_v3, 1  ;;  %v2284_v59 = vmul.f32 1.442695, %v2222_v45 }
 0x230   : > { %v2747_v38 = vadd.f32 %v2746_v41, %v2745_v37  ;;  %v2444_v36 = vrot.slane %v5095_v21, 4  ;;  %v2177_v32 = vmax.f32 %v2175_v28, %v2176_v48  ;;  %v3358_v62 = vunpack.c.h.bf16 %v5108_v46 }
 0x231   : > { %v5100_v13 = vpop.eup %3665  ;;  %v2779_v20 = vrot.slane %v2778_v22, 2  ;;  %v2769_v12 = vsel %vm620_vm0, %v2599_v44, 0.0  ;;  %v2455_v47 = vadd.f32 %v2454_v42, %v2453_v3  ;;  %3669 = vpow2.f32 %v2284_v59  ;;  %v2933_v59 = vld [vmem:[%s4674_s30 + $0x17] sm:$0x1] }
 0x232   : > { %v3668_v18 = vpop.eup %3667  ;;  %v2851_v14 = vpack.c.bf16 %v2747_v38, %v2747_v38  ;;  %v2770_v40 = vrot.slane %v2769_v12, 4  ;;  %v2445_v17 = vadd.f32 %v5095_v21, %v2444_v36  ;;  %v2438_v31 = vrot.slane %v5100_v13, 4 }
 0x233   : > { %v2780_v7 = vadd.f32 %v2779_v20, %v2778_v22  ;;  %v2534_v4 = vmul.f32 %v3668_v18, %v5058_v5  ;;  %3671 = vrcp.f32 %v2455_v47  ;;  %v2178_v33 = vrot.slane %v2177_v32, 1 }
 0x234   : > { %v2922_v9 = vsel %vm4103_vm3, %v2851_v14, %v2921_v49  ;;  %v2771_v15 = vadd.f32 %v2770_v40, %v2769_v12  ;;  %v2446_v60 = vrot.slane %v2445_v17, 2  ;;  %v2439_v52 = vadd.f32 %v5100_v13, %v2438_v31 }
 0x235   : > { %2923 = vst [vmem:[%s4674_s30 + $0x13] sm:$0x1] %v2922_v9  ;;  %v2781_v34 = vrot.slane %v2780_v7, 1  ;;  %v2598_v51 = vmul.f32 %v3349_v0, %v2534_v4  ;;  %v2169_v5 = vmax.f32 %v5085_v57, %v2168_v55  ;;  %v2179_v10 = vmax.f32 %v2177_v32, %v2178_v33 }
 0x236   : > { %v2772_v25 = vrot.slane %v2771_v15, 2  ;;  %v2447_v16 = vadd.f32 %v2446_v60, %v2445_v17  ;;  %v2440_v58 = vrot.slane %v2439_v52, 2  ;;  %v2186_v8 = vrot.slane %v5113_v61, 4 }
 0x237   : > { %v5118_v24 = vpop.eup %3669  ;;  %v2782_v26 = vadd.f32 %v2781_v34, %v2780_v7  ;;  %v2762_v29 = vsel %vm620_vm0, %v2598_v51, 0.0  ;;  %v2221_v1 = vsub.f32 %v5071_v39, %v2179_v10  ;;  %v2170_v37 = vrot.slane %v2169_v5, 2 }
 0x238   : > { %v2773_v43 = vadd.f32 %v2772_v25, %v2771_v15  ;;  %v2763_v50 = vrot.slane %v2762_v29, 4  ;;  %v2448_v11 = vrot.slane %v2447_v16, 1  ;;  %v2441_v54 = vadd.f32 %v2440_v58, %v2439_v52  ;;  %v2930_v52 = vld [vmem:[%s4674_s30 + $0x16] sm:$0x1] }
 0x239   : > { %v3672_v53 = vpop.eup %3671  ;;  %v2856_v28 = vpack.c.bf16 %v2782_v26, %v2782_v26  ;;  %v2468_v63 = vrot.slane %v5118_v24, 4  ;;  %v2282_v0 = vmul.f32 1.442695, %v2221_v1  ;;  %v2171_v36 = vmax.f32 %v2169_v5, %v2170_v37 }
 0x23a   : > { %v2774_v6 = vrot.slane %v2773_v43, 1  ;;  %v2764_v2 = vadd.f32 %v2763_v50, %v2762_v29  ;;  %v2539_v19 = vmul.f32 %v3672_v53, %v5074_v23  ;;  %v2449_v3 = vadd.f32 %v2448_v11, %v2447_v16 }
 0x23b   : > { %v2937_v45 = vsel %vm4103_vm3, %v2856_v28, %v2936_v27  ;;  %v2442_v56 = vrot.slane %v2441_v54, 1  ;;  %v2469_v41 = vadd.f32 %v5118_v24, %v2468_v63  ;;  %v2187_v49 = vmax.f32 %v5113_v61, %v2186_v8  ;;  %v5148_v27 = vld [vmem:[%s4585_s27 + $0x78] sm:$0xff]  }
 0x23c   : > { %2938 = vst [vmem:[%s4674_s30 + $0x18] sm:$0x1] %v2937_v45  ;;  %v2775_v22 = vadd.f32 %v2774_v6, %v2773_v43  ;;  %v2765_v44 = vrot.slane %v2764_v2, 2  ;;  %v2603_v42 = vmul.f32 %v3358_v62, %v2539_v19  ;;  %3673 = vrcp.f32 %v2449_v3 }
 0x23d   : > { %v2443_v39 = vadd.f32 %v2442_v56, %v2441_v54  ;;  %v2470_v38 = vrot.slane %v2469_v41, 2  ;;  %3675 = vpow2.f32 %v2282_v0  ;;  %v2172_v47 = vrot.slane %v2171_v36, 1 }
 0x23e   : > { %v2855_v23 = vpack.c.bf16 %v2775_v22, %v2775_v22  ;;  %v2766_v48 = vadd.f32 %v2765_v44, %v2764_v2  ;;  %v2797_v55 = vsel %vm620_vm0, %v2603_v42, 0.0  ;;  %v2188_v40 = vrot.slane %v2187_v49, 2 }
 0x23f   : > { %v2798_v20 = vrot.slane %v2797_v55, 4  ;;  %3677 = vrcp.f32 %v2443_v39  ;;  %v2471_v12 = vadd.f32 %v2470_v38, %v2469_v41  ;;  %v3357_v31 = vunpack.c.l.bf16 %v5108_v46 }
 0x240   : > { %v2934_v18 = vsel %vm4103_vm3, %v2855_v23, %v2933_v59  ;;  %v2767_v14 = vrot.slane %v2766_v48, 1  ;;  %v2173_v4 = vmax.f32 %v2171_v36, %v2172_v47  ;;  %v2189_v15 = vmax.f32 %v2187_v49, %v2188_v40  ;;  %v2942_v40 = vld [vmem:[%s4674_s30 + $0x1a] sm:$0x1] }
 0x241   : > { %2935 = vst [vmem:[%s4674_s30 + $0x17] sm:$0x1] %v2934_v18  ;;  %v2799_v17 = vadd.f32 %v2798_v20, %v2797_v55  ;;  %v2472_v7 = vrot.slane %v2471_v12, 1  ;;  %v3354_v62 = vunpack.c.h.bf16 %v5039_v35  ;;  %v3365_v1 = vunpack.c.l.bf16 %v5148_v27  ;;  %v3425_v18 = vld [vmem:[%s4585_s27 + $0x70] sm:$0xff]  }
 0x242   : > { %v3674_v32 = vpop.eup %3673  ;;  %v2768_v9 = vadd.f32 %v2767_v14, %v2766_v48  ;;  %v2220_v5 = vsub.f32 %v5085_v57, %v2173_v4  ;;  %v2190_v16 = vrot.slane %v2189_v15, 1 }
 0x243   : > { %v5137_v60 = vpop.eup %3675  ;;  %v2800_v34 = vrot.slane %v2799_v17, 2  ;;  %v2538_v51 = vmul.f32 %v3674_v32, %v5095_v21  ;;  %v2473_v33 = vadd.f32 %v2472_v7, %v2471_v12 }
 0x244   : > { %v2854_v25 = vpack.c.bf16 %v2768_v9, %v2768_v9  ;;  %v2462_v46 = vrot.slane %v5137_v60, 4  ;;  %v2280_v10 = vmul.f32 1.442695, %v2220_v5  ;;  %v2191_v43 = vmax.f32 %v2189_v15, %v2190_v16  ;;  %v2939_v5 = vld [vmem:[%s4674_s30 + $0x19] sm:$0x1] }
 0x245   : > { %v3678_v58 = vpop.eup %3677  ;;  %v2801_v26 = vadd.f32 %v2800_v34, %v2799_v17  ;;  %v2602_v29 = vmul.f32 %v3357_v31, %v2538_v51  ;;  %3679 = vrcp.f32 %v2473_v33 }
 0x246   : > { %v2931_v8 = vsel %vm4103_vm3, %v2854_v25, %v2930_v52  ;;  %v2537_v21 = vmul.f32 %v3678_v58, %v5100_v13  ;;  %v2463_v57 = vadd.f32 %v5137_v60, %v2462_v46  ;;  %3681 = vpow2.f32 %v2280_v10  ;;  %v2945_v13 = vld [vmem:[%s4674_s30 + $0x1b] sm:$0x1] }
 0x247   : > { %2932 = vst [vmem:[%s4674_s30 + $0x16] sm:$0x1] %v2931_v8  ;;  %v2802_v35 = vrot.slane %v2801_v26, 1  ;;  %v2790_v50 = vsel %vm620_vm0, %v2602_v29, 0.0  ;;  %v2223_v28 = vsub.f32 %v5113_v61, %v2191_v43  ;;  %v3362_v52 = vunpack.c.h.bf16 %v3425_v18 }
 0x248   : > { %v2791_v11 = vrot.slane %v2790_v50, 4  ;;  %v2601_v54 = vmul.f32 %v3354_v62, %v2537_v21  ;;  %v2464_v53 = vrot.slane %v2463_v57, 2 }
 0x249   : > { %v2803_v63 = vadd.f32 %v2802_v35, %v2801_v26  ;;  %v2286_v19 = vmul.f32 1.442695, %v2223_v28 }
 0x24a   : > { %v2792_v37 = vadd.f32 %v2791_v11, %v2790_v50  ;;  %v2783_v6 = vsel %vm620_vm0, %v2601_v54, 0.0  ;;  %v2465_v2 = vadd.f32 %v2464_v53, %v2463_v57  ;;  %v2954_v50 = vld [vmem:[%s4674_s30 + $0x1e] sm:$0x1] }
 0x24b   : > { %v3680_v3 = vpop.eup %3679  ;;  %v2859_v45 = vpack.c.bf16 %v2803_v63, %v2803_v63  ;;  %v2784_v56 = vrot.slane %v2783_v6, 4  ;;  %3683 = vpow2.f32 %v2286_v19  ;;  %v3361_v63 = vunpack.c.l.bf16 %v3425_v18 }
 0x24c   : > { %v2793_v41 = vrot.slane %v2792_v37, 2  ;;  %v2542_v0 = vmul.f32 %v3680_v3, %v5118_v24  ;;  %v2466_v22 = vrot.slane %v2465_v2, 1  ;;  %v3682_v44 = vpop.eup %3681  ;;  %v3366_v3 = vunpack.c.h.bf16 %v5148_v27 }
 0x24d   : > { %v2946_v61 = vsel %vm4103_vm3, %v2859_v45, %v2945_v13  ;;  %v2785_v42 = vadd.f32 %v2784_v56, %v2783_v6  ;;  %v2456_v36 = vrot.slane %v3682_v44, 4 }
 0x24e   : > { %2947 = vst [vmem:[%s4674_s30 + $0x1b] sm:$0x1] %v2946_v61  ;;  %v2794_v59 = vadd.f32 %v2793_v41, %v2792_v37  ;;  %v2606_v39 = vmul.f32 %v3365_v1, %v2542_v0  ;;  %v2467_v38 = vadd.f32 %v2466_v22, %v2465_v2  ;;  %v2951_v61 = vld [vmem:[%s4674_s30 + $0x1d] sm:$0x1] }
 0x24f   : > { %v2786_v23 = vrot.slane %v2785_v42, 2  ;;  %v2457_v24 = vadd.f32 %v3682_v44, %v2456_v36 }
 0x250   : > { %v2795_v48 = vrot.slane %v2794_v59, 1  ;;  %v2818_v55 = vsel %vm620_vm0, %v2606_v39, 0.0  ;;  %3685 = vrcp.f32 %v2467_v38 }
 0x251   : > { %v2787_v49 = vadd.f32 %v2786_v23, %v2785_v42  ;;  %v2819_v20 = vrot.slane %v2818_v55, 4  ;;  %v3684_v12 = vpop.eup %3683  ;;  %v2458_v14 = vrot.slane %v2457_v24, 2 }
 0x252   : > { %v2796_v47 = vadd.f32 %v2795_v48, %v2794_v59  ;;  %v2474_v7 = vrot.slane %v3684_v12, 4 }
 0x253   : > { %v2788_v17 = vrot.slane %v2787_v49, 1  ;;  %v2820_v31 = vadd.f32 %v2819_v20, %v2818_v55  ;;  %v2459_v32 = vadd.f32 %v2458_v14, %v2457_v24  ;;  %v2948_v20 = vld [vmem:[%s4674_s30 + $0x1c] sm:$0x1] }
 0x254   : > { %v2858_v4 = vpack.c.bf16 %v2796_v47, %v2796_v47  ;;  %v2475_v34 = vadd.f32 %v3684_v12, %v2474_v7 }
 0x255   : > { %v2789_v9 = vadd.f32 %v2788_v17, %v2787_v49  ;;  %v2821_v15 = vrot.slane %v2820_v31, 2  ;;  %v2460_v25 = vrot.slane %v2459_v32, 1  ;;  %v2957_v17 = vld [vmem:[%s4674_s30 + $0x1f] sm:$0x1] }
 0x256   : > { %v3686_v51 = vpop.eup %3685  ;;  %v2943_v33 = vsel %vm4103_vm3, %v2858_v4, %v2942_v40  ;;  %v2476_v58 = vrot.slane %v2475_v34, 2 }
 0x257   : > { %2944 = vst [vmem:[%s4674_s30 + $0x1a] sm:$0x1] %v2943_v33  ;;  %v2857_v62 = vpack.c.bf16 %v2789_v9, %v2789_v9  ;;  %v2822_v46 = vadd.f32 %v2821_v15, %v2820_v31  ;;  %v2541_v16 = vmul.f32 %v3686_v51, %v5137_v60  ;;  %v2461_v26 = vadd.f32 %v2460_v25, %v2459_v32 }
 0x258   : > { %v2477_v21 = vadd.f32 %v2476_v58, %v2475_v34 }
 0x259   : > { %v2940_v29 = vsel %vm4103_vm3, %v2857_v62, %v2939_v5  ;;  %v2823_v10 = vrot.slane %v2822_v46, 1  ;;  %v2605_v8 = vmul.f32 %v3362_v52, %v2541_v16  ;;  %3687 = vrcp.f32 %v2461_v26 }
 0x25a   : > { %2941 = vst [vmem:[%s4674_s30 + $0x19] sm:$0x1] %v2940_v29  ;;  %v2478_v35 = vrot.slane %v2477_v21, 1 }
 0x25b   : > { %v2824_v57 = vadd.f32 %v2823_v10, %v2822_v46  ;;  %v2811_v43 = vsel %vm620_vm0, %v2605_v8, 0.0 }
 0x25c   : > { %v2812_v11 = vrot.slane %v2811_v43, 4  ;;  %v2479_v53 = vadd.f32 %v2478_v35, %v2477_v21 }
 0x25d   : > { %v2862_v54 = vpack.c.bf16 %v2824_v57, %v2824_v57 }
 0x25e   : > { %v2813_v60 = vadd.f32 %v2812_v11, %v2811_v43  ;;  %3689 = vrcp.f32 %v2479_v53 }
 0x25f   : > { %v2955_v28 = vsel %vm4103_vm3, %v2862_v54, %v2954_v50  ;;  %v3688_v1 = vpop.eup %3687 }
 0x260   : > { %2956 = vst [vmem:[%s4674_s30 + $0x1e] sm:$0x1] %v2955_v28  ;;  %v2814_v13 = vrot.slane %v2813_v60, 2  ;;  %v2540_v37 = vmul.f32 %v3688_v1, %v3682_v44 }
 0x262   : > { %v2815_v6 = vadd.f32 %v2814_v13, %v2813_v60  ;;  %v2604_v2 = vmul.f32 %v3361_v63, %v2540_v37 }
 0x264   : > { %v2816_v19 = vrot.slane %v2815_v6, 1  ;;  %v3690_v45 = vpop.eup %3689  ;;  %v2804_v56 = vsel %vm620_vm0, %v2604_v2, 0.0 }
 0x265   : > { %v2805_v0 = vrot.slane %v2804_v56, 4  ;;  %v2543_v22 = vmul.f32 %v3690_v45, %v3684_v12 }
 0x266   : > { %v2817_v41 = vadd.f32 %v2816_v19, %v2815_v6 }
 0x267   : > { %v2806_v59 = vadd.f32 %v2805_v0, %v2804_v56  ;;  %v2607_v39 = vmul.f32 %v3366_v3, %v2543_v22 }
 0x268   : > { %v2861_v42 = vpack.c.bf16 %v2817_v41, %v2817_v41 }
 0x269   : > { %v2807_v38 = vrot.slane %v2806_v59, 2  ;;  %v2825_v36 = vsel %vm620_vm0, %v2607_v39, 0.0 }
 0x26a   : > { %v2952_v44 = vsel %vm4103_vm3, %v2861_v42, %v2951_v61  ;;  %v2826_v27 = vrot.slane %v2825_v36, 4 }
 0x26b   : > { %2953 = vst [vmem:[%s4674_s30 + $0x1d] sm:$0x1] %v2952_v44  ;;  %v2808_v23 = vadd.f32 %v2807_v38, %v2806_v59 }
 0x26c   : > { %v2827_v48 = vadd.f32 %v2826_v27, %v2825_v36 }
 0x26d   : > { %v2809_v55 = vrot.slane %v2808_v23, 1 }
 0x26e   : > { %v2828_v24 = vrot.slane %v2827_v48, 2 }
 0x26f   : > { %v2810_v49 = vadd.f32 %v2809_v55, %v2808_v23 }
 0x270   : > { %v2829_v12 = vadd.f32 %v2828_v24, %v2827_v48 }
 0x271   : > { %v2860_v47 = vpack.c.bf16 %v2810_v49, %v2810_v49 }
 0x272   : > { %v2830_v18 = vrot.slane %v2829_v12, 1 }
 0x273   : > { %v2949_v14 = vsel %vm4103_vm3, %v2860_v47, %v2948_v20 }
 0x274   : > { %2950 = vst [vmem:[%s4674_s30 + $0x1c] sm:$0x1] %v2949_v14  ;;  %v2831_v40 = vadd.f32 %v2830_v18, %v2829_v12 }
 0x276   : > { %v2863_v31 = vpack.c.bf16 %v2831_v40, %v2831_v40 }
 0x278   : > { %v2958_v7 = vsel %vm4103_vm3, %v2863_v31, %v2957_v17 }
 0x279   : > { %2959 = vst [vmem:[%s4674_s30 + $0x1f] sm:$0x1] %v2958_v7 }
 0x27a PF: > { %s18_s24 = sadd.s32 1, %s3697_s24  }
 0x27b   : > { %p15_p4 = scmp.ge.s32.totalorder %s18_s24, 4  }
 0x27d   :  { %17 = sbr.rel (!%p15_p4) target bundleno = 1 (0x1), region = 101 }

</bundles_post_ra>
